<compile_context>
chip_gen: v7x
topology: tpu7x:2x2x1
jax: 0.10.0
libtpu: 0.0.40
codegen_flags: <defaults>
</compile_context>

<pallas_src>
import functools

import jax
import jax.numpy as jnp
from jax.experimental import pallas as pl
from jax.experimental.pallas import tpu as pltpu


def _round_up(x, m):
    return -(-x // m) * m


def _slab_offsets(D, H2p, Hp):
    """Static row offsets of each weight matrix inside the packed weight slab."""
    Dr = _round_up(D, 8)
    offs = {"wpos": 0, "w0": Dr}
    row = Dr + H2p
    for name in ("w1t", "w1b", "w2t", "w2b", "w3t", "w3b", "wc"):
        offs[name] = row
        row += Hp
    offs["_rows"] = row
    return offs


# Rows of the packed f32 bias slab.
_B_POS, _B_0, _B_1, _B_2, _B_3, _B_C = range(6)


def pointnet_kernel(p_ref, w_ref, b_ref, out_ref, *,
                    tb, T, D, H2p, Hp, Cp, act_dtype):
    """One grid step == `tb` batch elements, flattened to (tb*T, .) matmuls."""
    rows = tb * T
    f32 = jnp.float32
    offs = _slab_offsets(D, H2p, Hp)

    def relu(x):
        return jnp.maximum(x, 0.0)

    def mm(x, w):
        # Operands in the weight dtype (bf16 by default), f32 MXU accumulation.
        return jnp.dot(x.astype(w.dtype), w, preferred_element_type=f32)

    def wslice(name, n_rows, n_cols):
        r = offs[name]                              # static ints -> free views
        return w_ref[r:r + n_rows, :n_cols]

    def brow(i, n_cols):
        return b_ref[i:i + 1, :n_cols]              # (1, n_cols) f32

    # ---- fc_pos: K = D = 3 contraction as D broadcast-FMAs on the VPU ------
    # (a K=3 MXU pass wastes the systolic array; the VPU does it for free)
    p = p_ref[...].astype(f32)                      # (rows, D)
    net = jnp.zeros((rows, H2p), f32)
    for d in range(D):                              # static unroll, D == 3
        w_row = w_ref[offs["wpos"] + d:offs["wpos"] + d + 1, :H2p].astype(f32)
        net = net + p[:, d:d + 1] * w_row
    net = net + brow(_B_POS, H2p)                   # (rows, H2p) f32

    # ---- fc_0 ---------------------------------------------------------------
    net = mm(relu(net), wslice("w0", H2p, Hp)) + brow(_B_0, Hp)
    net3 = net.astype(act_dtype).reshape(tb, T, Hp)  # tile-preserving (T % 8 == 0)

    # ---- fc_1/2/3: relu(cat([net, pooled])) @ W
    #            == relu(net) @ W[:H] + relu(mean(net)) @ W[H:]  (exact split)
    def pool_split_fc(net3, wt_name, wb_name, b_idx):
        pooled = jnp.mean(net3.astype(f32), axis=1)               # (tb, Hp)
        main = mm(relu(net3).reshape(rows, Hp), wslice(wt_name, Hp, Hp))
        main = main + brow(b_idx, Hp)                             # (rows, Hp) f32
        pooled_c = mm(relu(pooled), wslice(wb_name, Hp, Hp))      # (tb, Hp)  f32
        out3 = main.reshape(tb, T, Hp) + pooled_c[:, None, :]     # bcast over T
        return out3.astype(act_dtype)

    net3 = pool_split_fc(net3, "w1t", "w1b", _B_1)
    net3 = pool_split_fc(net3, "w2t", "w2b", _B_2)
    net3 = pool_split_fc(net3, "w3t", "w3b", _B_3)

    # ---- final mean-pool over points, then c = fc_c(relu(pooled)) -----------
    pooled = jnp.mean(net3.astype(f32), axis=1)                   # (tb, Hp)
    c = mm(relu(pooled), wslice("wc", Hp, Cp)) + brow(_B_C, Cp)   # (tb, Cp)
    out_ref[...] = c.astype(out_ref.dtype)


def _choose_tb(B, T):
    """Batch elements per grid step.

    Single grid step unless the per-step activation working set would get
    large (extra steps are pure overhead on single-TC v5e/v6e).  When
    splitting, keep >=256 rows per step (MXU M streaming) and an even step
    count (v7x megacore balance)."""
    rows = B * T
    max_rows = 2048
    if rows <= max_rows:
        return B                                   # one grid step
    tb = max(8, (max_rows // max(T, 1)) // 8 * 8)
    n_steps = -(-B // tb)
    if n_steps % 2:
        n_steps += 1                               # even step count for v7x
    tb = _round_up(-(-B // n_steps), 8)
    min_tb = _round_up(-(-256 // max(T, 1)), 8)    # >=256 rows per step
    return max(min(tb, B), min(min_tb, B))


def _pack_params(params, D, H, c_dim, weight_dtype):
    """Pack all weights into one slab and all biases into one f32 slab,
    zero-padding every feature dim up to a multiple of 128 lanes."""
    H2p = _round_up(2 * H, 128)
    Hp = _round_up(H, 128)
    Cp = _round_up(c_dim, 128)
    Wmax = max(H2p, Hp, Cp)
    offs = _slab_offsets(D, H2p, Hp)

    def padw(w, n_rows):
        return jnp.pad(w, ((0, n_rows - w.shape[0]), (0, Wmax - w.shape[1])))

    blocks = [
        padw(params["wpos"], _round_up(D, 8)),
        padw(params["w0"], H2p),
        padw(params["w1"][:H], Hp), padw(params["w1"][H:], Hp),
        padw(params["w2"][:H], Hp), padw(params["w2"][H:], Hp),
        padw(params["w3"][:H], Hp), padw(params["w3"][H:], Hp),
        padw(params["wc"], Hp),
    ]
    w_slab = jnp.concatenate(blocks, axis=0).astype(weight_dtype)
    assert w_slab.shape[0] == offs["_rows"]

    def padb(b):
        b = jnp.asarray(b, jnp.float32).reshape(1, -1)
        return jnp.pad(b, ((0, 0), (0, Wmax - b.shape[1])))

    b_rows = [padb(params[k]) for k in ("bpos", "b0", "b1", "b2", "b3", "bc")]
    b_slab = jnp.concatenate(
        b_rows + [jnp.zeros((2, Wmax), jnp.float32)], axis=0)  # pad to 8 rows
    return w_slab, b_slab, H2p, Hp, Cp


def _default_act_dtype():
    """bf16 elementwise chain on bf16-VPU chips (v6e/v7x); f32 on older gens."""
    try:
        kind = jax.devices()[0].device_kind.lower()
    except Exception:
        return jnp.float32
    if any(t in kind for t in ("v2", "v3", "v4", "v5")):
        return jnp.float32
    return jnp.bfloat16


def simple_pointnet_pallas(p, params, *, tb=None,
                           weight_dtype=jnp.bfloat16, act_dtype=None):
    B, T, D = p.shape
    H = params["w0"].shape[1]
    c_dim = params["wc"].shape[1]
    if act_dtype is None:
        act_dtype = _default_act_dtype()

    if tb is None:
        tb = _choose_tb(B, T)
    tb = max(1, min(tb, B))
    if tb != B and tb % 8 != 0:
        tb = B                                     # single full-batch step

    n_steps = -(-B // tb)
    B_pad = n_steps * tb
    if B_pad != B:
        p = jnp.pad(p, ((0, B_pad - B), (0, 0), (0, 0)))
    # Flatten on the host so every step sees one dense (tb*T, D) operand.
    p_flat = p.reshape(B_pad * T, D).astype(jnp.float32)

    w_slab, b_slab, H2p, Hp, Cp = _pack_params(params, D, H, c_dim, weight_dtype)

    kernel = functools.partial(pointnet_kernel, tb=tb, T=T, D=D,
                               H2p=H2p, Hp=Hp, Cp=Cp, act_dtype=act_dtype)

    out = pl.pallas_call(
        kernel,
        out_shape=jax.ShapeDtypeStruct((B_pad, Cp), jnp.float32),
        grid=(n_steps,),
        in_specs=[
            pl.BlockSpec((tb * T, D), lambda b: (b, 0)),
            # Packed parameter slabs: one DMA each, block index never changes.
            pl.BlockSpec(w_slab.shape, lambda b: (0, 0)),
            pl.BlockSpec(b_slab.shape, lambda b: (0, 0)),
        ],
        out_specs=pl.BlockSpec((tb, Cp), lambda b: (b, 0)),
        compiler_params=pltpu.CompilerParams(
            dimension_semantics=("parallel",),
            # Footprint is KBs at demo sizes; 32 MiB also covers hidden=128
            # configs and stays under v7x's 64 MiB physical VMEM.
            vmem_limit_bytes=32 * 1024 * 1024,
        ),
    )(p_flat, w_slab, b_slab)
    return out[:B, :c_dim]


def simple_pointnet_ref(p, params):
    """Pure-JAX reference mirroring the PyTorch forward exactly (f32)."""
    relu = lambda x: jnp.maximum(x, 0.0)

    def lin(x, w, b):
        return jnp.dot(x, w, precision="highest",
                       preferred_element_type=jnp.float32) + b

    net = lin(p, params["wpos"], params["bpos"])
    net = lin(relu(net), params["w0"], params["b0"])
    for wn, bn in (("w1", "b1"), ("w2", "b2"), ("w3", "b3")):
        pooled = jnp.mean(net, axis=1, keepdims=True)
        pooled = jnp.broadcast_to(pooled, net.shape)
        cat = jnp.concatenate([net, pooled], axis=2)
        net = lin(relu(cat), params[wn], params[bn])
    net = jnp.mean(net, axis=1)
    return lin(relu(net), params["wc"], params["bc"])


def init_params(key, dim=3, hidden_dim=32, c_dim=32):
    """Deterministic synthetic parameters; weights (in, out), biases (1, out)."""
    shapes = {
        "wpos": (dim, 2 * hidden_dim),
        "w0": (2 * hidden_dim, hidden_dim),
        "w1": (2 * hidden_dim, hidden_dim),
        "w2": (2 * hidden_dim, hidden_dim),
        "w3": (2 * hidden_dim, hidden_dim),
        "wc": (hidden_dim, c_dim),
    }
    params = {}
    keys = jax.random.split(key, 2 * len(shapes))
    for i, (name, shp) in enumerate(shapes.items()):
        params[name] = 0.1 * jax.random.normal(keys[2 * i], shp, jnp.float32)
        params["b" + name[1:]] = 0.1 * jax.random.normal(
            keys[2 * i + 1], (1, shp[1]), jnp.float32)
    return params


if __name__ == "__main__":
    B, T, D = 32, 8, 3
    hidden_dim, c_dim = 32, 32

    key = jax.random.PRNGKey(0)
    kp, kw = jax.random.split(key)
    p = jax.random.normal(kp, (B, T, D), jnp.float32)
    params = init_params(kw, dim=D, hidden_dim=hidden_dim, c_dim=c_dim)

    ref = simple_pointnet_ref(p, params)

    # Full-f32 path: validates the weight-split / padding / slab packing
    # restructuring exactly.
    out_f32 = jax.block_until_ready(
        simple_pointnet_pallas(p, params,
                               weight_dtype=jnp.float32, act_dtype=jnp.float32))
    assert out_f32.shape == (B, c_dim)
    err = float(jnp.max(jnp.abs(out_f32 - ref)))
    assert err < 5e-3, f"f32 path mismatch: max abs err {err}"

    # Default path: bf16 MXU operands (+ bf16 activation chain on v6e/v7x).
    out_lp = jax.block_until_ready(simple_pointnet_pallas(p, params))
    assert out_lp.shape == (B, c_dim)
    err = float(jnp.max(jnp.abs(out_lp - ref)))
    assert err < 5e-2, f"low-precision path mismatch: max abs err {err}"

    print("KERNEL_OK")
</pallas_src>

<mosaic_0001>
module attributes {stable_mosaic.version = 11 : i64} {
  func.func @pointnet_kernel(%arg0: i32, %arg1: memref<256x3xf32, #tpu.memory_space<vmem>>, %arg2: memref<1032x128xf32, #tpu.memory_space<vmem>>, %arg3: memref<8x128xf32, #tpu.memory_space<vmem>>, %arg4: memref<32x128xf32, #tpu.memory_space<vmem>>) attributes {dimension_semantics = [#tpu.dimension_semantics<parallel>], iteration_bounds = array<i64: 1>, scalar_prefetch = 0 : i64, scratch_operands = 0 : i64, tpu.core_type = #tpu.core_type<tc>, window_params = [{transform_indices = @transform_0, window_bounds = array<i64: 256, 3>}, {pipeline_mode = #tpu.pipeline_mode<synchronous>, transform_indices = @transform_1, window_bounds = array<i64: 1032, 128>}, {pipeline_mode = #tpu.pipeline_mode<synchronous>, transform_indices = @transform_2, window_bounds = array<i64: 8, 128>}, {transform_indices = @transform_3, window_bounds = array<i64: 32, 128>}]} {
    %c0 = arith.constant 0 : index
    %c0_0 = arith.constant 0 : index
    %0 = vector.load %arg1[%c0, %c0_0] : memref<256x3xf32, #tpu.memory_space<vmem>>, vector<256x3xf32>
    %cst = arith.constant 0.000000e+00 : f32
    %1 = vector.broadcast %cst : f32 to vector<256x128xf32>
    %c0_1 = arith.constant 0 : index
    %c0_2 = arith.constant 0 : index
    %2 = vector.load %arg2[%c0_1, %c0_2] : memref<1032x128xf32, #tpu.memory_space<vmem>>, vector<1x128xf32>
    %3 = vector.extract_strided_slice %0 {offsets = [0, 0], sizes = [256, 1], strides = [1, 1]} : vector<256x3xf32> to vector<256x1xf32>
    %4 = vector.broadcast %3 : vector<256x1xf32> to vector<256x128xf32>
    %5 = vector.broadcast %2 : vector<1x128xf32> to vector<256x128xf32>
    %6 = arith.mulf %4, %5 : vector<256x128xf32>
    %7 = arith.addf %1, %6 : vector<256x128xf32>
    %c1 = arith.constant 1 : index
    %c0_3 = arith.constant 0 : index
    %8 = vector.load %arg2[%c1, %c0_3] : memref<1032x128xf32, #tpu.memory_space<vmem>>, vector<1x128xf32>
    %9 = vector.extract_strided_slice %0 {offsets = [0, 1], sizes = [256, 1], strides = [1, 1]} : vector<256x3xf32> to vector<256x1xf32>
    %10 = vector.broadcast %9 : vector<256x1xf32> to vector<256x128xf32>
    %11 = vector.broadcast %8 : vector<1x128xf32> to vector<256x128xf32>
    %12 = arith.mulf %10, %11 : vector<256x128xf32>
    %13 = arith.addf %7, %12 : vector<256x128xf32>
    %c2 = arith.constant 2 : index
    %c0_4 = arith.constant 0 : index
    %14 = vector.load %arg2[%c2, %c0_4] : memref<1032x128xf32, #tpu.memory_space<vmem>>, vector<1x128xf32>
    %15 = vector.extract_strided_slice %0 {offsets = [0, 2], sizes = [256, 1], strides = [1, 1]} : vector<256x3xf32> to vector<256x1xf32>
    %16 = vector.broadcast %15 : vector<256x1xf32> to vector<256x128xf32>
    %17 = vector.broadcast %14 : vector<1x128xf32> to vector<256x128xf32>
    %18 = arith.mulf %16, %17 : vector<256x128xf32>
    %19 = arith.addf %13, %18 : vector<256x128xf32>
    %c0_5 = arith.constant 0 : index
    %c0_6 = arith.constant 0 : index
    %20 = vector.load %arg3[%c0_5, %c0_6] : memref<8x128xf32, #tpu.memory_space<vmem>>, vector<1x128xf32>
    %21 = vector.broadcast %20 : vector<1x128xf32> to vector<256x128xf32>
    %22 = arith.addf %19, %21 : vector<256x128xf32>
    %cst_7 = arith.constant 0.000000e+00 : f32
    %23 = vector.broadcast %cst_7 : f32 to vector<256x128xf32>
    %24 = arith.maximumf %22, %23 : vector<256x128xf32>
    %c8 = arith.constant 8 : index
    %c0_8 = arith.constant 0 : index
    %25 = vector.load %arg2[%c8, %c0_8] : memref<1032x128xf32, #tpu.memory_space<vmem>>, vector<128x128xf32>
    %cst_9 = arith.constant dense<0.000000e+00> : vector<256x128xf32>
    %26 = tpu.matmul %24, %25, %cst_9 {dimension_numbers = #tpu.dot_dimension_numbers<[1], [0], [0], [1], [0, 0, 1, 1], [], []>} : vector<256x128xf32>, vector<128x128xf32>, vector<256x128xf32> -> vector<256x128xf32>
    %c1_10 = arith.constant 1 : index
    %c0_11 = arith.constant 0 : index
    %27 = vector.load %arg3[%c1_10, %c0_11] : memref<8x128xf32, #tpu.memory_space<vmem>>, vector<1x128xf32>
    %28 = vector.broadcast %27 : vector<1x128xf32> to vector<256x128xf32>
    %29 = arith.addf %26, %28 : vector<256x128xf32>
    %30 = vector.shape_cast %29 : vector<256x128xf32> to vector<32x8x128xf32>
    %cst_12 = arith.constant dense<0.000000e+00> : vector<32x128xf32>
    %31 = vector.multi_reduction <add>, %30, %cst_12 [1] : vector<32x8x128xf32> to vector<32x128xf32>
    %cst_13 = arith.constant 8.000000e+00 : f32
    %32 = vector.broadcast %cst_13 : f32 to vector<32x128xf32>
    %33 = arith.divf %31, %32 : vector<32x128xf32>
    %cst_14 = arith.constant 0.000000e+00 : f32
    %34 = vector.broadcast %cst_14 : f32 to vector<32x8x128xf32>
    %35 = arith.maximumf %30, %34 : vector<32x8x128xf32>
    %36 = vector.shape_cast %35 : vector<32x8x128xf32> to vector<256x128xf32>
    %c136 = arith.constant 136 : index
    %c0_15 = arith.constant 0 : index
    %37 = vector.load %arg2[%c136, %c0_15] : memref<1032x128xf32, #tpu.memory_space<vmem>>, vector<128x128xf32>
    %cst_16 = arith.constant dense<0.000000e+00> : vector<256x128xf32>
    %38 = tpu.matmul %36, %37, %cst_16 {dimension_numbers = #tpu.dot_dimension_numbers<[1], [0], [0], [1], [0, 0, 1, 1], [], []>} : vector<256x128xf32>, vector<128x128xf32>, vector<256x128xf32> -> vector<256x128xf32>
    %c2_17 = arith.constant 2 : index
    %c0_18 = arith.constant 0 : index
    %39 = vector.load %arg3[%c2_17, %c0_18] : memref<8x128xf32, #tpu.memory_space<vmem>>, vector<1x128xf32>
    %40 = vector.broadcast %39 : vector<1x128xf32> to vector<256x128xf32>
    %41 = arith.addf %38, %40 : vector<256x128xf32>
    %cst_19 = arith.constant 0.000000e+00 : f32
    %42 = vector.broadcast %cst_19 : f32 to vector<32x128xf32>
    %43 = arith.maximumf %33, %42 : vector<32x128xf32>
    %c264 = arith.constant 264 : index
    %c0_20 = arith.constant 0 : index
    %44 = vector.load %arg2[%c264, %c0_20] : memref<1032x128xf32, #tpu.memory_space<vmem>>, vector<128x128xf32>
    %cst_21 = arith.constant dense<0.000000e+00> : vector<32x128xf32>
    %45 = tpu.matmul %43, %44, %cst_21 {dimension_numbers = #tpu.dot_dimension_numbers<[1], [0], [0], [1], [0, 0, 1, 1], [], []>} : vector<32x128xf32>, vector<128x128xf32>, vector<32x128xf32> -> vector<32x128xf32>
    %46 = vector.shape_cast %41 : vector<256x128xf32> to vector<32x8x128xf32>
    %47 = vector.shape_cast %45 : vector<32x128xf32> to vector<32x1x128xf32>
    %48 = vector.broadcast %47 : vector<32x1x128xf32> to vector<32x8x128xf32>
    %49 = arith.addf %46, %48 : vector<32x8x128xf32>
    %cst_22 = arith.constant dense<0.000000e+00> : vector<32x128xf32>
    %50 = vector.multi_reduction <add>, %49, %cst_22 [1] : vector<32x8x128xf32> to vector<32x128xf32>
    %cst_23 = arith.constant 8.000000e+00 : f32
    %51 = vector.broadcast %cst_23 : f32 to vector<32x128xf32>
    %52 = arith.divf %50, %51 : vector<32x128xf32>
    %cst_24 = arith.constant 0.000000e+00 : f32
    %53 = vector.broadcast %cst_24 : f32 to vector<32x8x128xf32>
    %54 = arith.maximumf %49, %53 : vector<32x8x128xf32>
    %55 = vector.shape_cast %54 : vector<32x8x128xf32> to vector<256x128xf32>
    %c392 = arith.constant 392 : index
    %c0_25 = arith.constant 0 : index
    %56 = vector.load %arg2[%c392, %c0_25] : memref<1032x128xf32, #tpu.memory_space<vmem>>, vector<128x128xf32>
    %cst_26 = arith.constant dense<0.000000e+00> : vector<256x128xf32>
    %57 = tpu.matmul %55, %56, %cst_26 {dimension_numbers = #tpu.dot_dimension_numbers<[1], [0], [0], [1], [0, 0, 1, 1], [], []>} : vector<256x128xf32>, vector<128x128xf32>, vector<256x128xf32> -> vector<256x128xf32>
    %c3 = arith.constant 3 : index
    %c0_27 = arith.constant 0 : index
    %58 = vector.load %arg3[%c3, %c0_27] : memref<8x128xf32, #tpu.memory_space<vmem>>, vector<1x128xf32>
    %59 = vector.broadcast %58 : vector<1x128xf32> to vector<256x128xf32>
    %60 = arith.addf %57, %59 : vector<256x128xf32>
    %cst_28 = arith.constant 0.000000e+00 : f32
    %61 = vector.broadcast %cst_28 : f32 to vector<32x128xf32>
    %62 = arith.maximumf %52, %61 : vector<32x128xf32>
    %c520 = arith.constant 520 : index
    %c0_29 = arith.constant 0 : index
    %63 = vector.load %arg2[%c520, %c0_29] : memref<1032x128xf32, #tpu.memory_space<vmem>>, vector<128x128xf32>
    %cst_30 = arith.constant dense<0.000000e+00> : vector<32x128xf32>
    %64 = tpu.matmul %62, %63, %cst_30 {dimension_numbers = #tpu.dot_dimension_numbers<[1], [0], [0], [1], [0, 0, 1, 1], [], []>} : vector<32x128xf32>, vector<128x128xf32>, vector<32x128xf32> -> vector<32x128xf32>
    %65 = vector.shape_cast %60 : vector<256x128xf32> to vector<32x8x128xf32>
    %66 = vector.shape_cast %64 : vector<32x128xf32> to vector<32x1x128xf32>
    %67 = vector.broadcast %66 : vector<32x1x128xf32> to vector<32x8x128xf32>
    %68 = arith.addf %65, %67 : vector<32x8x128xf32>
    %cst_31 = arith.constant dense<0.000000e+00> : vector<32x128xf32>
    %69 = vector.multi_reduction <add>, %68, %cst_31 [1] : vector<32x8x128xf32> to vector<32x128xf32>
    %cst_32 = arith.constant 8.000000e+00 : f32
    %70 = vector.broadcast %cst_32 : f32 to vector<32x128xf32>
    %71 = arith.divf %69, %70 : vector<32x128xf32>
    %cst_33 = arith.constant 0.000000e+00 : f32
    %72 = vector.broadcast %cst_33 : f32 to vector<32x8x128xf32>
    %73 = arith.maximumf %68, %72 : vector<32x8x128xf32>
    %74 = vector.shape_cast %73 : vector<32x8x128xf32> to vector<256x128xf32>
    %c648 = arith.constant 648 : index
    %c0_34 = arith.constant 0 : index
    %75 = vector.load %arg2[%c648, %c0_34] : memref<1032x128xf32, #tpu.memory_space<vmem>>, vector<128x128xf32>
    %cst_35 = arith.constant dense<0.000000e+00> : vector<256x128xf32>
    %76 = tpu.matmul %74, %75, %cst_35 {dimension_numbers = #tpu.dot_dimension_numbers<[1], [0], [0], [1], [0, 0, 1, 1], [], []>} : vector<256x128xf32>, vector<128x128xf32>, vector<256x128xf32> -> vector<256x128xf32>
    %c4 = arith.constant 4 : index
    %c0_36 = arith.constant 0 : index
    %77 = vector.load %arg3[%c4, %c0_36] : memref<8x128xf32, #tpu.memory_space<vmem>>, vector<1x128xf32>
    %78 = vector.broadcast %77 : vector<1x128xf32> to vector<256x128xf32>
    %79 = arith.addf %76, %78 : vector<256x128xf32>
    %cst_37 = arith.constant 0.000000e+00 : f32
    %80 = vector.broadcast %cst_37 : f32 to vector<32x128xf32>
    %81 = arith.maximumf %71, %80 : vector<32x128xf32>
    %c776 = arith.constant 776 : index
    %c0_38 = arith.constant 0 : index
    %82 = vector.load %arg2[%c776, %c0_38] : memref<1032x128xf32, #tpu.memory_space<vmem>>, vector<128x128xf32>
    %cst_39 = arith.constant dense<0.000000e+00> : vector<32x128xf32>
    %83 = tpu.matmul %81, %82, %cst_39 {dimension_numbers = #tpu.dot_dimension_numbers<[1], [0], [0], [1], [0, 0, 1, 1], [], []>} : vector<32x128xf32>, vector<128x128xf32>, vector<32x128xf32> -> vector<32x128xf32>
    %84 = vector.shape_cast %79 : vector<256x128xf32> to vector<32x8x128xf32>
    %85 = vector.shape_cast %83 : vector<32x128xf32> to vector<32x1x128xf32>
    %86 = vector.broadcast %85 : vector<32x1x128xf32> to vector<32x8x128xf32>
    %87 = arith.addf %84, %86 : vector<32x8x128xf32>
    %cst_40 = arith.constant dense<0.000000e+00> : vector<32x128xf32>
    %88 = vector.multi_reduction <add>, %87, %cst_40 [1] : vector<32x8x128xf32> to vector<32x128xf32>
    %cst_41 = arith.constant 8.000000e+00 : f32
    %89 = vector.broadcast %cst_41 : f32 to vector<32x128xf32>
    %90 = arith.divf %88, %89 : vector<32x128xf32>
    %cst_42 = arith.constant 0.000000e+00 : f32
    %91 = vector.broadcast %cst_42 : f32 to vector<32x128xf32>
    %92 = arith.maximumf %90, %91 : vector<32x128xf32>
    %c904 = arith.constant 904 : index
    %c0_43 = arith.constant 0 : index
    %93 = vector.load %arg2[%c904, %c0_43] : memref<1032x128xf32, #tpu.memory_space<vmem>>, vector<128x128xf32>
    %cst_44 = arith.constant dense<0.000000e+00> : vector<32x128xf32>
    %94 = tpu.matmul %92, %93, %cst_44 {dimension_numbers = #tpu.dot_dimension_numbers<[1], [0], [0], [1], [0, 0, 1, 1], [], []>} : vector<32x128xf32>, vector<128x128xf32>, vector<32x128xf32> -> vector<32x128xf32>
    %c5 = arith.constant 5 : index
    %c0_45 = arith.constant 0 : index
    %95 = vector.load %arg3[%c5, %c0_45] : memref<8x128xf32, #tpu.memory_space<vmem>>, vector<1x128xf32>
    %96 = vector.broadcast %95 : vector<1x128xf32> to vector<32x128xf32>
    %97 = arith.addf %94, %96 : vector<32x128xf32>
    %c0_46 = arith.constant 0 : index
    %c0_47 = arith.constant 0 : index
    %98 = vector.load %arg4[%c0_46, %c0_47] : memref<32x128xf32, #tpu.memory_space<vmem>>, vector<32x128xf32>
    tpu.vector_store %arg4[%c0_46, %c0_47], %97 {strides = array<i32>} : memref<32x128xf32, #tpu.memory_space<vmem>>, vector<32x128xf32>,
    return
  }
  func.func @transform_0(%arg0: i32) -> (i32, i32) {
    %c0_i32 = arith.constant 0 : i32
    %c0_i32_0 = arith.constant 0 : i32
    return %arg0, %c0_i32 : i32, i32
  }
  func.func @transform_1(%arg0: i32) -> (i32, i32) {
    %c0_i32 = arith.constant 0 : i32
    %c0_i32_0 = arith.constant 0 : i32
    %c0_i32_1 = arith.constant 0 : i32
    return %c0_i32, %c0_i32_0 : i32, i32
  }
  func.func @transform_2(%arg0: i32) -> (i32, i32) {
    %c0_i32 = arith.constant 0 : i32
    %c0_i32_0 = arith.constant 0 : i32
    %c0_i32_1 = arith.constant 0 : i32
    return %c0_i32, %c0_i32_0 : i32, i32
  }
  func.func @transform_3(%arg0: i32) -> (i32, i32) {
    %c0_i32 = arith.constant 0 : i32
    %c0_i32_0 = arith.constant 0 : i32
    return %arg0, %c0_i32 : i32, i32
  }
}

</mosaic_0001>

<bundles_post_ra>
// kernel: tpu_custom_call.1
= control target key start
LH: loop header
LB: loop body
LE: loop exit
PB: predicated region body
PF: predicated region fallthrough
CT: control target
= control target key end

     0   :  { %8 = vsyncpa [#allocation3], 0  ;;  %s7384_s0 = inlined_call_operand.vmem [shape: f32[256,3], index: 0, kind: input, shape index: {}]   ;;  %s7385_s1 = inlined_call_operand.hbm [shape: f32[1032,128], index: 1, kind: input, shape index: {}]   ;;  %s7386_s2 = inlined_call_operand.vmem [shape: f32[8,128], index: 2, kind: input, shape index: {}]   ;;  %s7387_s3 = inlined_call_operand.hbm [shape: f32[32,128], index: 3, kind: output, shape index: {}]  }
   0x1   :  { %9 = vsyncpa [#allocation4], 0  ;;  %s5845_s12 = smov [#allocation2]   ;;  %s5797_s16 = scalar_lea.hbm %s7385_s1, 16512 }
   0x2   :  { %s17_s13 = sshll.u32 %s5845_s12, 4  ;;  %p5798_p0 = scmp.ne.s32.totalorder %s7385_s1, %s5797_s16  ;;  %s18_s13 = int_to_ptr.vmem [resolvable:$true] %s17_s13 }
   0x3   :  { %p5801_p1 = scmp.lt.u32.totalorder %s5797_s16, %s7385_s1 }
   0x5   :  { %p5803_p2 = pnand %p5801_p1, %p5798_p0 }
   0x7   :  { %5806 = shalt.err (!%p5803_p2)
}
   0x8   :  { %s5807_s21 = scalar_lea.vmem %s18_s13, 16512  ;;  %p5812_p4 = scmp.lt.s32.totalorder %s18_s13, %s18_s13 }
   0x9   :  { %p5808_p3 = scmp.ne.s32.totalorder %s18_s13, %s5807_s21  ;;  %p5813_p5 = scmp.lt.s32.totalorder %s5807_s21, %s5807_s21 }
   0xb   :  { %p5814_p6 = por %p5813_p5, %p5812_p4 }
   0xd   :  { %p5815_p7 = pnand %p5814_p6, %p5808_p3 }
   0xf   :  { %5818 = shalt.err (!%p5815_p7)
}
  0x10   :  { %s5846_s22 = smov 128   ;;  %s5847_s23 = smov 8  }
  0x11   :  { %23 = dma.hbm_to_vmem [thread:$0]  %s7385_s1, 16512, %s18_s13, [#allocation3], %s5846_s22, %s5846_s22, %s5847_s23  }
  0x12   :  { %5841 = dma.done.wait [#allocation3], 16512  }
  0x13   :  { %5842 = vsyncadd [#allocation3], 4294950784  ;;  %v5848_v0 = vmov 0   ;;  %v5893_v1 = vld [vmem:[%s7384_s0 + $0x8] sm:$0xff]  ;;  %v29_v2 = vld [vmem:[%s7384_s0] sm:$0xff]  ;;  %v5849_v3 = vmov 1  }
  0x14   :  { %5746 = vset.pattern.permute.xlu1 %v5848_v0  ;;  %5744 = vset.pattern.permute.xlu0 %v5848_v0  ;;  %v5905_v4 = vld [vmem:[%s7384_s0 + $0x18] sm:$0xff]  ;;  %v5850_v5 = vmov 2   ;;  %v5913_v6 = vld [vmem:[%s7384_s0 + $0x28] sm:$0xff]  ;;  %v31_v7 = vld [vmem:[%s7384_s0 + $0x10] sm:$0xff]  ;;  %vm1582_vm0 = vcmask 1041409   ;;  %vm1584_vm1 = vcmask 1042434  }
  0x15   :  { %69 = vperm.xlu1 %5746, %v5893_v1   ;;  %64 = vperm.xlu0 %5744, %v29_v2   ;;  %v5923_v8 = vld [vmem:[%s7384_s0 + $0x38] sm:$0xff]  ;;  %v5930_v9 = vld [vmem:[%s7384_s0 + $0x48] sm:$0xff]  ;;  %v33_v12 = vld [vmem:[%s7384_s0 + $0x20] sm:$0xff]  ;;  %vm1586_vm2 = vcmask 1043459   ;;  %vm1588_vm3 = vcmask 1044484   ;;  %vm1590_vm4 = vcmask 1045509  }
  0x16   :  { %v5936_v10 = vld [vmem:[%s7384_s0 + $0x58] sm:$0xff]  ;;  %v5943_v11 = vld [vmem:[%s7384_s0 + $0x68] sm:$0xff]  ;;  %v753_v17 = vld [vmem:[#allocation2 + $0x8] sm:$0xff]  ;;  %vm1592_vm5 = vcmask 1046534   ;;  %vm1594_vm6 = vcmask 1047559   ;;  %s5852_s25 = smov [#allocation5]  }
  0x17   :  { %v5953_v13 = vld [vmem:[%s7384_s0 + $0x78] sm:$0xff]  ;;  %v5960_v14 = vld [vmem:[%s7384_s0 + $0x88] sm:$0xff]  ;;  %v755_v21 = vld [vmem:[#allocation2 + $0x18] sm:$0xff]  ;;  %s4715_s26 = sshll.u32 %s5852_s25, 4  ;;  %s4716_s26 = int_to_ptr.vmem [resolvable:$true] %s4715_s26 }
  0x18   :  { %v5967_v15 = vld [vmem:[%s7384_s0 + $0x98] sm:$0xff]  ;;  %v5974_v16 = vld [vmem:[%s7384_s0 + $0xa8] sm:$0xff]  ;;  %v35_v24 = vld [vmem:[%s7384_s0 + $0x30] sm:$0xff]  ;;  %s5819_s27 = scalar_lea.vmem %s4716_s26, 512  ;;  %p5824_p9 = scmp.lt.s32.totalorder %s4716_s26, %s4716_s26 }
  0x19   :  { %5747 = vset.pattern.permute.xlu1 %v5849_v3  ;;  %5745 = vset.pattern.permute.xlu0 %v5849_v3  ;;  %v754_v18 = vld [vmem:[#allocation2 + $0x10] sm:$0xff]  ;;  %v756_v22 = vld [vmem:[#allocation2 + $0x20] sm:$0xff]  ;;  %v757_v26 = vld [vmem:[#allocation2 + $0x28] sm:$0xff]  ;;  %p5820_p8 = scmp.ne.s32.totalorder %s4716_s26, %s5819_s27  ;;  %p5825_p10 = scmp.lt.s32.totalorder %s5819_s27, %s5819_s27 }
  0x1a   :  { %296 = vperm.xlu1 %5747, %v5893_v1   ;;  %292 = vperm.xlu0 %5745, %v29_v2   ;;  %v5480_v19 = vpack.c.bf16 %v754_v18, %v753_v17  ;;  %v5981_v20 = vld [vmem:[%s7384_s0 + $0xb8] sm:$0xff]  ;;  %v5484_v23 = vpack.c.bf16 %v756_v22, %v755_v21  ;;  %v5990_v25 = vld [vmem:[%s7384_s0 + $0xc8] sm:$0xff]  ;;  %v759_v30 = vld [vmem:[#allocation2 + $0x38] sm:$0xff] }
  0x1b   :  { %v758_v27 = vld [vmem:[#allocation2 + $0x30] sm:$0xff]  ;;  %v760_v31 = vld [vmem:[#allocation2 + $0x40] sm:$0xff]  ;;  %v761_v34 = vld [vmem:[#allocation2 + $0x48] sm:$0xff]  ;;  %p5826_p11 = por %p5825_p10, %p5824_p9 }
  0x1c   :  { %5481 = vmatprep.subr.bf16.mxu0 %v5480_v19  ;;  %v5488_v28 = vpack.c.bf16 %v758_v27, %v757_v26  ;;  %v5997_v29 = vld [vmem:[%s7384_s0 + $0xd8] sm:$0xff]  ;;  %v5492_v32 = vpack.c.bf16 %v760_v31, %v759_v30  ;;  %v6004_v33 = vld [vmem:[%s7384_s0 + $0xe8] sm:$0xff]  ;;  %v763_v38 = vld [vmem:[#allocation2 + $0x58] sm:$0xff] }
  0x1d   :  { %5483 = vmatpush3.bf16.msra.mxu0 %v5480_v19  ;;  %v762_v35 = vld [vmem:[#allocation2 + $0x50] sm:$0xff]  ;;  %v764_v39 = vld [vmem:[#allocation2 + $0x60] sm:$0xff]  ;;  %v765_v41 = vld [vmem:[#allocation2 + $0x68] sm:$0xff]  ;;  %p5827_p12 = pnand %p5826_p11, %p5820_p8 }
  0x1e   :  { %5748 = vset.pattern.permute.xlu1 %v5850_v5  ;;  %5751 = vset.pattern.permute.xlu0 %v5848_v0  ;;  %v5496_v36 = vpack.c.bf16 %v762_v35, %v761_v34  ;;  %v6011_v37 = vld [vmem:[%s7384_s0 + $0xf8] sm:$0xff]  ;;  %v5500_v40 = vpack.c.bf16 %v764_v39, %v763_v38  ;;  %v37_v43 = vld [vmem:[%s7384_s0 + $0x40] sm:$0xff]  ;;  %v768_v46 = vld [vmem:[#allocation2 + $0x80] sm:$0xff] }
  0x1f   :  { %489 = vperm.xlu1 %5748, %v29_v2   ;;  %79 = vperm.xlu0 %5751, %v5905_v4   ;;  %v766_v42 = vld [vmem:[#allocation2 + $0x70] sm:$0xff]  ;;  %v767_v45 = vld [vmem:[#allocation2 + $0x78] sm:$0xff]  ;;  %v39_v48 = vld [vmem:[%s7384_s0 + $0x50] sm:$0xff] }
  0x20   :  { %5485 = vmatprep.subr.bf16.mxu0 %v5484_v23  ;;  %v5504_v44 = vpack.c.bf16 %v766_v42, %v765_v41  ;;  %v5508_v47 = vpack.c.bf16 %v768_v46, %v767_v45  ;;  %v41_v49 = vld [vmem:[%s7384_s0 + $0x60] sm:$0xff]  ;;  %v43_v50 = vld [vmem:[%s7384_s0 + $0x70] sm:$0xff]  ;;  %v6058_v53 = vld [vmem:[#allocation2] ss:$0 sm:$0xff] }
  0x21   :  { %5487 = vmatpush3.bf16.msra.mxu0 %v5484_v23  ;;  %v6062_v55 = vld [vmem:[#allocation2 + $0x1] ss:$0 sm:$0xff]  ;;  %v6068_v59 = vld [vmem:[#allocation2 + $0x2] ss:$0 sm:$0xff]  ;;  %v47_v23 = vld [vmem:[%s7384_s0 + $0x90] sm:$0xff] }
  0x22   :  { %5489 = vmatprep.subr.bf16.mxu0 %v5488_v28  ;;  %v49_v35 = vld [vmem:[%s7384_s0 + $0xa0] sm:$0xff] }
  0x23   :  { %5749 = vset.pattern.permute.xlu1 %v5848_v0  ;;  %89 = vperm.xlu0 %5751, %v5913_v6  }
  0x24   :  { %74 = vperm.xlu1 %5749, %v31_v7  }
  0x25   :  { %5491 = vmatpush3.bf16.msra.mxu0 %v5488_v28 }
  0x26   :  { %5493 = vmatprep.subr.bf16.mxu0 %v5492_v32 }
  0x27   :  { %99 = vperm.xlu0 %5751, %v5923_v8  }
  0x28   :  { %5750 = vset.pattern.permute.xlu1 %v5849_v3 }
  0x29   :  { %300 = vperm.xlu1 %5750, %v31_v7   ;;  %5495 = vmatpush3.bf16.msra.mxu0 %v5492_v32 }
  0x2a   :  { %5497 = vmatprep.subr.bf16.mxu0 %v5496_v36 }
  0x2b   :  { %109 = vperm.xlu0 %5751, %v5930_v9  }
  0x2d   :  { %304 = vperm.xlu1 %5750, %v5905_v4   ;;  %5499 = vmatpush3.bf16.msra.mxu0 %v5496_v36 }
  0x2e   :  { %5501 = vmatprep.subr.bf16.mxu0 %v5500_v40 }
  0x2f   :  { %119 = vperm.xlu0 %5751, %v5936_v10  }
  0x31   :  { %5752 = vset.pattern.permute.xlu1 %v5850_v5  ;;  %5503 = vmatpush3.bf16.msra.mxu0 %v5500_v40 }
  0x32   :  { %497 = vperm.xlu1 %5752, %v31_v7   ;;  %5505 = vmatprep.subr.bf16.mxu0 %v5504_v44 }
  0x33   :  { %129 = vperm.xlu0 %5751, %v5943_v11  }
  0x35   :  { %5507 = vmatpush3.bf16.msra.mxu0 %v5504_v44 }
  0x36   :  { %5753 = vset.pattern.permute.xlu1 %v5848_v0  ;;  %5509 = vmatprep.subr.bf16.mxu0 %v5508_v47 }
  0x37   :  { %84 = vperm.xlu1 %5753, %v33_v12   ;;  %139 = vperm.xlu0 %5751, %v5953_v13  }
  0x39   :  { %5511 = vmatpush3.bf16.msra.mxu0 %v5508_v47 }
  0x3b   :  { %5754 = vset.pattern.permute.xlu1 %v5849_v3  ;;  %149 = vperm.xlu0 %5751, %v5960_v14  }
  0x3c   :  { %308 = vperm.xlu1 %5754, %v33_v12  }
  0x3f   :  { %159 = vperm.xlu0 %5751, %v5967_v15  }
  0x40   :  { %312 = vperm.xlu1 %5754, %v5913_v6  }
  0x43   :  { %169 = vperm.xlu0 %5751, %v5974_v16  }
  0x44   :  { %5755 = vset.pattern.permute.xlu1 %v5850_v5 }
  0x45   :  { %505 = vperm.xlu1 %5755, %v33_v12  }
  0x47   :  { %179 = vperm.xlu0 %5751, %v5981_v20  }
  0x49   :  { %5756 = vset.pattern.permute.xlu1 %v5848_v0 }
  0x4a   :  { %94 = vperm.xlu1 %5756, %v35_v24  }
  0x4b   :  { %189 = vperm.xlu0 %5751, %v5990_v25  }
  0x4e   :  { %5757 = vset.pattern.permute.xlu1 %v5849_v3 }
  0x4f   :  { %316 = vperm.xlu1 %5757, %v35_v24   ;;  %199 = vperm.xlu0 %5751, %v5997_v29  }
  0x53   :  { %320 = vperm.xlu1 %5757, %v5923_v8   ;;  %209 = vperm.xlu0 %5751, %v6004_v33  }
  0x57   :  { %5758 = vset.pattern.permute.xlu1 %v5850_v5  ;;  %219 = vperm.xlu0 %5751, %v6011_v37  }
  0x58   :  { %513 = vperm.xlu1 %5758, %v35_v24  }
  0x5b   :  { %5794 = vset.pattern.permute.xlu0 %v5850_v5 }
  0x5c   :  { %5759 = vset.pattern.permute.xlu1 %v5848_v0  ;;  %493 = vperm.xlu0 %5794, %v5893_v1   ;;  %v6077_v1 = vld [vmem:[%s7386_s2] ss:$0 sm:$0xff] }
  0x5d   :  { %104 = vperm.xlu1 %5759, %v37_v43  }
  0x60   :  { %501 = vperm.xlu0 %5794, %v5905_v4  }
  0x61   :  { %5760 = vset.pattern.permute.xlu1 %v5849_v3 }
  0x62   :  { %324 = vperm.xlu1 %5760, %v37_v43  }
  0x64   :  { %509 = vperm.xlu0 %5794, %v5913_v6  }
  0x66   :  { %328 = vperm.xlu1 %5760, %v5930_v9  }
  0x68   :  { %517 = vperm.xlu0 %5794, %v5923_v8  }
  0x6a   :  { %5761 = vset.pattern.permute.xlu1 %v5850_v5 }
  0x6b   :  { %521 = vperm.xlu1 %5761, %v37_v43  }
  0x6c   :  { %525 = vperm.xlu0 %5794, %v5930_v9  }
  0x6f   :  { %5762 = vset.pattern.permute.xlu1 %v5848_v0 }
  0x70   :  { %114 = vperm.xlu1 %5762, %v39_v48   ;;  %533 = vperm.xlu0 %5794, %v5936_v10  }
  0x74   :  { %5763 = vset.pattern.permute.xlu1 %v5849_v3  ;;  %541 = vperm.xlu0 %5794, %v5943_v11  }
  0x75   :  { %332 = vperm.xlu1 %5763, %v39_v48  }
  0x78   :  { %549 = vperm.xlu0 %5794, %v5953_v13  }
  0x79   :  { %336 = vperm.xlu1 %5763, %v5936_v10   ;;  %v45_v10 = vld [vmem:[%s7384_s0 + $0x80] sm:$0xff] }
  0x7c   :  { %557 = vperm.xlu0 %5794, %v5960_v14  }
  0x7d   :  { %5764 = vset.pattern.permute.xlu1 %v5850_v5 }
  0x7e   :  { %529 = vperm.xlu1 %5764, %v39_v48  }
  0x80   :  { %565 = vperm.xlu0 %5794, %v5967_v15  }
  0x82   :  { %5765 = vset.pattern.permute.xlu1 %v5848_v0 }
  0x83   :  { %124 = vperm.xlu1 %5765, %v41_v49  }
  0x84   :  { %573 = vperm.xlu0 %5794, %v5974_v16  }
  0x87   :  { %5766 = vset.pattern.permute.xlu1 %v5849_v3 }
  0x88   :  { %340 = vperm.xlu1 %5766, %v41_v49   ;;  %581 = vperm.xlu0 %5794, %v5981_v20  }
  0x8c   :  { %344 = vperm.xlu1 %5766, %v5943_v11   ;;  %589 = vperm.xlu0 %5794, %v5990_v25  }
  0x90   :  { %5767 = vset.pattern.permute.xlu1 %v5850_v5  ;;  %597 = vperm.xlu0 %5794, %v5997_v29  }
  0x91   :  { %537 = vperm.xlu1 %5767, %v41_v49  }
  0x94   :  { %v6054_v51 = vpop.permute.xlu1 %69  ;;  %v65_v52 = vpop.permute.xlu0 %64  ;;  %605 = vperm.xlu0 %5794, %v6004_v33  }
  0x95   :  { %5768 = vset.pattern.permute.xlu1 %v5848_v0  ;;  %v226_v54 = vmul.f32 %v6058_v53, %v65_v52  ;;  %v227_v48 = vmul.f32 %v6058_v53, %v6054_v51 }
  0x96   :  { %134 = vperm.xlu1 %5768, %v43_v50  }
  0x98   :  { %613 = vperm.xlu0 %5794, %v6011_v37  }
  0x99   :  { %v6064_v56 = vpop.permute.xlu1 %296  ;;  %v293_v57 = vpop.permute.xlu0 %292 }
  0x9a   :  { %5769 = vset.pattern.permute.xlu1 %v5849_v3  ;;  %v423_v58 = vmul.f32 %v6062_v55, %v293_v57  ;;  %v424_v45 = vmul.f32 %v6062_v55, %v6064_v56 }
  0x9b   :  { %348 = vperm.xlu1 %5769, %v43_v50  }
  0x9c   :  { %v455_v60 = vadd.f32 %v423_v58, %v226_v54  ;;  %v456_v57 = vadd.f32 %v424_v45, %v227_v48 }
  0x9e   :  { %v490_v61 = vpop.permute.xlu1 %489  ;;  %v6070_v62 = vpop.permute.xlu0 %79 }
  0x9f   :  { %v620_v63 = vmul.f32 %v6068_v59, %v490_v61  ;;  %352 = vperm.xlu1 %5769, %v5953_v13   ;;  %v229_v58 = vmul.f32 %v6058_v53, %v6070_v62 }
  0xa1   :  { %v652_v2 = vadd.f32 %v620_v63, %v455_v60 }
  0xa2   :  { %v6079_v4 = vpop.permute.xlu0 %89 }
  0xa3   :  { %5770 = vset.pattern.permute.xlu1 %v5850_v5  ;;  %v75_v6 = vpop.permute.xlu1 %74  ;;  %v689_v7 = vadd.f32 %v6077_v1, %v652_v2  ;;  %v231_v63 = vmul.f32 %v6058_v53, %v6079_v4 }
  0xa4   :  { %545 = vperm.xlu1 %5770, %v43_v50   ;;  %v228_v42 = vmul.f32 %v6058_v53, %v75_v6 }
  0xa5   :  { %v721_v8 = vmax.f32 %v689_v7, 0.0 }
  0xa6   :  { %v6083_v9 = vpop.permute.xlu0 %99 }
  0xa7   :  { %5040 = vmatprep.mubr.f32.mxu0 %v721_v8 }
  0xa8   :  { %5771 = vset.pattern.permute.xlu1 %v5848_v0  ;;  %v301_v11 = vpop.permute.xlu1 %300 }
  0xa9   :  { %144 = vperm.xlu1 %5771, %v45_v10   ;;  %v425_v40 = vmul.f32 %v6062_v55, %v301_v11 }
  0xaa   :  { %v6089_v12 = vpop.permute.xlu0 %109 }
  0xab   :  { %v457_v46 = vadd.f32 %v425_v40, %v228_v42 }
  0xac   :  { %v305_v13 = vpop.permute.xlu1 %304 }
  0xad   :  { %5772 = vset.pattern.permute.xlu1 %v5849_v3  ;;  %v426_v56 = vmul.f32 %v6062_v55, %v305_v13 }
  0xae   :  { %356 = vperm.xlu1 %5772, %v45_v10   ;;  %v6092_v17 = vpop.permute.xlu0 %119 }
  0xaf   :  { %v458_v13 = vadd.f32 %v426_v56, %v229_v58 }
  0xb1   :  { %v498_v18 = vpop.permute.xlu1 %497 }
  0xb2   :  { %360 = vperm.xlu1 %5772, %v5960_v14   ;;  %v6095_v19 = vpop.permute.xlu0 %129  ;;  %v622_v43 = vmul.f32 %v6068_v59, %v498_v18 }
  0xb4   :  { %v654_v49 = vadd.f32 %v622_v43, %v457_v46 }
  0xb6   :  { %5773 = vset.pattern.permute.xlu1 %v5850_v5  ;;  %v85_v21 = vpop.permute.xlu1 %84  ;;  %v6098_v22 = vpop.permute.xlu0 %139  ;;  %v691_v11 = vadd.f32 %v6077_v1, %v654_v49 }
  0xb7   :  { %553 = vperm.xlu1 %5773, %v45_v10   ;;  %v230_v50 = vmul.f32 %v6058_v53, %v85_v21  ;;  %v51_v10 = vld [vmem:[%s7384_s0 + $0xb0] sm:$0xff] }
  0xb8   :  { %v723_v42 = vmax.f32 %v691_v11, 0.0 }
  0xba   :  { %v6103_v24 = vpop.permute.xlu0 %149 }
  0xbb   :  { %5774 = vset.pattern.permute.xlu1 %v5848_v0  ;;  %v309_v26 = vpop.permute.xlu1 %308 }
  0xbc   :  { %154 = vperm.xlu1 %5774, %v47_v23   ;;  %v427_v47 = vmul.f32 %v6062_v55, %v309_v26 }
  0xbe   :  { %v6106_v27 = vpop.permute.xlu0 %159  ;;  %v459_v61 = vadd.f32 %v427_v47, %v230_v50 }
  0xbf   :  { %v313_v14 = vpop.permute.xlu1 %312 }
  0xc0   :  { %5775 = vset.pattern.permute.xlu1 %v5849_v3  ;;  %v428_v18 = vmul.f32 %v6062_v55, %v313_v14 }
  0xc1   :  { %364 = vperm.xlu1 %5775, %v47_v23  }
  0xc2   :  { %v6109_v28 = vpop.permute.xlu0 %169  ;;  %v460_v14 = vadd.f32 %v428_v18, %v231_v63 }
  0xc4   :  { %v506_v30 = vpop.permute.xlu1 %505 }
  0xc5   :  { %368 = vperm.xlu1 %5775, %v5967_v15   ;;  %v624_v52 = vmul.f32 %v6068_v59, %v506_v30 }
  0xc6   :  { %v6112_v31 = vpop.permute.xlu0 %179 }
  0xc7   :  { %v656_v6 = vadd.f32 %v624_v52, %v459_v61 }
  0xc9   :  { %5776 = vset.pattern.permute.xlu1 %v5850_v5  ;;  %v95_v32 = vpop.permute.xlu1 %94  ;;  %v693_v43 = vadd.f32 %v6077_v1, %v656_v6 }
  0xca   :  { %561 = vperm.xlu1 %5776, %v47_v23   ;;  %v6115_v34 = vpop.permute.xlu0 %189  ;;  %v232_v7 = vmul.f32 %v6058_v53, %v95_v32 }
  0xce   :  { %5777 = vset.pattern.permute.xlu1 %v5848_v0  ;;  %v317_v36 = vpop.permute.xlu1 %316  ;;  %v6121_v38 = vpop.permute.xlu0 %199 }
  0xcf   :  { %164 = vperm.xlu1 %5777, %v49_v35   ;;  %v429_v51 = vmul.f32 %v6062_v55, %v317_v36 }
  0xd1   :  { %v461_v23 = vadd.f32 %v429_v51, %v232_v7 }
  0xd2   :  { %v321_v39 = vpop.permute.xlu1 %320  ;;  %v6123_v15 = vpop.permute.xlu0 %209 }
  0xd3   :  { %5778 = vset.pattern.permute.xlu1 %v5849_v3 }
  0xd4   :  { %372 = vperm.xlu1 %5778, %v49_v35  }
  0xd6   :  { %v6127_v41 = vpop.permute.xlu0 %219 }
  0xd7   :  { %v514_v44 = vpop.permute.xlu1 %513 }
  0xd8   :  { %376 = vperm.xlu1 %5778, %v5974_v16   ;;  %v626_v62 = vmul.f32 %v6068_v59, %v514_v44  ;;  %v430_v44 = vmul.f32 %v6062_v55, %v321_v39 }
  0xda   :  { %v658_v36 = vadd.f32 %v626_v62, %v461_v23 }
  0xdb   :  { %v494_v54 = vpop.permute.xlu0 %493 }
  0xdc   :  { %v621_v16 = vmul.f32 %v6068_v59, %v494_v54  ;;  %5779 = vset.pattern.permute.xlu1 %v5850_v5  ;;  %v105_v60 = vpop.permute.xlu1 %104  ;;  %v725_v54 = vmax.f32 %v693_v43, 0.0  ;;  %v695_v39 = vadd.f32 %v6077_v1, %v658_v36 }
  0xdd   :  { %569 = vperm.xlu1 %5779, %v49_v35   ;;  %v233_v35 = vmul.f32 %v6058_v53, %v6083_v9  ;;  %v235_v9 = vmul.f32 %v6058_v53, %v6089_v12  ;;  %v234_v61 = vmul.f32 %v6058_v53, %v105_v60 }
  0xde   :  { %v653_v2 = vadd.f32 %v621_v16, %v456_v57  ;;  %v727_v62 = vmax.f32 %v695_v39, 0.0 }
  0xdf   :  { %v502_v8 = vpop.permute.xlu0 %501  ;;  %v462_v57 = vadd.f32 %v430_v44, %v233_v35 }
  0xe0   :  { %v623_v21 = vmul.f32 %v6068_v59, %v502_v8  ;;  %v690_v4 = vadd.f32 %v6077_v1, %v653_v2 }
  0xe1   :  { %5780 = vset.pattern.permute.xlu1 %v5848_v0  ;;  %v325_v26 = vpop.permute.xlu1 %324 }
  0xe2   :  { %v655_v30 = vadd.f32 %v623_v21, %v458_v13  ;;  %174 = vperm.xlu1 %5780, %v51_v10   ;;  %v722_v32 = vmax.f32 %v690_v4, 0.0  ;;  %v431_v50 = vmul.f32 %v6062_v55, %v325_v26 }
  0xe3   :  { %v510_v40 = vpop.permute.xlu0 %509 }
  0xe4   :  { %v625_v45 = vmul.f32 %v6068_v59, %v510_v40  ;;  %5041 = vmatmul.mubr.f32.vlgmr.msra.gmra.mrb[0].mxu0 %v722_v32  ;;  %v692_v46 = vadd.f32 %v6077_v1, %v655_v30  ;;  %v463_v2 = vadd.f32 %v431_v50, %v234_v61  ;;  %v53_v32 = vld [vmem:[%s7384_s0 + $0xc0] sm:$0xff]  ;;  %v237_v40 = vmul.f32 %v6058_v53, %v6092_v17 }
  0xe5   :  { %v329_v47 = vpop.permute.xlu1 %328  ;;  %5043 = vmatprep.mubr.f32.mxu0 %v723_v42 }
  0xe6   :  { %v657_v48 = vadd.f32 %v625_v45, %v460_v14  ;;  %5781 = vset.pattern.permute.xlu1 %v5849_v3  ;;  %v724_v49 = vmax.f32 %v692_v46, 0.0  ;;  %v432_v58 = vmul.f32 %v6062_v55, %v329_v47 }
  0xe7   :  { %380 = vperm.xlu1 %5781, %v51_v10   ;;  %v518_v52 = vpop.permute.xlu0 %517 }
  0xe8   :  { %v627_v56 = vmul.f32 %v6068_v59, %v518_v52  ;;  %5044 = vmatmul.mubr.f32.gmra.mrb[2].mxu0 %v724_v49  ;;  %v694_v16 = vadd.f32 %v6077_v1, %v657_v48  ;;  %v464_v8 = vadd.f32 %v432_v58, %v235_v9 }
  0xe9   :  { %5046 = vmatprep.mubr.f32.mxu0 %v725_v54 }
  0xea   :  { %v659_v51 = vadd.f32 %v627_v56, %v462_v57  ;;  %v522_v12 = vpop.permute.xlu1 %521  ;;  %v726_v63 = vmax.f32 %v694_v16, 0.0  ;;  %v55_v57 = vld [vmem:[%s7384_s0 + $0xd0] sm:$0xff]  ;;  %v239_v56 = vmul.f32 %v6058_v53, %v6095_v19 }
  0xeb   :  { %v628_v6 = vmul.f32 %v6068_v59, %v522_v12  ;;  %384 = vperm.xlu1 %5781, %v5981_v20   ;;  %v526_v7 = vpop.permute.xlu0 %525 }
  0xec   :  { %v629_v11 = vmul.f32 %v6068_v59, %v526_v7  ;;  %5047 = vmatmul.mubr.f32.gmra.mrb[4].mxu0 %v726_v63  ;;  %v696_v13 = vadd.f32 %v6077_v1, %v659_v51 }
  0xed   :  { %v660_v18 = vadd.f32 %v628_v6, %v463_v2  ;;  %5049 = vmatprep.mubr.f32.mxu0 %v727_v62 }
  0xee   :  { %v661_v60 = vadd.f32 %v629_v11, %v464_v8  ;;  %v728_v21 = vmax.f32 %v696_v13, 0.0 }
  0xef   :  { %5782 = vset.pattern.permute.xlu1 %v5850_v5  ;;  %v115_v4 = vpop.permute.xlu1 %114  ;;  %v697_v23 = vadd.f32 %v6077_v1, %v660_v18  ;;  %v534_v36 = vpop.permute.xlu0 %533 }
  0xf0   :  { %577 = vperm.xlu1 %5782, %v51_v10   ;;  %5050 = vmatmul.mubr.f32.gmra.mrb[6].mxu0 %v728_v21  ;;  %v698_v20 = vadd.f32 %v6077_v1, %v661_v60  ;;  %v631_v43 = vmul.f32 %v6068_v59, %v534_v36  ;;  %v236_v45 = vmul.f32 %v6058_v53, %v115_v4  ;;  %v57_v4 = vld [vmem:[%s7384_s0 + $0xe0] sm:$0xff] }
  0xf1   :  { %v729_v26 = vmax.f32 %v697_v23, 0.0 }
  0xf2   :  { %v730_v30 = vmax.f32 %v698_v20, 0.0  ;;  %v1257_v20 = vld [vmem:[#allocation2 + $0x90] sm:$0xff] }
  0xf3   :  { %5052 = vmatprep.mubr.f32.mxu0 %v729_v26 }
  0xf4   :  { %5783 = vset.pattern.permute.xlu1 %v5848_v0  ;;  %v333_v35 = vpop.permute.xlu1 %332  ;;  %5053 = vmatmul.mubr.f32.gmra.mrb[8].mxu0 %v730_v30 }
  0xf5   :  { %184 = vperm.xlu1 %5783, %v53_v32   ;;  %v433_v14 = vmul.f32 %v6062_v55, %v333_v35 }
  0xf7   :  { %v465_v48 = vadd.f32 %v433_v14, %v236_v45 }
  0xf8   :  { %v337_v10 = vpop.permute.xlu1 %336 }
  0xf9   :  { %v434_v42 = vmul.f32 %v6062_v55, %v337_v10  ;;  %5784 = vset.pattern.permute.xlu1 %v5849_v3  ;;  %v1258_v10 = vld [vmem:[#allocation2 + $0x98] sm:$0xff] }
  0xfa   :  { %388 = vperm.xlu1 %5784, %v53_v32  }
  0xfb   :  { %v466_v44 = vadd.f32 %v434_v42, %v237_v40  ;;  %v1259_v42 = vld [vmem:[#allocation2 + $0xa0] sm:$0xff] }
  0xfc   :  { %v5516_v14 = vpack.c.bf16 %v1259_v42, %v1258_v10 }
  0xfd   :  { %v663_v46 = vadd.f32 %v631_v43, %v466_v44  ;;  %v530_v47 = vpop.permute.xlu1 %529 }
  0xfe   :  { %v630_v49 = vmul.f32 %v6068_v59, %v530_v47  ;;  %392 = vperm.xlu1 %5784, %v5990_v25   ;;  %v542_v25 = vpop.permute.xlu0 %541  ;;  %v1260_v47 = vld [vmem:[#allocation2 + $0xa8] sm:$0xff] }
  0xff   :  { %v700_v9 = vadd.f32 %v6077_v1, %v663_v46  ;;  %v633_v51 = vmul.f32 %v6068_v59, %v542_v25 }
 0x100   :  { %v662_v17 = vadd.f32 %v630_v49, %v465_v48  ;;  %v1261_v48 = vld [vmem:[#allocation2 + $0xb0] sm:$0xff] }
 0x101   :  { %v732_v39 = vmax.f32 %v700_v9, 0.0  ;;  %v5520_v9 = vpack.c.bf16 %v1261_v48, %v1260_v47 }
 0x102   :  { %5785 = vset.pattern.permute.xlu1 %v5850_v5  ;;  %v125_v50 = vpop.permute.xlu1 %124  ;;  %v699_v52 = vadd.f32 %v6077_v1, %v662_v17  ;;  %v550_v26 = vpop.permute.xlu0 %549 }
 0x103   :  { %585 = vperm.xlu1 %5785, %v53_v32   ;;  %v238_v2 = vmul.f32 %v6058_v53, %v125_v50  ;;  %v241_v32 = vmul.f32 %v6058_v53, %v6098_v22  ;;  %v635_v40 = vmul.f32 %v6068_v59, %v550_v26 }
 0x104   :  { %v731_v54 = vmax.f32 %v699_v52, 0.0 }
 0x106   :  { %5055 = vmatprep.mubr.f32.mxu0 %v731_v54  ;;  %v1262_v54 = vld [vmem:[#allocation2 + $0xb8] sm:$0xff] }
 0x107   :  { %5786 = vset.pattern.permute.xlu1 %v5848_v0  ;;  %v341_v58 = vpop.permute.xlu1 %340  ;;  %5056 = vmatmul.mubr.f32.gmra.mrb[10].mxu0 %v732_v39  ;;  %v1263_v39 = vld [vmem:[#allocation2 + $0xc0] sm:$0xff] }
 0x108   :  { %194 = vperm.xlu1 %5786, %v55_v57   ;;  %v435_v12 = vmul.f32 %v6062_v55, %v341_v58  ;;  %v5524_v25 = vpack.c.bf16 %v1263_v39, %v1262_v54 }
 0x10a   :  { %v467_v62 = vadd.f32 %v435_v12, %v238_v2  ;;  %v558_v2 = vpop.permute.xlu0 %557 }
 0x10b   :  { %v345_v16 = vpop.permute.xlu1 %344 }
 0x10c   :  { %v436_v61 = vmul.f32 %v6062_v55, %v345_v16  ;;  %5787 = vset.pattern.permute.xlu1 %v5849_v3 }
 0x10d   :  { %396 = vperm.xlu1 %5787, %v55_v57  }
 0x10e   :  { %v468_v63 = vadd.f32 %v436_v61, %v239_v56  ;;  %v1264_v61 = vld [vmem:[#allocation2 + $0xc8] sm:$0xff] }
 0x110   :  { %v665_v6 = vadd.f32 %v633_v51, %v468_v63  ;;  %v538_v7 = vpop.permute.xlu1 %537  ;;  %v1265_v51 = vld [vmem:[#allocation2 + $0xd0] sm:$0xff] }
 0x111   :  { %v632_v8 = vmul.f32 %v6068_v59, %v538_v7  ;;  %400 = vperm.xlu1 %5787, %v5997_v29   ;;  %v1256_v29 = vld [vmem:[#allocation2 + $0x88] sm:$0xff]  ;;  %v5528_v12 = vpack.c.bf16 %v1265_v51, %v1264_v61  ;;  %v1267_v7 = vld [vmem:[#allocation2 + $0xe0] sm:$0xff] }
 0x112   :  { %v702_v11 = vadd.f32 %v6077_v1, %v665_v6  ;;  %v5512_v30 = vpack.c.bf16 %v1257_v20, %v1256_v29  ;;  %v1266_v6 = vld [vmem:[#allocation2 + $0xd8] sm:$0xff] }
 0x113   :  { %v664_v19 = vadd.f32 %v632_v8, %v467_v62  ;;  %v243_v62 = vmul.f32 %v6058_v53, %v6103_v24  ;;  %v5532_v8 = vpack.c.bf16 %v1267_v7, %v1266_v6 }
 0x114   :  { %v734_v21 = vmax.f32 %v702_v11, 0.0  ;;  %5513 = vmatprep.subr.bf16.mxu1 %v5512_v30 }
 0x115   :  { %5788 = vset.pattern.permute.xlu1 %v5850_v5  ;;  %v135_v13 = vpop.permute.xlu1 %134  ;;  %v701_v18 = vadd.f32 %v6077_v1, %v664_v19  ;;  %5515 = vmatpush3.bf16.msra.mxu1 %v5512_v30  ;;  %v1271_v30 = vld [vmem:[#allocation2 + $0x100] sm:$0xff] }
 0x116   :  { %593 = vperm.xlu1 %5788, %v55_v57   ;;  %v240_v45 = vmul.f32 %v6058_v53, %v135_v13  ;;  %5517 = vmatprep.subr.bf16.mxu1 %v5516_v14  ;;  %v637_v13 = vmul.f32 %v6068_v59, %v558_v2 }
 0x117   :  { %v733_v60 = vmax.f32 %v701_v18, 0.0  ;;  %v1268_v18 = vld [vmem:[#allocation2 + $0xe8] sm:$0xff] }
 0x119   :  { %5058 = vmatprep.mubr.f32.mxu0 %v733_v60  ;;  %5519 = vmatpush3.bf16.msra.mxu1 %v5516_v14  ;;  %v1269_v60 = vld [vmem:[#allocation2 + $0xf0] sm:$0xff] }
 0x11a   :  { %5789 = vset.pattern.permute.xlu1 %v5848_v0  ;;  %v349_v23 = vpop.permute.xlu1 %348  ;;  %5059 = vmatmul.mubr.f32.gmra.mrb[12].mxu0 %v734_v21 }
 0x11b   :  { %204 = vperm.xlu1 %5789, %v57_v4   ;;  %v437_v43 = vmul.f32 %v6062_v55, %v349_v23  ;;  %5521 = vmatprep.subr.bf16.mxu1 %v5520_v9 }
 0x11d   :  { %v469_v49 = vadd.f32 %v437_v43, %v240_v45  ;;  %5523 = vmatpush3.bf16.msra.mxu1 %v5520_v9 }
 0x11e   :  { %v353_v35 = vpop.permute.xlu1 %352  ;;  %5525 = vmatprep.subr.bf16.mxu1 %v5524_v25 }
 0x11f   :  { %v438_v36 = vmul.f32 %v6062_v55, %v353_v35  ;;  %5790 = vset.pattern.permute.xlu1 %v5849_v3 }
 0x120   :  { %404 = vperm.xlu1 %5790, %v57_v4  }
 0x121   :  { %v470_v44 = vadd.f32 %v438_v36, %v241_v32  ;;  %5527 = vmatpush3.bf16.msra.mxu1 %v5524_v25 }
 0x122   :  { %5529 = vmatprep.subr.bf16.mxu1 %v5528_v12 }
 0x123   :  { %v667_v22 = vadd.f32 %v635_v40, %v470_v44  ;;  %v546_v46 = vpop.permute.xlu1 %545  ;;  %v245_v44 = vmul.f32 %v6058_v53, %v6106_v27 }
 0x124   :  { %v634_v17 = vmul.f32 %v6068_v59, %v546_v46  ;;  %408 = vperm.xlu1 %5790, %v6004_v33   ;;  %v59_v33 = vld [vmem:[%s7384_s0 + $0xf0] sm:$0xff] }
 0x125   :  { %v704_v52 = vadd.f32 %v6077_v1, %v667_v22  ;;  %5531 = vmatpush3.bf16.msra.mxu1 %v5528_v12 }
 0x126   :  { %v666_v50 = vadd.f32 %v634_v17, %v469_v49  ;;  %5533 = vmatprep.subr.bf16.mxu1 %v5532_v8 }
 0x127   :  { %v736_v16 = vmax.f32 %v704_v52, 0.0 }
 0x128   :  { %5791 = vset.pattern.permute.xlu1 %v5850_v5  ;;  %v145_v57 = vpop.permute.xlu1 %144  ;;  %v703_v58 = vadd.f32 %v6077_v1, %v666_v50 }
 0x129   :  { %601 = vperm.xlu1 %5791, %v57_v4   ;;  %5535 = vmatpush3.bf16.msra.mxu1 %v5532_v8  ;;  %v5536_v4 = vpack.c.bf16 %v1269_v60, %v1268_v18  ;;  %v242_v23 = vmul.f32 %v6058_v53, %v145_v57 }
 0x12a   :  { %v735_v56 = vmax.f32 %v703_v58, 0.0 }
 0x12b   :  { %5537 = vmatprep.subr.bf16.mxu1 %v5536_v4 }
 0x12c   :  { %5061 = vmatprep.mubr.f32.mxu0 %v735_v56 }
 0x12d   :  { %5792 = vset.pattern.permute.xlu1 %v5848_v0  ;;  %v357_v63 = vpop.permute.xlu1 %356  ;;  %5062 = vmatmul.mubr.f32.gmra.mrb[14].mxu0 %v736_v16 }
 0x12e   :  { %214 = vperm.xlu1 %5792, %v59_v33   ;;  %v439_v0 = vmul.f32 %v6062_v55, %v357_v63  ;;  %5539 = vmatpush3.bf16.msra.mxu1 %v5536_v4 }
 0x130   :  { %v471_v20 = vadd.f32 %v439_v0, %v242_v23  ;;  %v249_v23 = vmul.f32 %v6058_v53, %v6112_v31 }
 0x131   :  { %v361_v19 = vpop.permute.xlu1 %360 }
 0x132   :  { %v440_v11 = vmul.f32 %v6062_v55, %v361_v19  ;;  %5793 = vset.pattern.permute.xlu1 %v5849_v3  ;;  %v1270_v3 = vld [vmem:[#allocation2 + $0xf8] sm:$0xff] }
 0x133   :  { %412 = vperm.xlu1 %5793, %v59_v33   ;;  %v5540_v32 = vpack.c.bf16 %v1271_v30, %v1270_v3 }
 0x134   :  { %v472_v21 = vadd.f32 %v440_v11, %v243_v62 }
 0x135   :  { %5541 = vmatprep.subr.bf16.mxu1 %v5540_v32 }
 0x136   :  { %v669_v24 = vadd.f32 %v637_v13, %v472_v21  ;;  %v554_v29 = vpop.permute.xlu1 %553  ;;  %5543 = vmatpush3.bf16.msra.mxu1 %v5540_v32 }
 0x137   :  { %v636_v26 = vmul.f32 %v6068_v59, %v554_v29  ;;  %416 = vperm.xlu1 %5793, %v6011_v37   ;;  %v566_v37 = vpop.permute.xlu0 %565 }
 0x138   :  { %v706_v36 = vadd.f32 %v6077_v1, %v669_v24  ;;  %v639_v46 = vmul.f32 %v6068_v59, %v566_v37 }
 0x139   :  { %v668_v35 = vadd.f32 %v636_v26, %v471_v20 }
 0x13a   :  { %v738_v43 = vmax.f32 %v706_v36, 0.0 }
 0x13b   :  { %5795 = vset.pattern.permute.xlu1 %v5850_v5  ;;  %v155_v40 = vpop.permute.xlu1 %154  ;;  %v705_v10 = vadd.f32 %v6077_v1, %v668_v35  ;;  %v574_v56 = vpop.permute.xlu0 %573 }
 0x13c   :  { %609 = vperm.xlu1 %5795, %v59_v33   ;;  %v244_v48 = vmul.f32 %v6058_v53, %v155_v40  ;;  %v247_v33 = vmul.f32 %v6058_v53, %v6109_v28  ;;  %v641_v51 = vmul.f32 %v6068_v59, %v574_v56 }
 0x13d   :  { %v737_v42 = vmax.f32 %v705_v10, 0.0 }
 0x13f   :  { %5064 = vmatprep.mubr.f32.mxu0 %v737_v42  ;;  %v582_v21 = vpop.permute.xlu0 %581 }
 0x140   :  { %v365_v14 = vpop.permute.xlu1 %364  ;;  %5065 = vmatmul.mubr.f32.gmra.mrb[16].mxu0 %v738_v43  ;;  %v643_v29 = vmul.f32 %v6068_v59, %v582_v21 }
 0x141   :  { %v441_v5 = vmul.f32 %v6062_v55, %v365_v14 }
 0x143   :  { %v473_v9 = vadd.f32 %v441_v5, %v244_v48 }
 0x144   :  { %v369_v45 = vpop.permute.xlu1 %368 }
 0x145   :  { %v442_v22 = vmul.f32 %v6062_v55, %v369_v45  ;;  %v1535_v45 = vld [vmem:[#allocation2 + $0x110] sm:$0xff] }
 0x147   :  { %v474_v47 = vadd.f32 %v442_v22, %v245_v44  ;;  %v1534_v44 = vld [vmem:[#allocation2 + $0x108] sm:$0xff]  ;;  %v590_v22 = vpop.permute.xlu0 %589 }
 0x148   :  { %v5544_v5 = vpack.c.bf16 %v1535_v45, %v1534_v44  ;;  %v645_v48 = vmul.f32 %v6068_v59, %v590_v22 }
 0x149   :  { %v671_v49 = vadd.f32 %v639_v46, %v474_v47  ;;  %v562_v17 = vpop.permute.xlu1 %561  ;;  %v251_v47 = vmul.f32 %v6058_v53, %v6115_v34 }
 0x14a   :  { %v638_v50 = vmul.f32 %v6068_v59, %v562_v17  ;;  %5545 = vmatprep.subr.bf16.mxu0 %v5544_v5 }
 0x14b   :  { %v708_v54 = vadd.f32 %v6077_v1, %v671_v49  ;;  %5547 = vmatpush3.bf16.msra.mxu0 %v5544_v5 }
 0x14c   :  { %v670_v52 = vadd.f32 %v638_v50, %v473_v9  ;;  %v1536_v9 = vld [vmem:[#allocation2 + $0x118] sm:$0xff]  ;;  %v1537_v50 = vld [vmem:[#allocation2 + $0x120] sm:$0xff] }
 0x14d   :  { %v740_v58 = vmax.f32 %v708_v54, 0.0 }
 0x14e   :  { %v165_v39 = vpop.permute.xlu1 %164  ;;  %v707_v27 = vadd.f32 %v6077_v1, %v670_v52  ;;  %v1538_v52 = vld [vmem:[#allocation2 + $0x128] sm:$0xff] }
 0x14f   :  { %v246_v2 = vmul.f32 %v6058_v53, %v165_v39  ;;  %v5548_v39 = vpack.c.bf16 %v1537_v50, %v1536_v9 }
 0x150   :  { %v739_v57 = vmax.f32 %v707_v27, 0.0  ;;  %v1539_v27 = vld [vmem:[#allocation2 + $0x130] sm:$0xff] }
 0x151   :  { %5549 = vmatprep.subr.bf16.mxu0 %v5548_v39 }
 0x152   :  { %5067 = vmatprep.mubr.f32.mxu0 %v739_v57  ;;  %5551 = vmatpush3.bf16.msra.mxu0 %v5548_v39 }
 0x153   :  { %v373_v25 = vpop.permute.xlu1 %372  ;;  %5068 = vmatmul.mubr.f32.gmra.mrb[18].mxu0 %v740_v58  ;;  %v5552_v58 = vpack.c.bf16 %v1539_v27, %v1538_v52 }
 0x154   :  { %v443_v12 = vmul.f32 %v6062_v55, %v373_v25 }
 0x155   :  { %5553 = vmatprep.subr.bf16.mxu0 %v5552_v58 }
 0x156   :  { %v475_v62 = vadd.f32 %v443_v12, %v246_v2  ;;  %5555 = vmatpush3.bf16.msra.mxu0 %v5552_v58  ;;  %v1541_v2 = vld [vmem:[#allocation2 + $0x140] sm:$0xff] }
 0x157   :  { %v377_v16 = vpop.permute.xlu1 %376 }
 0x158   :  { %v444_v61 = vmul.f32 %v6062_v55, %v377_v16 }
 0x15a   :  { %v476_v63 = vadd.f32 %v444_v61, %v247_v33 }
 0x15c   :  { %v673_v6 = vadd.f32 %v641_v51, %v476_v63  ;;  %v570_v7 = vpop.permute.xlu1 %569  ;;  %v1540_v63 = vld [vmem:[#allocation2 + $0x138] sm:$0xff] }
 0x15d   :  { %v640_v8 = vmul.f32 %v6068_v59, %v570_v7  ;;  %v5556_v7 = vpack.c.bf16 %v1541_v2, %v1540_v63  ;;  %v257_v63 = vmul.f32 %v6058_v53, %v6127_v41 }
 0x15e   :  { %v710_v11 = vadd.f32 %v6077_v1, %v673_v6 }
 0x15f   :  { %v672_v19 = vadd.f32 %v640_v8, %v475_v62  ;;  %5557 = vmatprep.subr.bf16.mxu0 %v5556_v7 }
 0x160   :  { %v742_v18 = vmax.f32 %v710_v11, 0.0  ;;  %v1543_v11 = vld [vmem:[#allocation2 + $0x150] sm:$0xff]  ;;  %5559 = vmatpush3.bf16.msra.mxu0 %v5556_v7 }
 0x161   :  { %v175_v13 = vpop.permute.xlu1 %174  ;;  %v709_v28 = vadd.f32 %v6077_v1, %v672_v19  ;;  %v1542_v19 = vld [vmem:[#allocation2 + $0x148] sm:$0xff] }
 0x162   :  { %v248_v3 = vmul.f32 %v6058_v53, %v175_v13  ;;  %v5560_v13 = vpack.c.bf16 %v1543_v11, %v1542_v19 }
 0x163   :  { %v741_v0 = vmax.f32 %v709_v28, 0.0 }
 0x164   :  { %5561 = vmatprep.subr.bf16.mxu0 %v5560_v13 }
 0x165   :  { %5070 = vmatprep.mubr.f32.mxu0 %v741_v0  ;;  %v1544_v0 = vld [vmem:[#allocation2 + $0x158] sm:$0xff]  ;;  %5563 = vmatpush3.bf16.msra.mxu0 %v5560_v13 }
 0x166   :  { %v381_v60 = vpop.permute.xlu1 %380  ;;  %5071 = vmatmul.mubr.f32.gmra.mrb[20].mxu0 %v742_v18  ;;  %v1545_v18 = vld [vmem:[#allocation2 + $0x160] sm:$0xff] }
 0x167   :  { %v445_v20 = vmul.f32 %v6062_v55, %v381_v60  ;;  %v253_v60 = vmul.f32 %v6058_v53, %v6121_v38 }
 0x169   :  { %v477_v35 = vadd.f32 %v445_v20, %v248_v3  ;;  %v1547_v20 = vld [vmem:[#allocation2 + $0x170] sm:$0xff] }
 0x16a   :  { %v385_v4 = vpop.permute.xlu1 %384 }
 0x16b   :  { %v446_v24 = vmul.f32 %v6062_v55, %v385_v4  ;;  %v5564_v4 = vpack.c.bf16 %v1545_v18, %v1544_v0 }
 0x16d   :  { %v478_v26 = vadd.f32 %v446_v24, %v249_v23  ;;  %v598_v23 = vpop.permute.xlu0 %597  ;;  %5565 = vmatprep.subr.bf16.mxu0 %v5564_v4 }
 0x16e   :  { %5567 = vmatpush3.bf16.msra.mxu0 %v5564_v4 }
 0x16f   :  { %v675_v30 = vadd.f32 %v643_v29, %v478_v26  ;;  %v578_v32 = vpop.permute.xlu1 %577  ;;  %v1546_v29 = vld [vmem:[#allocation2 + $0x168] sm:$0xff]  ;;  %v647_v26 = vmul.f32 %v6068_v59, %v598_v23 }
 0x170   :  { %v642_v36 = vmul.f32 %v6068_v59, %v578_v32  ;;  %v1548_v32 = vld [vmem:[#allocation2 + $0x178] sm:$0xff] }
 0x171   :  { %v712_v10 = vadd.f32 %v6077_v1, %v675_v30  ;;  %v5568_v30 = vpack.c.bf16 %v1547_v20, %v1546_v29 }
 0x172   :  { %v674_v40 = vadd.f32 %v642_v36, %v477_v35  ;;  %v1549_v35 = vld [vmem:[#allocation2 + $0x180] sm:$0xff] }
 0x173   :  { %v744_v14 = vmax.f32 %v712_v10, 0.0  ;;  %5569 = vmatprep.subr.bf16.mxu0 %v5568_v30 }
 0x174   :  { %v185_v42 = vpop.permute.xlu1 %184  ;;  %v711_v31 = vadd.f32 %v6077_v1, %v674_v40  ;;  %5571 = vmatpush3.bf16.msra.mxu0 %v5568_v30 }
 0x175   :  { %v250_v57 = vmul.f32 %v6058_v53, %v185_v42 }
 0x176   :  { %v743_v43 = vmax.f32 %v711_v31, 0.0  ;;  %v5572_v31 = vpack.c.bf16 %v1549_v35, %v1548_v32 }
 0x178   :  { %5073 = vmatprep.mubr.f32.mxu0 %v743_v43  ;;  %5573 = vmatprep.subr.bf16.mxu0 %v5572_v31 }
 0x179   :  { %v389_v37 = vpop.permute.xlu1 %388  ;;  %5074 = vmatmul.mubr.f32.gmra.mrb[22].mxu0 %v744_v14 }
 0x17a   :  { %v447_v17 = vmul.f32 %v6062_v55, %v389_v37  ;;  %5575 = vmatpush3.bf16.msra.mxu0 %v5572_v31 }
 0x17c   :  { %v479_v34 = vadd.f32 %v447_v17, %v250_v57 }
 0x17d   :  { %v393_v46 = vpop.permute.xlu1 %392 }
 0x17e   :  { %v448_v49 = vmul.f32 %v6062_v55, %v393_v46 }
 0x180   :  { %v480_v54 = vadd.f32 %v448_v49, %v251_v47  ;;  %v255_v47 = vmul.f32 %v6058_v53, %v6123_v15  ;;  %v606_v49 = vpop.permute.xlu0 %605 }
 0x181   :  { %v649_v9 = vmul.f32 %v6068_v59, %v606_v49 }
 0x182   :  { %v677_v25 = vadd.f32 %v645_v48, %v480_v54  ;;  %v586_v56 = vpop.permute.xlu1 %585 }
 0x183   :  { %v644_v16 = vmul.f32 %v6068_v59, %v586_v56 }
 0x184   :  { %v714_v61 = vadd.f32 %v6077_v1, %v677_v25 }
 0x185   :  { %v676_v33 = vadd.f32 %v644_v16, %v479_v34 }
 0x186   :  { %v746_v62 = vmax.f32 %v714_v61, 0.0  ;;  %v6300_v61 = vld [vmem:[%s7386_s2 + $0x1] ss:$0 sm:$0xff] }
 0x187   :  { %v195_v51 = vpop.permute.xlu1 %194  ;;  %v713_v12 = vadd.f32 %v6077_v1, %v676_v33 }
 0x188   :  { %v252_v36 = vmul.f32 %v6058_v53, %v195_v51  ;;  %v614_v51 = vpop.permute.xlu0 %613 }
 0x189   :  { %v745_v6 = vmax.f32 %v713_v12, 0.0  ;;  %v651_v19 = vmul.f32 %v6068_v59, %v614_v51 }
 0x18b   :  { %5076 = vmatprep.mubr.f32.mxu0 %v745_v6 }
 0x18c   :  { %v397_v8 = vpop.permute.xlu1 %396  ;;  %5077 = vmatmul.mubr.f32.gmra.mrb[24].mxu0 %v746_v62 }
 0x18d   :  { %v449_v24 = vmul.f32 %v6062_v55, %v397_v8 }
 0x18f   :  { %v481_v10 = vadd.f32 %v449_v24, %v252_v36 }
 0x190   :  { %v401_v28 = vpop.permute.xlu1 %400 }
 0x191   :  { %v450_v21 = vmul.f32 %v6062_v55, %v401_v28 }
 0x193   :  { %v482_v3 = vadd.f32 %v450_v21, %v253_v60 }
 0x195   :  { %v679_v40 = vadd.f32 %v647_v26, %v482_v3  ;;  %v594_v38 = vpop.permute.xlu1 %593 }
 0x196   :  { %v646_v42 = vmul.f32 %v6068_v59, %v594_v38 }
 0x197   :  { %v716_v14 = vadd.f32 %v6077_v1, %v679_v40 }
 0x198   :  { %v678_v43 = vadd.f32 %v646_v42, %v481_v10 }
 0x199   :  { %v748_v22 = vmax.f32 %v716_v14, 0.0 }
 0x19a   :  { %v205_v37 = vpop.permute.xlu1 %204  ;;  %v715_v44 = vadd.f32 %v6077_v1, %v678_v43 }
 0x19b   :  { %v254_v52 = vmul.f32 %v6058_v53, %v205_v37 }
 0x19c   :  { %v747_v45 = vmax.f32 %v715_v44, 0.0  ;;  %v5796_v44 = vld [vmem:[%s7386_s2] ss:$0 sm:$0xff] }
 0x19e   :  { %5079 = vmatprep.mubr.f32.mxu0 %v747_v45 }
 0x19f   :  { %v405_v46 = vpop.permute.xlu1 %404  ;;  %5080 = vmatmul.mubr.f32.gmra.mrb[26].mxu0 %v748_v22 }
 0x1a0   :  { %v451_v17 = vmul.f32 %v6062_v55, %v405_v46 }
 0x1a2   :  { %v483_v27 = vadd.f32 %v451_v17, %v254_v52 }
 0x1a3   :  { %v409_v5 = vpop.permute.xlu1 %408 }
 0x1a4   :  { %v452_v48 = vmul.f32 %v6062_v55, %v409_v5 }
 0x1a6   :  { %v484_v50 = vadd.f32 %v452_v48, %v255_v47 }
 0x1a8   :  { %v681_v54 = vadd.f32 %v649_v9, %v484_v50  ;;  %v602_v39 = vpop.permute.xlu1 %601 }
 0x1a9   :  { %v648_v57 = vmul.f32 %v6068_v59, %v602_v39 }
 0x1aa   :  { %v718_v25 = vadd.f32 %v6077_v1, %v681_v54 }
 0x1ab   :  { %v680_v58 = vadd.f32 %v648_v57, %v483_v27 }
 0x1ac   :  { %v750_v16 = vmax.f32 %v718_v25, 0.0 }
 0x1ad   :  { %v215_v56 = vpop.permute.xlu1 %214  ;;  %v717_v15 = vadd.f32 %v6077_v1, %v680_v58 }
 0x1ae   :  { %v256_v11 = vmul.f32 %v6058_v53, %v215_v56 }
 0x1af   :  { %v749_v34 = vmax.f32 %v717_v15, 0.0 }
 0x1b1   :  { %5082 = vmatprep.mubr.f32.mxu0 %v749_v34 }
 0x1b2   :  { %v413_v33 = vpop.permute.xlu1 %412  ;;  %5083 = vmatmul.mubr.f32.gmra.mrb[28].mxu0 %v750_v16 }
 0x1b3   :  { %v453_v2 = vmul.f32 %v6062_v55, %v413_v33 }
 0x1b5   :  { %v485_v18 = vadd.f32 %v453_v2, %v256_v11 }
 0x1b6   :  { %v417_v12 = vpop.permute.xlu1 %416 }
 0x1b7   :  { %v454_v6 = vmul.f32 %v6062_v55, %v417_v12  ;;  %v5042_v7 = vpop.f32.mrb[0].mxu0 }
 0x1b8   :  { %v846_v62 = vadd.f32 %v5042_v7, %v6300_v61  ;;  %v840_v8 = vpop.f32.mrb[1].mxu0 }
 0x1b9   :  { %v486_v13 = vadd.f32 %v454_v6, %v257_v63  ;;  %v841_v28 = vadd.f32 %v6300_v61, %v840_v8 }
 0x1ba   :  { %v1005_v0 = vrot.slane %v846_v62, 4  ;;  %v1225_v26 = vmax.f32 %v846_v62, 0.0 }
 0x1bb   :  { %v683_v60 = vadd.f32 %v651_v19, %v486_v13  ;;  %v999_v21 = vrot.slane %v841_v28, 4  ;;  %v610_v41 = vpop.permute.xlu1 %609  ;;  %v5045_v4 = vpop.f32.mrb[2].mxu0  ;;  %v1224_v23 = vmax.f32 %v841_v28, 0.0 }
 0x1bc   :  { %v1006_v24 = vadd.f32 %v1005_v0, %v846_v62  ;;  %v650_v55 = vmul.f32 %v6068_v59, %v610_v41  ;;  %v856_v29 = vadd.f32 %v5045_v4, %v6300_v61  ;;  %v850_v20 = vpop.f32.mrb[3].mxu0 }
 0x1bd   :  { %v1000_v3 = vadd.f32 %v999_v21, %v841_v28  ;;  %v851_v53 = vadd.f32 %v6300_v61, %v850_v20  ;;  %5120 = vmatprep.mubr.f32.mxu1 %v1224_v23  ;;  %v720_v30 = vadd.f32 %v6077_v1, %v683_v60 }
 0x1be   :  { %v1007_v32 = vrot.slane %v1006_v24, 2  ;;  %v682_v35 = vadd.f32 %v650_v55, %v485_v18  ;;  %v1017_v36 = vrot.slane %v856_v29, 4  ;;  %5121 = vmatmul.mubr.f32.vlgmr.msra.gmra.mrb[0].mxu1 %v1225_v26  ;;  %v1227_v31 = vmax.f32 %v856_v29, 0.0 }
 0x1bf   :  { %v1001_v40 = vrot.slane %v1000_v3, 2  ;;  %v1011_v38 = vrot.slane %v851_v53, 4  ;;  %v5048_v10 = vpop.f32.mrb[4].mxu0  ;;  %v1226_v42 = vmax.f32 %v851_v53, 0.0  ;;  %v752_v5 = vmax.f32 %v720_v30, 0.0 }
 0x1c0   :  { %v1008_v59 = vadd.f32 %v1007_v32, %v1006_v24  ;;  %v1018_v43 = vadd.f32 %v1017_v36, %v856_v29  ;;  %v866_v14 = vadd.f32 %v5048_v10, %v6300_v61  ;;  %v860_v37 = vpop.f32.mrb[5].mxu0  ;;  %v719_v1 = vadd.f32 %v5796_v44, %v682_v35 }
 0x1c1   :  { %v1002_v45 = vadd.f32 %v1001_v40, %v1000_v3  ;;  %v1012_v22 = vadd.f32 %v1011_v38, %v851_v53  ;;  %v861_v46 = vadd.f32 %v6300_v61, %v860_v37  ;;  %5123 = vmatprep.mubr.f32.mxu1 %v1226_v42 }
 0x1c2   :  { %v1009_v47 = vrot.slane %v1008_v59, 1  ;;  %v1019_v48 = vrot.slane %v1018_v43, 2  ;;  %v1029_v49 = vrot.slane %v866_v14, 4  ;;  %5124 = vmatmul.mubr.f32.gmra.mrb[2].mxu1 %v1227_v31  ;;  %v751_v17 = vmax.f32 %v719_v1, 0.0 }
 0x1c3   :  { %v1003_v9 = vrot.slane %v1002_v45, 1  ;;  %v1013_v50 = vrot.slane %v1012_v22, 2  ;;  %v1023_v52 = vrot.slane %v861_v46, 4  ;;  %v5051_v54 = vpop.f32.mrb[6].mxu0  ;;  %v1228_v39 = vmax.f32 %v861_v46, 0.0 }
 0x1c4   :  { %v1010_v27 = vadd.f32 %v1009_v47, %v1008_v59  ;;  %v1020_v57 = vadd.f32 %v1019_v48, %v1018_v43  ;;  %v1030_v58 = vadd.f32 %v1029_v49, %v866_v14  ;;  %v876_v25 = vadd.f32 %v5051_v54, %v6300_v61  ;;  %v870_v56 = vpop.f32.mrb[7].mxu0  ;;  %5085 = vmatprep.mubr.f32.mxu0 %v751_v17 }
 0x1c5   :  { %v1004_v15 = vadd.f32 %v1003_v9, %v1002_v45  ;;  %v1014_v34 = vadd.f32 %v1013_v50, %v1012_v22  ;;  %v1024_v16 = vadd.f32 %v1023_v52, %v861_v46  ;;  %v871_v33 = vadd.f32 %v6300_v61, %v870_v56  ;;  %5086 = vmatmul.mubr.f32.gmra.mrb[30].mxu0 %v752_v5 }
 0x1c6   :  { %v1193_v51 = vmul.f32 0.125, %v1010_v27  ;;  %v1021_v12 = vrot.slane %v1020_v57, 1  ;;  %v1031_v63 = vrot.slane %v1030_v58, 2  ;;  %v1041_v2 = vrot.slane %v876_v25, 4  ;;  %5126 = vmatprep.mubr.f32.mxu1 %v1228_v39 }
 0x1c7   :  { %v1192_v6 = vmul.f32 0.125, %v1004_v15  ;;  %v1015_v7 = vrot.slane %v1014_v34, 1  ;;  %v1025_v62 = vrot.slane %v1024_v16, 2  ;;  %v1035_v8 = vrot.slane %v871_v33, 4  ;;  %v5054_v19 = vpop.f32.mrb[8].mxu0 }
 0x1c8   :  { %v1503_v11 = vmax.f32 %v1193_v51, 0.0  ;;  %v1022_v13 = vadd.f32 %v1021_v12, %v1020_v57  ;;  %v1032_v28 = vadd.f32 %v1031_v63, %v1030_v58  ;;  %v1042_v0 = vadd.f32 %v1041_v2, %v876_v25  ;;  %v880_v18 = vpop.f32.mrb[9].mxu0 }
 0x1c9   :  { %v1502_v60 = vmax.f32 %v1192_v6, 0.0  ;;  %v1016_v21 = vadd.f32 %v1015_v7, %v1014_v34  ;;  %v1026_v41 = vadd.f32 %v1025_v62, %v1024_v16  ;;  %v1036_v4 = vadd.f32 %v1035_v8, %v871_v33 }
 0x1ca   :  { %v1033_v23 = vrot.slane %v1032_v28, 1  ;;  %v1043_v24 = vrot.slane %v1042_v0, 2  ;;  %v1229_v55 = vmax.f32 %v866_v14, 0.0  ;;  %v1195_v53 = vmul.f32 0.125, %v1022_v13 }
 0x1cb   :  { %v1583_v29 = vsel %vm1582_vm0, %v1503_v11, %v1502_v60  ;;  %v1194_v20 = vmul.f32 0.125, %v1016_v21  ;;  %v1027_v26 = vrot.slane %v1026_v41, 1  ;;  %v1037_v3 = vrot.slane %v1036_v4, 2 }
 0x1cc   :  { %v1034_v30 = vadd.f32 %v1033_v23, %v1032_v28  ;;  %v1044_v32 = vadd.f32 %v1043_v24, %v1042_v0  ;;  %5127 = vmatmul.mubr.f32.gmra.mrb[4].mxu1 %v1229_v55  ;;  %v886_v35 = vadd.f32 %v5054_v19, %v6300_v61  ;;  %v881_v10 = vadd.f32 %v6300_v61, %v880_v18 }
 0x1cd   :  { %v1504_v36 = vmax.f32 %v1194_v20, 0.0  ;;  %v1028_v40 = vadd.f32 %v1027_v26, %v1026_v41  ;;  %v1038_v38 = vadd.f32 %v1037_v3, %v1036_v4  ;;  %v1230_v43 = vmax.f32 %v871_v33, 0.0 }
 0x1ce   :  { %v1197_v42 = vmul.f32 0.125, %v1034_v30  ;;  %v1045_v31 = vrot.slane %v1044_v32, 1  ;;  %v1053_v59 = vrot.slane %v886_v35, 4  ;;  %v1047_v44 = vrot.slane %v881_v10, 4 }
 0x1cf   :  { %v1196_v14 = vmul.f32 0.125, %v1028_v40  ;;  %v1039_v37 = vrot.slane %v1038_v38, 1  ;;  %v1231_v1 = vmax.f32 %v876_v25, 0.0  ;;  %v1505_v45 = vmax.f32 %v1195_v53, 0.0  ;;  %5129 = vmatprep.mubr.f32.mxu1 %v1230_v43 }
 0x1d0   :  { %v1054_v22 = vadd.f32 %v1053_v59, %v886_v35  ;;  %v1232_v46 = vmax.f32 %v881_v10, 0.0  ;;  %v1048_v48 = vadd.f32 %v1047_v44, %v881_v10  ;;  %v1046_v49 = vadd.f32 %v1045_v31, %v1044_v32 }
 0x1d1   :  { %v1506_v5 = vmax.f32 %v1196_v14, 0.0  ;;  %v1040_v47 = vadd.f32 %v1039_v37, %v1038_v38  ;;  %5130 = vmatmul.mubr.f32.gmra.mrb[6].mxu1 %v1231_v1  ;;  %v1507_v17 = vmax.f32 %v1197_v42, 0.0  ;;  %v1233_v50 = vmax.f32 %v886_v35, 0.0 }
 0x1d2   :  { %v1055_v9 = vrot.slane %v1054_v22, 2  ;;  %5132 = vmatprep.mubr.f32.mxu1 %v1232_v46  ;;  %v1585_v52 = vsel %vm1584_vm1, %v1504_v36, %v1583_v29  ;;  %v1049_v54 = vrot.slane %v1048_v48, 2  ;;  %v1199_v27 = vmul.f32 0.125, %v1046_v49 }
 0x1d3   :  { %v1198_v39 = vmul.f32 0.125, %v1040_v47  ;;  %v1587_v57 = vsel %vm1586_vm2, %v1505_v45, %v1585_v52 }
 0x1d4   :  { %v1056_v58 = vadd.f32 %v1055_v9, %v1054_v22  ;;  %v1589_v25 = vsel %vm1588_vm3, %v1506_v5, %v1587_v57  ;;  %v1050_v56 = vadd.f32 %v1049_v54, %v1048_v48  ;;  %v1509_v33 = vmax.f32 %v1199_v27, 0.0 }
 0x1d5   :  { %5133 = vmatmul.mubr.f32.gmra.mrb[8].mxu1 %v1233_v50  ;;  %v1508_v15 = vmax.f32 %v1198_v39, 0.0  ;;  %v1591_v34 = vsel %vm1590_vm4, %v1507_v17, %v1589_v25 }
 0x1d6   :  { %v1057_v16 = vrot.slane %v1056_v58, 1  ;;  %v1051_v51 = vrot.slane %v1050_v56, 1 }
 0x1d7   :  { %v1593_v12 = vsel %vm1592_vm5, %v1508_v15, %v1591_v34 }
 0x1d8   :  { %v1058_v63 = vadd.f32 %v1057_v16, %v1056_v58  ;;  %v1595_v2 = vsel %vm1594_vm6, %v1509_v33, %v1593_v12  ;;  %v1052_v6 = vadd.f32 %v1051_v51, %v1050_v56 }
 0x1d9   :  { %5200 = vmatprep.mubr.f32.mxu0 %v1595_v2 }
 0x1da   :  { %v1201_v7 = vmul.f32 0.125, %v1058_v63  ;;  %v5057_v62 = vpop.f32.mrb[10].mxu0  ;;  %v1200_v8 = vmul.f32 0.125, %v1052_v6 }
 0x1db   :  { %v896_v19 = vadd.f32 %v5057_v62, %v6300_v61  ;;  %v890_v11 = vpop.f32.mrb[11].mxu0 }
 0x1dc   :  { %v1511_v13 = vmax.f32 %v1201_v7, 0.0  ;;  %v891_v28 = vadd.f32 %v6300_v61, %v890_v11  ;;  %v1510_v0 = vmax.f32 %v1200_v8, 0.0 }
 0x1dd   :  { %v1065_v18 = vrot.slane %v896_v19, 4  ;;  %v1235_v23 = vmax.f32 %v896_v19, 0.0 }
 0x1de   :  { %v1059_v60 = vrot.slane %v891_v28, 4  ;;  %v1234_v21 = vmax.f32 %v891_v28, 0.0  ;;  %v1596_v41 = vsel %vm1582_vm0, %v1511_v13, %v1510_v0 }
 0x1df   :  { %v1066_v4 = vadd.f32 %v1065_v18, %v896_v19 }
 0x1e0   :  { %v1060_v24 = vadd.f32 %v1059_v60, %v891_v28  ;;  %5135 = vmatprep.mubr.f32.mxu1 %v1234_v21 }
 0x1e1   :  { %v1067_v55 = vrot.slane %v1066_v4, 2  ;;  %5136 = vmatmul.mubr.f32.gmra.mrb[10].mxu1 %v1235_v23 }
 0x1e2   :  { %v1061_v29 = vrot.slane %v1060_v24, 2 }
 0x1e3   :  { %v1068_v20 = vadd.f32 %v1067_v55, %v1066_v4 }
 0x1e4   :  { %v1062_v26 = vadd.f32 %v1061_v29, %v1060_v24 }
 0x1e5   :  { %v1069_v3 = vrot.slane %v1068_v20, 1 }
 0x1e6   :  { %v1063_v53 = vrot.slane %v1062_v26, 1 }
 0x1e7   :  { %v1070_v30 = vadd.f32 %v1069_v3, %v1068_v20 }
 0x1e8   :  { %v1064_v32 = vadd.f32 %v1063_v53, %v1062_v26 }
 0x1e9   :  { %v1203_v35 = vmul.f32 0.125, %v1070_v30 }
 0x1ea   :  { %v1202_v36 = vmul.f32 0.125, %v1064_v32 }
 0x1eb   :  { %v1513_v38 = vmax.f32 %v1203_v35, 0.0 }
 0x1ec   :  { %v1512_v40 = vmax.f32 %v1202_v36, 0.0 }
 0x1ed   :  { %v5060_v10 = vpop.f32.mrb[12].mxu0 }
 0x1ee   :  { %v1597_v42 = vsel %vm1584_vm1, %v1512_v40, %v1596_v41  ;;  %v906_v31 = vadd.f32 %v5060_v10, %v6300_v61  ;;  %v900_v59 = vpop.f32.mrb[13].mxu0 }
 0x1ef   :  { %v901_v43 = vadd.f32 %v6300_v61, %v900_v59  ;;  %v1598_v14 = vsel %vm1586_vm2, %v1513_v38, %v1597_v42 }
 0x1f0   :  { %v1077_v37 = vrot.slane %v906_v31, 4  ;;  %v1237_v22 = vmax.f32 %v906_v31, 0.0 }
 0x1f1   :  { %v1071_v44 = vrot.slane %v901_v43, 4  ;;  %v1236_v1 = vmax.f32 %v901_v43, 0.0 }
 0x1f2   :  { %v1078_v45 = vadd.f32 %v1077_v37, %v906_v31 }
 0x1f3   :  { %v1072_v46 = vadd.f32 %v1071_v44, %v901_v43  ;;  %5138 = vmatprep.mubr.f32.mxu1 %v1236_v1 }
 0x1f4   :  { %v1079_v5 = vrot.slane %v1078_v45, 2  ;;  %5139 = vmatmul.mubr.f32.gmra.mrb[12].mxu1 %v1237_v22 }
 0x1f5   :  { %v1073_v47 = vrot.slane %v1072_v46, 2 }
 0x1f6   :  { %v1080_v48 = vadd.f32 %v1079_v5, %v1078_v45 }
 0x1f7   :  { %v1074_v49 = vadd.f32 %v1073_v47, %v1072_v46 }
 0x1f8   :  { %v1081_v17 = vrot.slane %v1080_v48, 1 }
 0x1f9   :  { %v1075_v9 = vrot.slane %v1074_v49, 1 }
 0x1fa   :  { %v1082_v50 = vadd.f32 %v1081_v17, %v1080_v48 }
 0x1fb   :  { %v1076_v52 = vadd.f32 %v1075_v9, %v1074_v49 }
 0x1fc   :  { %v1205_v54 = vmul.f32 0.125, %v1082_v50 }
 0x1fd   :  { %v1204_v39 = vmul.f32 0.125, %v1076_v52 }
 0x1fe   :  { %v1515_v57 = vmax.f32 %v1205_v54, 0.0 }
 0x1ff   :  { %v1514_v27 = vmax.f32 %v1204_v39, 0.0 }
 0x200   :  { %v5063_v58 = vpop.f32.mrb[14].mxu0 }
 0x201   :  { %v916_v25 = vadd.f32 %v5063_v58, %v6300_v61  ;;  %v910_v56 = vpop.f32.mrb[15].mxu0  ;;  %v1599_v15 = vsel %vm1588_vm3, %v1514_v27, %v1598_v14 }
 0x202   :  { %v911_v34 = vadd.f32 %v6300_v61, %v910_v56  ;;  %v1600_v16 = vsel %vm1590_vm4, %v1515_v57, %v1599_v15 }
 0x203   :  { %v1089_v33 = vrot.slane %v916_v25, 4  ;;  %v1239_v2 = vmax.f32 %v916_v25, 0.0 }
 0x204   :  { %v1083_v51 = vrot.slane %v911_v34, 4  ;;  %v1238_v12 = vmax.f32 %v911_v34, 0.0 }
 0x205   :  { %v1090_v63 = vadd.f32 %v1089_v33, %v916_v25 }
 0x206   :  { %v1084_v6 = vadd.f32 %v1083_v51, %v911_v34  ;;  %5141 = vmatprep.mubr.f32.mxu1 %v1238_v12 }
 0x207   :  { %v1091_v7 = vrot.slane %v1090_v63, 2  ;;  %5142 = vmatmul.mubr.f32.gmra.mrb[14].mxu1 %v1239_v2 }
 0x208   :  { %v1085_v62 = vrot.slane %v1084_v6, 2 }
 0x209   :  { %v1092_v8 = vadd.f32 %v1091_v7, %v1090_v63 }
 0x20a   :  { %v1086_v19 = vadd.f32 %v1085_v62, %v1084_v6 }
 0x20b   :  { %v1093_v11 = vrot.slane %v1092_v8, 1 }
 0x20c   :  { %v1087_v13 = vrot.slane %v1086_v19, 1 }
 0x20d   :  { %v1094_v28 = vadd.f32 %v1093_v11, %v1092_v8 }
 0x20e   :  { %v1088_v0 = vadd.f32 %v1087_v13, %v1086_v19 }
 0x20f   :  { %v1207_v18 = vmul.f32 0.125, %v1094_v28 }
 0x210   :  { %v1206_v60 = vmul.f32 0.125, %v1088_v0 }
 0x211   :  { %v1517_v41 = vmax.f32 %v1207_v18, 0.0 }
 0x212   :  { %v1516_v21 = vmax.f32 %v1206_v60, 0.0 }
 0x213   :  { %v5066_v4 = vpop.f32.mrb[16].mxu0 }
 0x214   :  { %v926_v23 = vadd.f32 %v5066_v4, %v6300_v61  ;;  %v920_v24 = vpop.f32.mrb[17].mxu0  ;;  %v1601_v55 = vsel %vm1592_vm5, %v1516_v21, %v1600_v16 }
 0x215   :  { %v921_v29 = vadd.f32 %v6300_v61, %v920_v24  ;;  %v1602_v20 = vsel %vm1594_vm6, %v1517_v41, %v1601_v55 }
 0x216   :  { %v1101_v26 = vrot.slane %v926_v23, 4  ;;  %5201 = vmatmul.mubr.f32.vlgmr.msra.gmra.mrb[32].mxu0 %v1602_v20  ;;  %v1241_v32 = vmax.f32 %v926_v23, 0.0 }
 0x217   :  { %v1095_v3 = vrot.slane %v921_v29, 4  ;;  %v1240_v53 = vmax.f32 %v921_v29, 0.0 }
 0x218   :  { %v1102_v30 = vadd.f32 %v1101_v26, %v926_v23  ;;  %v2354_v26 = vld [vmem:[#allocation2 + $0x188] sm:$0xff] }
 0x219   :  { %v1096_v35 = vadd.f32 %v1095_v3, %v921_v29  ;;  %5144 = vmatprep.mubr.f32.mxu1 %v1240_v53  ;;  %v2355_v3 = vld [vmem:[#allocation2 + $0x190] sm:$0xff] }
 0x21a   :  { %v1103_v36 = vrot.slane %v1102_v30, 2  ;;  %5145 = vmatmul.mubr.f32.gmra.mrb[16].mxu1 %v1241_v32  ;;  %v5576_v53 = vpack.c.bf16 %v2355_v3, %v2354_v26 }
 0x21b   :  { %v1097_v40 = vrot.slane %v1096_v35, 2 }
 0x21c   :  { %v1104_v38 = vadd.f32 %v1103_v36, %v1102_v30  ;;  %5577 = vmatprep.subr.bf16.mxu1 %v5576_v53 }
 0x21d   :  { %v1098_v10 = vadd.f32 %v1097_v40, %v1096_v35  ;;  %5579 = vmatpush3.bf16.msra.mxu1 %v5576_v53  ;;  %v2364_v53 = vld [vmem:[#allocation2 + $0x1d8] sm:$0xff] }
 0x21e   :  { %v1105_v42 = vrot.slane %v1104_v38, 1 }
 0x21f   :  { %v1099_v31 = vrot.slane %v1098_v10, 1 }
 0x220   :  { %v1106_v59 = vadd.f32 %v1105_v42, %v1104_v38 }
 0x221   :  { %v1100_v43 = vadd.f32 %v1099_v31, %v1098_v10 }
 0x222   :  { %v1209_v14 = vmul.f32 0.125, %v1106_v59 }
 0x223   :  { %v1208_v37 = vmul.f32 0.125, %v1100_v43 }
 0x224   :  { %v1519_v44 = vmax.f32 %v1209_v14, 0.0 }
 0x225   :  { %v1518_v1 = vmax.f32 %v1208_v37, 0.0 }
 0x226   :  { %v5069_v45 = vpop.f32.mrb[18].mxu0 }
 0x227   :  { %v1603_v22 = vsel %vm1582_vm0, %v1519_v44, %v1518_v1  ;;  %v936_v46 = vadd.f32 %v5069_v45, %v6300_v61  ;;  %v930_v5 = vpop.f32.mrb[19].mxu0 }
 0x228   :  { %v931_v47 = vadd.f32 %v6300_v61, %v930_v5 }
 0x229   :  { %v1113_v48 = vrot.slane %v936_v46, 4  ;;  %v1243_v50 = vmax.f32 %v936_v46, 0.0 }
 0x22a   :  { %v1107_v49 = vrot.slane %v931_v47, 4  ;;  %v1242_v17 = vmax.f32 %v931_v47, 0.0 }
 0x22b   :  { %v1114_v9 = vadd.f32 %v1113_v48, %v936_v46 }
 0x22c   :  { %v1108_v52 = vadd.f32 %v1107_v49, %v931_v47  ;;  %5147 = vmatprep.mubr.f32.mxu1 %v1242_v17 }
 0x22d   :  { %v1115_v54 = vrot.slane %v1114_v9, 2  ;;  %5148 = vmatmul.mubr.f32.gmra.mrb[18].mxu1 %v1243_v50  ;;  %v2356_v50 = vld [vmem:[#allocation2 + $0x198] sm:$0xff] }
 0x22e   :  { %v1109_v39 = vrot.slane %v1108_v52, 2 }
 0x22f   :  { %v1116_v27 = vadd.f32 %v1115_v54, %v1114_v9  ;;  %v2358_v54 = vld [vmem:[#allocation2 + $0x1a8] sm:$0xff] }
 0x230   :  { %v1110_v57 = vadd.f32 %v1109_v39, %v1108_v52  ;;  %v2357_v52 = vld [vmem:[#allocation2 + $0x1a0] sm:$0xff] }
 0x231   :  { %v1117_v58 = vrot.slane %v1116_v27, 1  ;;  %v5580_v39 = vpack.c.bf16 %v2357_v52, %v2356_v50  ;;  %v2368_v52 = vld [vmem:[#allocation2 + $0x1f8] sm:$0xff] }
 0x232   :  { %v1111_v25 = vrot.slane %v1110_v57, 1 }
 0x233   :  { %v1118_v56 = vadd.f32 %v1117_v58, %v1116_v27  ;;  %v2359_v27 = vld [vmem:[#allocation2 + $0x1b0] sm:$0xff]  ;;  %5581 = vmatprep.subr.bf16.mxu1 %v5580_v39 }
 0x234   :  { %v1112_v15 = vadd.f32 %v1111_v25, %v1110_v57  ;;  %v5584_v58 = vpack.c.bf16 %v2359_v27, %v2358_v54  ;;  %v2360_v25 = vld [vmem:[#allocation2 + $0x1b8] sm:$0xff]  ;;  %5583 = vmatpush3.bf16.msra.mxu1 %v5580_v39  ;;  %v2369_v54 = vld [vmem:[#allocation2 + $0x200] sm:$0xff] }
 0x235   :  { %v1211_v34 = vmul.f32 0.125, %v1118_v56  ;;  %v2361_v56 = vld [vmem:[#allocation2 + $0x1c0] sm:$0xff]  ;;  %v5604_v27 = vpack.c.bf16 %v2369_v54, %v2368_v52 }
 0x236   :  { %v1210_v16 = vmul.f32 0.125, %v1112_v15  ;;  %5585 = vmatprep.subr.bf16.mxu1 %v5584_v58 }
 0x237   :  { %v1521_v51 = vmax.f32 %v1211_v34, 0.0 }
 0x238   :  { %v1520_v33 = vmax.f32 %v1210_v16, 0.0  ;;  %5587 = vmatpush3.bf16.msra.mxu1 %v5584_v58  ;;  %v2636_v58 = vld [vmem:[#allocation2 + $0x228] sm:$0xff] }
 0x239   :  { %v5072_v12 = vpop.f32.mrb[20].mxu0 }
 0x23a   :  { %v946_v63 = vadd.f32 %v5072_v12, %v6300_v61  ;;  %v940_v2 = vpop.f32.mrb[21].mxu0  ;;  %v1604_v6 = vsel %vm1584_vm1, %v1520_v33, %v1603_v22 }
 0x23b   :  { %v941_v7 = vadd.f32 %v6300_v61, %v940_v2  ;;  %v1605_v62 = vsel %vm1586_vm2, %v1521_v51, %v1604_v6  ;;  %v5588_v2 = vpack.c.bf16 %v2361_v56, %v2360_v25  ;;  %v2637_v25 = vld [vmem:[#allocation2 + $0x230] sm:$0xff] }
 0x23c   :  { %v1125_v8 = vrot.slane %v946_v63, 4  ;;  %v1245_v28 = vmax.f32 %v946_v63, 0.0 }
 0x23d   :  { %v1119_v19 = vrot.slane %v941_v7, 4  ;;  %v1244_v11 = vmax.f32 %v941_v7, 0.0  ;;  %5589 = vmatprep.subr.bf16.mxu1 %v5588_v2 }
 0x23e   :  { %v1126_v13 = vadd.f32 %v1125_v8, %v946_v63  ;;  %5591 = vmatpush3.bf16.msra.mxu1 %v5588_v2 }
 0x23f   :  { %v1120_v0 = vadd.f32 %v1119_v19, %v941_v7  ;;  %5150 = vmatprep.mubr.f32.mxu1 %v1244_v11  ;;  %v2362_v7 = vld [vmem:[#allocation2 + $0x1c8] sm:$0xff] }
 0x240   :  { %v1127_v18 = vrot.slane %v1126_v13, 2  ;;  %5151 = vmatmul.mubr.f32.gmra.mrb[20].mxu1 %v1245_v28 }
 0x241   :  { %v1121_v60 = vrot.slane %v1120_v0, 2 }
 0x242   :  { %v1128_v21 = vadd.f32 %v1127_v18, %v1126_v13 }
 0x243   :  { %v1122_v41 = vadd.f32 %v1121_v60, %v1120_v0 }
 0x244   :  { %v1129_v4 = vrot.slane %v1128_v21, 1 }
 0x245   :  { %v1123_v23 = vrot.slane %v1122_v41, 1 }
 0x246   :  { %v1130_v24 = vadd.f32 %v1129_v4, %v1128_v21 }
 0x247   :  { %v1124_v55 = vadd.f32 %v1123_v23, %v1122_v41 }
 0x248   :  { %v1213_v29 = vmul.f32 0.125, %v1130_v24 }
 0x249   :  { %v1212_v20 = vmul.f32 0.125, %v1124_v55 }
 0x24a   :  { %v1523_v32 = vmax.f32 %v1213_v29, 0.0 }
 0x24b   :  { %v1522_v30 = vmax.f32 %v1212_v20, 0.0 }
 0x24c   :  { %v5075_v35 = vpop.f32.mrb[22].mxu0 }
 0x24d   :  { %v956_v36 = vadd.f32 %v5075_v35, %v6300_v61  ;;  %v950_v40 = vpop.f32.mrb[23].mxu0  ;;  %v1606_v38 = vsel %vm1588_vm3, %v1522_v30, %v1605_v62  ;;  %v2363_v62 = vld [vmem:[#allocation2 + $0x1d0] sm:$0xff]  ;;  %v2365_v30 = vld [vmem:[#allocation2 + $0x1e0] sm:$0xff] }
 0x24e   :  { %v951_v10 = vadd.f32 %v6300_v61, %v950_v40  ;;  %v1607_v42 = vsel %vm1590_vm4, %v1523_v32, %v1606_v38  ;;  %v5592_v0 = vpack.c.bf16 %v2363_v62, %v2362_v7  ;;  %v5596_v35 = vpack.c.bf16 %v2365_v30, %v2364_v53 }
 0x24f   :  { %v1137_v31 = vrot.slane %v956_v36, 4  ;;  %v1247_v37 = vmax.f32 %v956_v36, 0.0 }
 0x250   :  { %v1131_v59 = vrot.slane %v951_v10, 4  ;;  %v1246_v43 = vmax.f32 %v951_v10, 0.0  ;;  %5593 = vmatprep.subr.bf16.mxu1 %v5592_v0 }
 0x251   :  { %v1138_v14 = vadd.f32 %v1137_v31, %v956_v36  ;;  %5595 = vmatpush3.bf16.msra.mxu1 %v5592_v0  ;;  %v2632_v31 = vld [vmem:[#allocation2 + $0x208] sm:$0xff] }
 0x252   :  { %v1132_v44 = vadd.f32 %v1131_v59, %v951_v10  ;;  %5153 = vmatprep.mubr.f32.mxu1 %v1246_v43  ;;  %5597 = vmatprep.subr.bf16.mxu1 %v5596_v35  ;;  %v2633_v59 = vld [vmem:[#allocation2 + $0x210] sm:$0xff] }
 0x253   :  { %v1139_v1 = vrot.slane %v1138_v14, 2  ;;  %5154 = vmatmul.mubr.f32.gmra.mrb[22].mxu1 %v1247_v37  ;;  %v5608_v37 = vpack.c.bf16 %v2633_v59, %v2632_v31 }
 0x254   :  { %v1133_v45 = vrot.slane %v1132_v44, 2 }
 0x255   :  { %v1140_v22 = vadd.f32 %v1139_v1, %v1138_v14  ;;  %5599 = vmatpush3.bf16.msra.mxu1 %v5596_v35  ;;  %5609 = vmatprep.subr.bf16.mxu0 %v5608_v37  ;;  %v2645_v35 = vld [vmem:[#allocation2 + $0x270] sm:$0xff] }
 0x256   :  { %v1134_v46 = vadd.f32 %v1133_v45, %v1132_v44  ;;  %v2366_v45 = vld [vmem:[#allocation2 + $0x1e8] sm:$0xff]  ;;  %5611 = vmatpush3.bf16.msra.mxu0 %v5608_v37 }
 0x257   :  { %v1141_v5 = vrot.slane %v1140_v22, 1 }
 0x258   :  { %v1135_v47 = vrot.slane %v1134_v46, 1 }
 0x259   :  { %v1142_v48 = vadd.f32 %v1141_v5, %v1140_v22  ;;  %v2367_v22 = vld [vmem:[#allocation2 + $0x1f0] sm:$0xff] }
 0x25a   :  { %v1136_v49 = vadd.f32 %v1135_v47, %v1134_v46  ;;  %v5600_v5 = vpack.c.bf16 %v2367_v22, %v2366_v45 }
 0x25b   :  { %v1215_v17 = vmul.f32 0.125, %v1142_v48  ;;  %v2634_v48 = vld [vmem:[#allocation2 + $0x218] sm:$0xff] }
 0x25c   :  { %v1214_v9 = vmul.f32 0.125, %v1136_v49  ;;  %v2635_v49 = vld [vmem:[#allocation2 + $0x220] sm:$0xff]  ;;  %5601 = vmatprep.subr.bf16.mxu1 %v5600_v5 }
 0x25d   :  { %v1525_v34 = vmax.f32 %v1215_v17, 0.0  ;;  %5603 = vmatpush3.bf16.msra.mxu1 %v5600_v5  ;;  %v2646_v5 = vld [vmem:[#allocation2 + $0x278] sm:$0xff] }
 0x25e   :  { %v1524_v57 = vmax.f32 %v1214_v9, 0.0  ;;  %v5612_v9 = vpack.c.bf16 %v2635_v49, %v2634_v48  ;;  %5605 = vmatprep.subr.bf16.mxu1 %v5604_v27 }
 0x25f   :  { %v5078_v15 = vpop.f32.mrb[24].mxu0 }
 0x260   :  { %v966_v16 = vadd.f32 %v5078_v15, %v6300_v61  ;;  %v960_v33 = vpop.f32.mrb[25].mxu0  ;;  %v1608_v51 = vsel %vm1592_vm5, %v1524_v57, %v1607_v42  ;;  %5613 = vmatprep.subr.bf16.mxu0 %v5612_v9  ;;  %v5616_v15 = vpack.c.bf16 %v2637_v25, %v2636_v58 }
 0x261   :  { %v961_v12 = vadd.f32 %v6300_v61, %v960_v33  ;;  %v1609_v63 = vsel %vm1594_vm6, %v1525_v34, %v1608_v51  ;;  %5615 = vmatpush3.bf16.msra.mxu0 %v5612_v9  ;;  %5607 = vmatpush3.bf16.msra.mxu1 %v5604_v27  ;;  %v2638_v51 = vld [vmem:[#allocation2 + $0x238] sm:$0xff] }
 0x262   :  { %v1149_v6 = vrot.slane %v966_v16, 4  ;;  %5203 = vmatprep.mubr.f32.mxu0 %v1609_v63  ;;  %v1249_v13 = vmax.f32 %v966_v16, 0.0  ;;  %5617 = vmatprep.subr.bf16.mxu0 %v5616_v15 }
 0x263   :  { %v1143_v8 = vrot.slane %v961_v12, 4  ;;  %v1248_v19 = vmax.f32 %v961_v12, 0.0 }
 0x264   :  { %v1150_v11 = vadd.f32 %v1149_v6, %v966_v16 }
 0x265   :  { %v1144_v28 = vadd.f32 %v1143_v8, %v961_v12  ;;  %5156 = vmatprep.mubr.f32.mxu1 %v1248_v19  ;;  %5619 = vmatpush3.bf16.msra.mxu0 %v5616_v15  ;;  %v2639_v12 = vld [vmem:[#allocation2 + $0x240] sm:$0xff]  ;;  %v2640_v8 = vld [vmem:[#allocation2 + $0x248] sm:$0xff]  ;;  %v2641_v19 = vld [vmem:[#allocation2 + $0x250] sm:$0xff] }
 0x266   :  { %v1151_v18 = vrot.slane %v1150_v11, 2  ;;  %5157 = vmatmul.mubr.f32.gmra.mrb[24].mxu1 %v1249_v13  ;;  %v5620_v2 = vpack.c.bf16 %v2639_v12, %v2638_v51  ;;  %v5624_v0 = vpack.c.bf16 %v2641_v19, %v2640_v8 }
 0x267   :  { %v1145_v60 = vrot.slane %v1144_v28, 2 }
 0x268   :  { %v1152_v21 = vadd.f32 %v1151_v18, %v1150_v11  ;;  %5621 = vmatprep.subr.bf16.mxu0 %v5620_v2 }
 0x269   :  { %v1146_v41 = vadd.f32 %v1145_v60, %v1144_v28  ;;  %5623 = vmatpush3.bf16.msra.mxu0 %v5620_v2 }
 0x26a   :  { %v1153_v4 = vrot.slane %v1152_v21, 1  ;;  %5625 = vmatprep.subr.bf16.mxu0 %v5624_v0 }
 0x26b   :  { %v1147_v23 = vrot.slane %v1146_v41, 1 }
 0x26c   :  { %v1154_v24 = vadd.f32 %v1153_v4, %v1152_v21  ;;  %v2643_v4 = vld [vmem:[#allocation2 + $0x260] sm:$0xff] }
 0x26d   :  { %v1148_v55 = vadd.f32 %v1147_v23, %v1146_v41  ;;  %v2642_v41 = vld [vmem:[#allocation2 + $0x258] sm:$0xff]  ;;  %5627 = vmatpush3.bf16.msra.mxu0 %v5624_v0 }
 0x26e   :  { %v1217_v29 = vmul.f32 0.125, %v1154_v24 }
 0x26f   :  { %v1216_v20 = vmul.f32 0.125, %v1148_v55  ;;  %v5628_v55 = vpack.c.bf16 %v2643_v4, %v2642_v41 }
 0x270   :  { %v1527_v26 = vmax.f32 %v1217_v29, 0.0 }
 0x271   :  { %v1526_v3 = vmax.f32 %v1216_v20, 0.0  ;;  %5629 = vmatprep.subr.bf16.mxu0 %v5628_v55 }
 0x272   :  { %v5081_v32 = vpop.f32.mrb[26].mxu0  ;;  %5631 = vmatpush3.bf16.msra.mxu0 %v5628_v55  ;;  %v5851_v55 = vmov 1966171168  }
 0x273   :  { %v1610_v36 = vsel %vm1582_vm0, %v1527_v26, %v1526_v3  ;;  %v976_v40 = vadd.f32 %v5081_v32, %v6300_v61  ;;  %v970_v38 = vpop.f32.mrb[27].mxu0  ;;  %v2644_v32 = vld [vmem:[#allocation2 + $0x268] sm:$0xff] }
 0x274   :  { %v971_v10 = vadd.f32 %v6300_v61, %v970_v38 }
 0x275   :  { %v1161_v42 = vrot.slane %v976_v40, 4  ;;  %v1251_v1 = vmax.f32 %v976_v40, 0.0 }
 0x276   :  { %v1155_v43 = vrot.slane %v971_v10, 4  ;;  %v1250_v14 = vmax.f32 %v971_v10, 0.0 }
 0x277   :  { %v1162_v44 = vadd.f32 %v1161_v42, %v976_v40  ;;  %v5632_v40 = vpack.c.bf16 %v2645_v35, %v2644_v32 }
 0x278   :  { %v1156_v46 = vadd.f32 %v1155_v43, %v971_v10  ;;  %5159 = vmatprep.mubr.f32.mxu1 %v1250_v14 }
 0x279   :  { %v1163_v47 = vrot.slane %v1162_v44, 2  ;;  %5160 = vmatmul.mubr.f32.gmra.mrb[26].mxu1 %v1251_v1  ;;  %5633 = vmatprep.subr.bf16.mxu0 %v5632_v40 }
 0x27a   :  { %v1157_v17 = vrot.slane %v1156_v46, 2  ;;  %5635 = vmatpush3.bf16.msra.mxu0 %v5632_v40 }
 0x27b   :  { %v1164_v50 = vadd.f32 %v1163_v47, %v1162_v44  ;;  %v2647_v47 = vld [vmem:[#allocation2 + $0x280] sm:$0xff] }
 0x27c   :  { %v1158_v39 = vadd.f32 %v1157_v17, %v1156_v46  ;;  %v5636_v9 = vpack.c.bf16 %v2647_v47, %v2646_v5 }
 0x27d   :  { %v1165_v57 = vrot.slane %v1164_v50, 1 }
 0x27e   :  { %v1159_v56 = vrot.slane %v1158_v39, 1  ;;  %5637 = vmatprep.subr.bf16.mxu0 %v5636_v9 }
 0x27f   :  { %v1166_v34 = vadd.f32 %v1165_v57, %v1164_v50  ;;  %5639 = vmatpush3.bf16.msra.mxu0 %v5636_v9 }
 0x280   :  { %v1160_v16 = vadd.f32 %v1159_v56, %v1158_v39 }
 0x281   :  { %v1219_v33 = vmul.f32 0.125, %v1166_v34 }
 0x282   :  { %v1218_v63 = vmul.f32 0.125, %v1160_v16 }
 0x283   :  { %v1529_v7 = vmax.f32 %v1219_v33, 0.0 }
 0x284   :  { %v1528_v6 = vmax.f32 %v1218_v63, 0.0 }
 0x285   :  { %v5084_v62 = vpop.f32.mrb[28].mxu0 }
 0x286   :  { %v986_v11 = vadd.f32 %v5084_v62, %v6300_v61  ;;  %v980_v13 = vpop.f32.mrb[29].mxu0  ;;  %v1611_v28 = vsel %vm1584_vm1, %v1528_v6, %v1610_v36 }
 0x287   :  { %v981_v18 = vadd.f32 %v6300_v61, %v980_v13  ;;  %v1612_v60 = vsel %vm1586_vm2, %v1529_v7, %v1611_v28 }
 0x288   :  { %v1173_v21 = vrot.slane %v986_v11, 4  ;;  %v1253_v20 = vmax.f32 %v986_v11, 0.0 }
 0x289   :  { %v1167_v23 = vrot.slane %v981_v18, 4  ;;  %v1252_v24 = vmax.f32 %v981_v18, 0.0 }
 0x28a   :  { %v1174_v29 = vadd.f32 %v1173_v21, %v986_v11 }
 0x28b   :  { %v1168_v26 = vadd.f32 %v1167_v23, %v981_v18  ;;  %5162 = vmatprep.mubr.f32.mxu1 %v1252_v24 }
 0x28c   :  { %v1175_v3 = vrot.slane %v1174_v29, 2  ;;  %5163 = vmatmul.mubr.f32.gmra.mrb[28].mxu1 %v1253_v20  ;;  %v1714_v20 = vlaneseq }
 0x28d   :  { %v1169_v53 = vrot.slane %v1168_v26, 2 }
 0x28e   :  { %v1176_v30 = vadd.f32 %v1175_v3, %v1174_v29  ;;  %v1712_v29 = vunpack.c.l.s4 %v5851_v55  ;;  %v1715_v3 = vshrl.u32 %v1714_v20, 7 }
 0x28f   :  { %v1170_v36 = vadd.f32 %v1169_v53, %v1168_v26  ;;  %v6380_v53 = vld [vmem:[%s7386_s2 + $0x2] ss:$0 sm:$0xff] }
 0x290   :  { %v1177_v38 = vrot.slane %v1176_v30, 1  ;;  %v1713_v26 = vunpack.c.0.s8 %v1712_v29 }
 0x291   :  { %v1171_v10 = vrot.slane %v1170_v36, 1  ;;  %v6367_v42 = vpop.f32.mrb[0].mxu1 }
 0x292   :  { %v1178_v31 = vadd.f32 %v1177_v38, %v1176_v30  ;;  %v6369_v59 = vpop.f32.mrb[1].mxu1  ;;  %v6382_v30 = vsub.s32 %v1713_v26, %v1715_v3  ;;  %v6386_v32 = vadd.f32 %v6367_v42, %v6380_v53 }
 0x293   :  { %v1172_v43 = vadd.f32 %v1171_v10, %v1170_v36  ;;  %v6390_v35 = vadd.f32 %v6380_v53, %v6369_v59  ;;  %v6392_v36 = vsub.s32 0, %v1715_v3 }
 0x294   :  { %v1221_v14 = vmul.f32 0.125, %v1178_v31 }
 0x295   :  { %v1220_v37 = vmul.f32 0.125, %v1172_v43  ;;  %v5125_v44 = vpop.f32.mrb[2].mxu1 }
 0x296   :  { %v1353_v1 = vpop.f32.mrb[3].mxu1  ;;  %v1531_v22 = vmax.f32 %v1221_v14, 0.0  ;;  %v6395_v40 = vadd.f32 %v5125_v44, %v6380_v53 }
 0x297   :  { %v1530_v45 = vmax.f32 %v1220_v37, 0.0  ;;  %v6398_v38 = vadd.f32 %v6380_v53, %v1353_v1 }
 0x298   :  { %v5087_v46 = vpop.f32.mrb[30].mxu0 }
 0x299   :  { %v996_v48 = vadd.f32 %v5087_v46, %v6300_v61  ;;  %v990_v49 = vpop.f32.mrb[31].mxu0  ;;  %v1613_v17 = vsel %vm1588_vm3, %v1530_v45, %v1612_v60 }
 0x29a   :  { %v991_v50 = vadd.f32 %v6300_v61, %v990_v49  ;;  %v1614_v52 = vsel %vm1590_vm4, %v1531_v22, %v1613_v17 }
 0x29b   :  { %v1185_v54 = vrot.slane %v996_v48, 4  ;;  %v1255_v58 = vmax.f32 %v996_v48, 0.0 }
 0x29c   :  { %v1179_v39 = vrot.slane %v991_v50, 4  ;;  %v1254_v27 = vmax.f32 %v991_v50, 0.0 }
 0x29d   :  { %v1186_v57 = vadd.f32 %v1185_v54, %v996_v48 }
 0x29e   :  { %v1180_v25 = vadd.f32 %v1179_v39, %v991_v50  ;;  %5165 = vmatprep.mubr.f32.mxu1 %v1254_v27 }
 0x29f   :  { %v1187_v56 = vrot.slane %v1186_v57, 2  ;;  %v5128_v15 = vpop.f32.mrb[4].mxu1  ;;  %5166 = vmatmul.mubr.f32.gmra.mrb[30].mxu1 %v1255_v58 }
 0x2a0   :  { %v1181_v34 = vrot.slane %v1180_v25, 2  ;;  %v1363_v16 = vpop.f32.mrb[5].mxu1  ;;  %v6401_v10 = vadd.f32 %v5128_v15, %v6380_v53 }
 0x2a1   :  { %v1188_v33 = vadd.f32 %v1187_v56, %v1186_v57  ;;  %v6404_v31 = vadd.f32 %v6380_v53, %v1363_v16 }
 0x2a2   :  { %v1182_v51 = vadd.f32 %v1181_v34, %v1180_v25 }
 0x2a3   :  { %v1189_v12 = vrot.slane %v1188_v33, 1 }
 0x2a4   :  { %v1183_v61 = vrot.slane %v1182_v51, 1  ;;  %v5131_v63 = vpop.f32.mrb[6].mxu1 }
 0x2a5   :  { %v1373_v2 = vpop.f32.mrb[7].mxu1  ;;  %v1190_v6 = vadd.f32 %v1189_v12, %v1188_v33  ;;  %v6407_v43 = vadd.f32 %v5131_v63, %v6380_v53 }
 0x2a6   :  { %v1184_v7 = vadd.f32 %v1183_v61, %v1182_v51  ;;  %v6410_v59 = vadd.f32 %v6380_v53, %v1373_v2 }
 0x2a7   :  { %v1223_v62 = vmul.f32 0.125, %v1190_v6 }
 0x2a8   :  { %v5134_v8 = vpop.f32.mrb[8].mxu1  ;;  %v1222_v19 = vmul.f32 0.125, %v1184_v7 }
 0x2a9   :  { %v1383_v11 = vpop.f32.mrb[9].mxu1  ;;  %v1533_v28 = vmax.f32 %v1223_v62, 0.0  ;;  %v6414_v1 = vadd.f32 %v5134_v8, %v6380_v53 }
 0x2aa   :  { %v1532_v13 = vmax.f32 %v1222_v19, 0.0  ;;  %v1384_v45 = vadd.f32 %v6380_v53, %v1383_v11 }
 0x2ac   :  { %v1615_v0 = vsel %vm1592_vm5, %v1532_v13, %v1614_v52 }
 0x2ad   :  { %v1616_v18 = vsel %vm1594_vm6, %v1533_v28, %v1615_v0 }
 0x2ae   :  { %5204 = vmatmul.mubr.f32.gmra.mrb[34].mxu0 %v1616_v18 }
 0x2b4   :  { %v5137_v60 = vpop.f32.mrb[10].mxu1 }
 0x2b5   :  { %v1393_v21 = vpop.f32.mrb[11].mxu1  ;;  %v6419_v5 = vadd.f32 %v5137_v60, %v6380_v53 }
 0x2b6   :  { %v6424_v17 = vadd.f32 %v6380_v53, %v1393_v21 }
 0x2c7   :  { %v5140_v41 = vpop.f32.mrb[12].mxu1 }
 0x2c8   :  { %v1403_v4 = vpop.f32.mrb[13].mxu1  ;;  %v1409_v9 = vadd.f32 %v5140_v41, %v6380_v53 }
 0x2c9   :  { %v6431_v39 = vadd.f32 %v6380_v53, %v1403_v4 }
 0x2da   :  { %v5143_v23 = vpop.f32.mrb[14].mxu1 }
 0x2db   :  { %v1413_v24 = vpop.f32.mrb[15].mxu1  ;;  %v1419_v33 = vadd.f32 %v5143_v23, %v6380_v53 }
 0x2dc   :  { %v1414_v63 = vadd.f32 %v6380_v53, %v1413_v24 }
 0x2e9   :  { %v5202_v42 = vpop.f32.mrb[32].mxu0 }
 0x2ea   :  { %v1759_v14 = vcombine.high %v5202_v42, %v5202_v42  ;;  %v1766_v37 = vrot.slane %v5202_v42, %v6382_v30  ;;  %v1687_v44 = vpop.f32.mrb[33].mxu0 }
 0x2eb   :  { %v1710_v22 = vcombine.high %v1687_v44, %v1687_v44  ;;  %v1717_v46 = vrot.slane %v1687_v44, %v6382_v30 }
 0x2ec   :  { %v1773_v47 = vrot.slane %v1759_v14, %v6382_v30  ;;  %v1774_v48 = vcombine.high %v1766_v37, %v1766_v37  ;;  %v1782_v49 = vrot.slane %v1766_v37, %v6382_v30 }
 0x2ed   :  { %v1724_v50 = vrot.slane %v1710_v22, %v6382_v30  ;;  %v1725_v52 = vcombine.high %v1717_v46, %v1717_v46  ;;  %v6428_v54 = vpop.f32.mrb[16].mxu1  ;;  %v1733_v34 = vrot.slane %v1717_v46, %v6382_v30 }
 0x2ee   :  { %v1775_v27 = vcombine.high %v1773_v47, %v1773_v47  ;;  %v6434_v57 = vrot.slane %v1773_v47, %v6382_v30  ;;  %v6437_v58 = vrot.slane %v1774_v48, %v6382_v30  ;;  %v6439_v25 = vpop.f32.mrb[17].mxu1  ;;  %v1941_v56 = vrot.slane %v1782_v49, %v6392_v36 }
 0x2ef   :  { %v1726_v15 = vcombine.high %v1724_v50, %v1724_v50  ;;  %v1740_v16 = vrot.slane %v1724_v50, %v6382_v30  ;;  %v1747_v61 = vrot.slane %v1725_v52, %v6382_v30  ;;  %v1804_v2 = vcombine.high %v1782_v49, %v1782_v49 }
 0x2f0   :  { %v1803_v51 = vrot.slane %v1775_v27, %v6382_v30  ;;  %v1805_v12 = vcombine.high %v6434_v57, %v6434_v57  ;;  %v1806_v6 = vcombine.high %v6437_v58, %v6437_v58  ;;  %v6452_v7 = vadd.f32 %v1941_v56, %v1384_v45 }
 0x2f1   :  { %v1945_v8 = vrot.slane %v6437_v58, %v6392_v36  ;;  %v6460_v28 = vrot.slane %v1726_v15, %v6382_v30  ;;  %v1755_v0 = vcombine.high %v1733_v34, %v1733_v34  ;;  %v1756_v18 = vcombine.high %v1740_v16, %v1740_v16 }
 0x2f2   :  { %v1807_v62 = vcombine.high %v1803_v51, %v1803_v51  ;;  %v1961_v19 = vrot.slane %v1803_v51, %v6392_v36  ;;  %v1965_v11 = vrot.slane %v1805_v12, %v6392_v36  ;;  %v2146_v13 = vrot.slane %v6452_v7, 4 }
 0x2f3   :  { %v1757_v4 = vcombine.high %v1747_v61, %v1747_v61  ;;  %v1909_v24 = vrot.slane %v1733_v34, %v6392_v36  ;;  %v1913_v55 = vrot.slane %v1747_v61, %v6392_v36  ;;  %v1917_v29 = vrot.slane %v1755_v0, %v6392_v36 }
 0x2f4   :  { %v1969_v60 = vrot.slane %v1807_v62, %v6392_v36  ;;  %v6463_v21 = vadd.f32 %v1961_v19, %v1409_v9  ;;  %v6465_v41 = vadd.f32 %v1965_v11, %v1414_v63  ;;  %v2147_v23 = vadd.f32 %v2146_v13, %v6452_v7 }
 0x2f5   :  { %v6472_v20 = vrot.slane %v1804_v2, %v6392_v36  ;;  %v1957_v26 = vrot.slane %v6434_v57, %v6392_v36  ;;  %v6480_v14 = vrot.slane %v1806_v6, %v6392_v36  ;;  %v1758_v45 = vcombine.high %v6460_v28, %v6460_v28 }
 0x2f6   :  { %v6476_v3 = vadd.f32 %v1969_v60, %v1419_v33  ;;  %v2176_v42 = vrot.slane %v6463_v21, 4  ;;  %v2148_v37 = vrot.slane %v2147_v23, 2  ;;  %v2182_v44 = vrot.slane %v6465_v41, 4 }
 0x2f7   :  { %v1921_v22 = vrot.slane %v1757_v4, %v6392_v36  ;;  %v1925_v46 = vrot.slane %v1740_v16, %v6392_v36  ;;  %v2066_v47 = vadd.f32 %v1909_v24, %v6390_v35  ;;  %v2067_v48 = vadd.f32 %v1913_v55, %v6386_v32 }
 0x2f8   :  { %v2149_v49 = vadd.f32 %v2148_v37, %v2147_v23  ;;  %v1929_v9 = vrot.slane %v6460_v28, %v6392_v36  ;;  %v1933_v50 = vrot.slane %v1756_v18, %v6392_v36  ;;  %v2068_v52 = vadd.f32 %v1917_v29, %v6398_v38 }
 0x2f9   :  { %v6494_v27 = vadd.f32 %v2176_v42, %v6463_v21  ;;  %v2098_v56 = vrot.slane %v2066_v47, 4  ;;  %v2104_v15 = vrot.slane %v2067_v48, 4  ;;  %v2322_v34 = vmax.f32 %v2066_v47, 0.0 }
 0x2fa   :  { %v2150_v33 = vrot.slane %v2149_v49, 1  ;;  %v2323_v16 = vmax.f32 %v2067_v48, 0.0  ;;  %v2110_v51 = vrot.slane %v2068_v52, 4  ;;  %v2324_v35 = vmax.f32 %v2068_v52, 0.0 }
 0x2fb   :  { %v2099_v12 = vadd.f32 %v2098_v56, %v2066_v47  ;;  %v2105_v32 = vadd.f32 %v2104_v15, %v2067_v48  ;;  %5238 = vmatprep.mubr.f32.mxu1 %v2322_v34  ;;  %v2069_v61 = vadd.f32 %v1921_v22, %v6395_v40  ;;  %v2070_v63 = vadd.f32 %v1925_v46, %v6404_v31 }
 0x2fc   :  { %v2151_v2 = vadd.f32 %v2150_v33, %v2149_v49  ;;  %5239 = vmatmul.mubr.f32.vlgmr.msra.gmra.mrb[32].mxu1 %v2323_v16  ;;  %v2111_v38 = vadd.f32 %v2110_v51, %v2068_v52  ;;  %v2071_v6 = vadd.f32 %v1929_v9, %v6401_v10  ;;  %v2072_v62 = vadd.f32 %v1933_v50, %v6410_v59 }
 0x2fd   :  { %v2100_v19 = vrot.slane %v2099_v12, 2  ;;  %v2106_v11 = vrot.slane %v2105_v32, 2  ;;  %5241 = vmatprep.mubr.f32.mxu1 %v2324_v35  ;;  %v2116_v13 = vrot.slane %v2069_v61, 4  ;;  %v2325_v0 = vmax.f32 %v2069_v61, 0.0 }
 0x2fe   :  { %v6500_v18 = vmul.f32 0.125, %v2151_v2  ;;  %v2112_v60 = vrot.slane %v2111_v38, 2  ;;  %v2122_v4 = vrot.slane %v2070_v63, 4  ;;  %v2326_v23 = vmax.f32 %v2070_v63, 0.0 }
 0x2ff   :  { %v2101_v40 = vadd.f32 %v2100_v19, %v2099_v12  ;;  %v2107_v24 = vadd.f32 %v2106_v11, %v2105_v32  ;;  %v2117_v31 = vadd.f32 %v2116_v13, %v2069_v61  ;;  %v2128_v55 = vrot.slane %v2071_v6, 4 }
 0x300   :  { %v6502_v29 = vpop.f32.mrb[18].mxu1  ;;  %v2178_v10 = vrot.slane %v6494_v27, 2  ;;  %v6506_v59 = vadd.f32 %v2182_v44, %v6465_v41  ;;  %v2113_v42 = vadd.f32 %v2112_v60, %v2111_v38  ;;  %5242 = vmatmul.mubr.f32.gmra.mrb[34].mxu1 %v2325_v0  ;;  %v2123_v37 = vadd.f32 %v2122_v4, %v2070_v63 }
 0x301   :  { %v6508_v22 = vpop.f32.mrb[19].mxu1  ;;  %v2102_v46 = vrot.slane %v2101_v40, 1  ;;  %v2108_v47 = vrot.slane %v2107_v24, 1  ;;  %v2118_v48 = vrot.slane %v2117_v31, 2  ;;  %5244 = vmatprep.mubr.f32.mxu1 %v2326_v23  ;;  %v2129_v49 = vadd.f32 %v2128_v55, %v2071_v6 }
 0x302   :  { %v2114_v9 = vrot.slane %v2113_v42, 1  ;;  %v2124_v50 = vrot.slane %v2123_v37, 2  ;;  %v2327_v52 = vmax.f32 %v2071_v6, 0.0  ;;  %v2134_v56 = vrot.slane %v2072_v62, 4 }
 0x303   :  { %v2608_v15 = vmax.f32 %v6500_v18, 0.0  ;;  %v2103_v34 = vadd.f32 %v2102_v46, %v2101_v40  ;;  %v2109_v33 = vadd.f32 %v2108_v47, %v2107_v24  ;;  %v2119_v44 = vadd.f32 %v2118_v48, %v2117_v31 }
 0x304   :  { %v2115_v16 = vadd.f32 %v2114_v9, %v2113_v42  ;;  %v2125_v51 = vadd.f32 %v2124_v50, %v2123_v37  ;;  %v2130_v35 = vrot.slane %v2129_v49, 2  ;;  %5245 = vmatmul.mubr.f32.gmra.mrb[36].mxu1 %v2327_v52  ;;  %v2328_v12 = vmax.f32 %v2072_v62, 0.0 }
 0x305   :  { %v6511_v32 = vmul.f32 0.125, %v2103_v34  ;;  %v6513_v61 = vmul.f32 0.125, %v2109_v33  ;;  %v2120_v63 = vrot.slane %v2119_v44, 1  ;;  %v2135_v2 = vadd.f32 %v2134_v56, %v2072_v62 }
 0x306   :  { %v6515_v38 = vmul.f32 0.125, %v2115_v16  ;;  %5247 = vmatprep.mubr.f32.mxu1 %v2328_v12  ;;  %v1937_v6 = vrot.slane %v1758_v45, %v6392_v36  ;;  %v2330_v19 = vmax.f32 %v6452_v7, 0.0  ;;  %v2075_v11 = vadd.f32 %v1945_v8, %v6414_v1 }
 0x307   :  { %v2600_v13 = vmax.f32 %v6511_v32, 0.0  ;;  %v2601_v0 = vmax.f32 %v6513_v61, 0.0  ;;  %v2076_v62 = vadd.f32 %v6472_v20, %v6424_v17  ;;  %v2077_v60 = vadd.f32 %v6480_v14, %v6419_v5 }
 0x308   :  { %v2073_v28 = vadd.f32 %v1937_v6, %v6407_v43  ;;  %v2152_v45 = vrot.slane %v2075_v11, 4  ;;  %v2331_v4 = vmax.f32 %v2075_v11, 0.0  ;;  %v2078_v58 = vadd.f32 %v1957_v26, %v6431_v39 }
 0x309   :  { %v2158_v1 = vrot.slane %v2076_v62, 4  ;;  %v2332_v7 = vmax.f32 %v2076_v62, 0.0  ;;  %v2164_v8 = vrot.slane %v2077_v60, 4  ;;  %v2333_v23 = vmax.f32 %v2077_v60, 0.0 }
 0x30a   :  { %v2140_v40 = vrot.slane %v2073_v28, 4  ;;  %v2329_v24 = vmax.f32 %v2073_v28, 0.0  ;;  %v2153_v31 = vadd.f32 %v2152_v45, %v2075_v11  ;;  %v2170_v17 = vrot.slane %v2078_v58, 4 }
 0x30b   :  { %v2159_v20 = vadd.f32 %v2158_v1, %v2076_v62  ;;  %v2165_v55 = vadd.f32 %v2164_v8, %v2077_v60  ;;  %v2334_v5 = vmax.f32 %v2078_v58, 0.0  ;;  %v2121_v14 = vadd.f32 %v2120_v63, %v2119_v44 }
 0x30c   :  { %5248 = vmatmul.mubr.f32.gmra.mrb[38].mxu1 %v2329_v24  ;;  %v2154_v43 = vrot.slane %v2153_v31, 2  ;;  %v2171_v42 = vadd.f32 %v2170_v17, %v2078_v58  ;;  %v2126_v37 = vrot.slane %v2125_v51, 1  ;;  %v2131_v46 = vadd.f32 %v2130_v35, %v2129_v49 }
 0x30d   :  { %5250 = vmatprep.mubr.f32.mxu1 %v2330_v19  ;;  %v2160_v57 = vrot.slane %v2159_v20, 2  ;;  %v2166_v39 = vrot.slane %v2165_v55, 2  ;;  %v2136_v26 = vrot.slane %v2135_v2, 2  ;;  %v2141_v47 = vadd.f32 %v2140_v40, %v2073_v28 }
 0x30e   :  { %v2155_v48 = vadd.f32 %v2154_v43, %v2153_v31  ;;  %v2172_v9 = vrot.slane %v2171_v42, 2  ;;  %v2127_v50 = vadd.f32 %v2126_v37, %v2125_v51  ;;  %v2132_v52 = vrot.slane %v2131_v46, 1 }
 0x30f   :  { %v2161_v56 = vadd.f32 %v2160_v57, %v2159_v20  ;;  %v2167_v34 = vadd.f32 %v2166_v39, %v2165_v55  ;;  %v2137_v33 = vadd.f32 %v2136_v26, %v2135_v2  ;;  %v2142_v16 = vrot.slane %v2141_v47, 2 }
 0x310   :  { %v2156_v12 = vrot.slane %v2155_v48, 1  ;;  %5251 = vmatmul.mubr.f32.gmra.mrb[40].mxu1 %v2331_v4  ;;  %v2173_v44 = vadd.f32 %v2172_v9, %v2171_v42  ;;  %v2133_v63 = vadd.f32 %v2132_v52, %v2131_v46  ;;  %v2293_v6 = vmul.f32 0.125, %v2121_v14 }
 0x311   :  { %v2162_v11 = vrot.slane %v2161_v56, 1  ;;  %5253 = vmatprep.mubr.f32.mxu1 %v2332_v7  ;;  %v2168_v49 = vrot.slane %v2167_v34, 1  ;;  %v2138_v35 = vrot.slane %v2137_v33, 1  ;;  %v2143_v19 = vadd.f32 %v2142_v16, %v2141_v47 }
 0x312   :  { %v2157_v62 = vadd.f32 %v2156_v12, %v2155_v48  ;;  %v2174_v60 = vrot.slane %v2173_v44, 1  ;;  %v2294_v28 = vmul.f32 0.125, %v2127_v50  ;;  %v2295_v45 = vmul.f32 0.125, %v2133_v63 }
 0x313   :  { %v6537_v51 = vpop.f32.mrb[20].mxu1  ;;  %v2163_v58 = vadd.f32 %v2162_v11, %v2161_v56  ;;  %v2169_v1 = vadd.f32 %v2168_v49, %v2167_v34  ;;  %v2139_v2 = vadd.f32 %v2138_v35, %v2137_v33  ;;  %v2144_v8 = vrot.slane %v2143_v19, 1 }
 0x314   :  { %v6539_v40 = vpop.f32.mrb[21].mxu1  ;;  %v2299_v4 = vmul.f32 0.125, %v2157_v62  ;;  %5254 = vmatmul.mubr.f32.gmra.mrb[42].mxu1 %v2333_v23  ;;  %v2175_v24 = vadd.f32 %v2174_v60, %v2173_v44  ;;  %v2602_v7 = vmax.f32 %v6515_v38, 0.0  ;;  %v2603_v31 = vmax.f32 %v2293_v6, 0.0 }
 0x315   :  { %v2300_v17 = vmul.f32 0.125, %v2163_v58  ;;  %v2301_v20 = vmul.f32 0.125, %v2169_v1  ;;  %5256 = vmatprep.mubr.f32.mxu1 %v2334_v5  ;;  %v2145_v55 = vadd.f32 %v2144_v8, %v2143_v19  ;;  %v2296_v14 = vmul.f32 0.125, %v2139_v2 }
 0x316   :  { %v2609_v43 = vmax.f32 %v2299_v4, 0.0  ;;  %v2604_v42 = vmax.f32 %v2294_v28, 0.0  ;;  %v2605_v37 = vmax.f32 %v2295_v45, 0.0  ;;  %v2680_v46 = vsel %vm1582_vm0, %v2601_v0, %v2600_v13 }
 0x317   :  { %v2610_v57 = vmax.f32 %v2300_v17, 0.0  ;;  %v2611_v23 = vmax.f32 %v2301_v20, 0.0  ;;  %v2297_v39 = vmul.f32 0.125, %v2145_v55  ;;  %v2606_v26 = vmax.f32 %v2296_v14, 0.0  ;;  %v3445_v20 = vld [vmem:[#allocation2 + $0x288] sm:$0xff]  ;;  %v3446_v55 = vld [vmem:[#allocation2 + $0x290] sm:$0xff] }
 0x318   :  { %v2681_v38 = vsel %vm1584_vm1, %v2602_v7, %v2680_v46  ;;  %v2179_v5 = vadd.f32 %v2178_v10, %v6494_v27  ;;  %v2184_v47 = vrot.slane %v6506_v59, 2  ;;  %v2188_v48 = vrot.slane %v6476_v3, 4 }
 0x319   :  { %v2607_v9 = vmax.f32 %v2297_v39, 0.0  ;;  %v2682_v32 = vsel %vm1586_vm2, %v2603_v31, %v2681_v38  ;;  %v2302_v61 = vmul.f32 0.125, %v2175_v24  ;;  %v2687_v13 = vsel %vm1582_vm0, %v2609_v43, %v2608_v15  ;;  %v3447_v43 = vld [vmem:[#allocation2 + $0x298] sm:$0xff]  ;;  %v3450_v39 = vld [vmem:[#allocation2 + $0x2b0] sm:$0xff] }
 0x31a   :  { %v2683_v0 = vsel %vm1588_vm3, %v2604_v42, %v2682_v32  ;;  %v2180_v50 = vrot.slane %v2179_v5, 1  ;;  %v2185_v52 = vadd.f32 %v2184_v47, %v6506_v59  ;;  %v2189_v56 = vadd.f32 %v2188_v48, %v6476_v3  ;;  %v3448_v42 = vld [vmem:[#allocation2 + $0x2a0] sm:$0xff]  ;;  %v3451_v38 = vld [vmem:[#allocation2 + $0x2b8] sm:$0xff]  ;;  %v3453_v48 = vld [vmem:[#allocation2 + $0x2c8] sm:$0xff] }
 0x31b   :  { %v2684_v27 = vsel %vm1590_vm4, %v2605_v37, %v2683_v0  ;;  %v2612_v10 = vmax.f32 %v2302_v61, 0.0  ;;  %v2688_v34 = vsel %vm1584_vm1, %v2610_v57, %v2687_v13  ;;  %v2335_v33 = vmax.f32 %v6463_v21, 0.0 }
 0x31c   :  { %v2685_v16 = vsel %vm1592_vm5, %v2606_v26, %v2684_v27  ;;  %v2181_v12 = vadd.f32 %v2180_v50, %v2179_v5  ;;  %v2186_v18 = vrot.slane %v2185_v52, 1  ;;  %v2190_v44 = vrot.slane %v2189_v56, 2  ;;  %v3452_v5 = vld [vmem:[#allocation2 + $0x2c0] sm:$0xff] }
 0x31d   :  { %v2686_v15 = vsel %vm1594_vm6, %v2607_v9, %v2685_v16  ;;  %v2689_v63 = vsel %vm1586_vm2, %v2611_v23, %v2688_v34  ;;  %5257 = vmatmul.mubr.f32.gmra.mrb[44].mxu1 %v2335_v33  ;;  %v2336_v59 = vmax.f32 %v6465_v41, 0.0  ;;  %v2337_v21 = vmax.f32 %v6476_v3, 0.0  ;;  %v3449_v23 = vld [vmem:[#allocation2 + $0x2a8] sm:$0xff]  ;;  %v3454_v9 = vld [vmem:[#allocation2 + $0x2d0] sm:$0xff] }
 0x31e   :  { %5318 = vmatprep.mubr.f32.mxu0 %v2686_v15  ;;  %v2187_v6 = vadd.f32 %v2186_v18, %v2185_v52  ;;  %v2191_v11 = vadd.f32 %v2190_v44, %v2189_v56  ;;  %v2303_v49 = vmul.f32 0.125, %v2181_v12  ;;  %v2690_v35 = vsel %vm1588_vm3, %v2612_v10, %v2689_v63 }
 0x31f   :  { %5259 = vmatprep.mubr.f32.mxu1 %v2336_v59  ;;  %v5640_v14 = vpack.c.bf16 %v3446_v55, %v3445_v20  ;;  %v5644_v37 = vpack.c.bf16 %v3448_v42, %v3447_v43  ;;  %v5648_v26 = vpack.c.bf16 %v3450_v39, %v3449_v23  ;;  %v5652_v47 = vpack.c.bf16 %v3452_v5, %v3451_v38 }
 0x320   :  { %v2192_v19 = vrot.slane %v2191_v11, 1  ;;  %v2304_v62 = vmul.f32 0.125, %v2187_v6  ;;  %v2613_v60 = vmax.f32 %v2303_v49, 0.0  ;;  %v5656_v32 = vpack.c.bf16 %v3454_v9, %v3453_v48 }
 0x321   :  { %5260 = vmatmul.mubr.f32.gmra.mrb[46].mxu1 %v2337_v21  ;;  %5641 = vmatprep.subr.bf16.mxu0 %v5640_v14  ;;  %v6574_v0 = vadd.f32 %v6428_v54, %v6380_v53  ;;  %v6578_v50 = vadd.f32 %v6380_v53, %v6439_v25  ;;  %v6582_v52 = vadd.f32 %v6502_v29, %v6380_v53 }
 0x322   :  { %v2193_v28 = vadd.f32 %v2192_v19, %v2191_v11  ;;  %v2614_v45 = vmax.f32 %v2304_v62, 0.0  ;;  %v2691_v58 = vsel %vm1590_vm4, %v2613_v60, %v2690_v35  ;;  %v6586_v56 = vadd.f32 %v6380_v53, %v6508_v22 }
 0x323   :  { %v6590_v27 = vadd.f32 %v6537_v51, %v6380_v53  ;;  %v6594_v54 = vadd.f32 %v6380_v53, %v6539_v40 }
 0x324   :  { %v2305_v1 = vmul.f32 0.125, %v2193_v28  ;;  %v2692_v41 = vsel %vm1592_vm5, %v2614_v45, %v2691_v58 }
 0x326   :  { %v5155_v2 = vpop.f32.mrb[22].mxu1  ;;  %v2615_v8 = vmax.f32 %v2305_v1, 0.0 }
 0x327   :  { %v1453_v4 = vpop.f32.mrb[23].mxu1  ;;  %v6597_v10 = vadd.f32 %v5155_v2, %v6380_v53 }
 0x328   :  { %v2693_v24 = vsel %vm1594_vm6, %v2615_v8, %v2692_v41  ;;  %v6600_v25 = vadd.f32 %v6380_v53, %v1453_v4 }
 0x329   :  { %5319 = vmatmul.mubr.f32.vlgmr.msra.gmra.mrb[36].mxu0 %v2693_v24 }
 0x32a   :  { %5643 = vmatpush3.bf16.msra.mxu0 %v5640_v14 }
 0x32b   :  { %5645 = vmatprep.subr.bf16.mxu0 %v5644_v37 }
 0x32e   :  { %5647 = vmatpush3.bf16.msra.mxu0 %v5644_v37 }
 0x32f   :  { %5649 = vmatprep.subr.bf16.mxu0 %v5648_v26 }
 0x332   :  { %5651 = vmatpush3.bf16.msra.mxu0 %v5648_v26 }
 0x333   :  { %5653 = vmatprep.subr.bf16.mxu0 %v5652_v47 }
 0x336   :  { %5655 = vmatpush3.bf16.msra.mxu0 %v5652_v47 }
 0x337   :  { %5657 = vmatprep.subr.bf16.mxu0 %v5656_v32 }
 0x339   :  { %v5158_v7 = vpop.f32.mrb[24].mxu1 }
 0x33a   :  { %v1463_v31 = vpop.f32.mrb[25].mxu1  ;;  %5659 = vmatpush3.bf16.msra.mxu0 %v5656_v32  ;;  %v6603_v29 = vadd.f32 %v5158_v7, %v6380_v53 }
 0x33b   :  { %v1464_v22 = vadd.f32 %v6380_v53, %v1463_v31 }
 0x34c   :  { %v5161_v3 = vpop.f32.mrb[26].mxu1 }
 0x34d   :  { %v1473_v17 = vpop.f32.mrb[27].mxu1  ;;  %v6607_v33 = vadd.f32 %v5161_v3, %v6380_v53 }
 0x34e   :  { %v6610_v51 = vadd.f32 %v6380_v53, %v1473_v17 }
 0x35f   :  { %v5164_v46 = vpop.f32.mrb[28].mxu1 }
 0x360   :  { %v1483_v57 = vpop.f32.mrb[29].mxu1  ;;  %v1489_v18 = vadd.f32 %v5164_v46, %v6380_v53 }
 0x361   :  { %v6615_v44 = vadd.f32 %v6380_v53, %v1483_v57 }
 0x372   :  { %v5167_v61 = vpop.f32.mrb[30].mxu1 }
 0x373   :  { %v1493_v13 = vpop.f32.mrb[31].mxu1  ;;  %v1499_v59 = vadd.f32 %v5167_v61, %v6380_v53 }
 0x374   :  { %v1494_v35 = vadd.f32 %v6380_v53, %v1493_v13 }
 0x381   :  { %v5205_v34 = vpop.f32.mrb[34].mxu0 }
 0x382   :  { %v1857_v40 = vcombine.high %v5205_v34, %v5205_v34  ;;  %v1864_v16 = vrot.slane %v5205_v34, %v6382_v30  ;;  %v1697_v12 = vpop.f32.mrb[35].mxu0 }
 0x383   :  { %v1808_v15 = vcombine.high %v1697_v12, %v1697_v12  ;;  %v1815_v63 = vrot.slane %v1697_v12, %v6382_v30 }
 0x384   :  { %v1871_v6 = vrot.slane %v1857_v40, %v6382_v30  ;;  %v1872_v11 = vcombine.high %v1864_v16, %v1864_v16  ;;  %v1880_v49 = vrot.slane %v1864_v16, %v6382_v30 }
 0x385   :  { %v1822_v21 = vrot.slane %v1808_v15, %v6382_v30  ;;  %v1823_v19 = vcombine.high %v1815_v63, %v1815_v63  ;;  %v1831_v62 = vrot.slane %v1815_v63, %v6382_v30 }
 0x386   :  { %v1873_v60 = vcombine.high %v1871_v6, %v1871_v6  ;;  %v6625_v28 = vrot.slane %v1871_v6, %v6382_v30  ;;  %v6628_v45 = vrot.slane %v1872_v11, %v6382_v30  ;;  %v1902_v58 = vcombine.high %v1880_v49, %v1880_v49 }
 0x387   :  { %v2005_v1 = vrot.slane %v1880_v49, %v6392_v36  ;;  %v1824_v41 = vcombine.high %v1822_v21, %v1822_v21  ;;  %v1838_v2 = vrot.slane %v1822_v21, %v6382_v30  ;;  %v1845_v53 = vrot.slane %v1823_v19, %v6382_v30 }
 0x388   :  { %v1901_v8 = vrot.slane %v1873_v60, %v6382_v30  ;;  %v1903_v4 = vcombine.high %v6625_v28, %v6625_v28  ;;  %v1904_v24 = vcombine.high %v6628_v45, %v6628_v45  ;;  %v2009_v7 = vrot.slane %v6628_v45, %v6392_v36 }
 0x389   :  { %v6641_v31 = vrot.slane %v1902_v58, %v6392_v36  ;;  %v2021_v3 = vrot.slane %v6625_v28, %v6392_v36  ;;  %v6645_v17 = vadd.f32 %v2005_v1, %v1464_v22  ;;  %v6648_v20 = vrot.slane %v1824_v41, %v6382_v30 }
 0x38a   :  { %v1905_v55 = vcombine.high %v1901_v8, %v1901_v8  ;;  %v6651_v14 = vrot.slane %v1904_v24, %v6392_v36  ;;  %v2025_v43 = vrot.slane %v1901_v8, %v6392_v36  ;;  %v2029_v42 = vrot.slane %v1903_v4, %v6392_v36 }
 0x38b   :  { %v2242_v37 = vrot.slane %v6645_v17, 4  ;;  %v1853_v46 = vcombine.high %v1831_v62, %v1831_v62  ;;  %v1854_v57 = vcombine.high %v1838_v2, %v1838_v2  ;;  %v1855_v23 = vcombine.high %v1845_v53, %v1845_v53 }
 0x38c   :  { %v2033_v39 = vrot.slane %v1905_v55, %v6392_v36  ;;  %v6657_v26 = vadd.f32 %v2025_v43, %v1489_v18  ;;  %v6659_v38 = vadd.f32 %v2029_v42, %v1494_v35  ;;  %v1856_v5 = vcombine.high %v6648_v20, %v6648_v20 }
 0x38d   :  { %v2243_v47 = vadd.f32 %v2242_v37, %v6645_v17  ;;  %v1973_v48 = vrot.slane %v1831_v62, %v6392_v36  ;;  %v1977_v9 = vrot.slane %v1845_v53, %v6392_v36  ;;  %v1981_v32 = vrot.slane %v1853_v46, %v6392_v36 }
 0x38e   :  { %v6667_v61 = vadd.f32 %v2033_v39, %v1499_v59  ;;  %v2272_v13 = vrot.slane %v6657_v26, 4  ;;  %v1985_v22 = vrot.slane %v1855_v23, %v6392_v36  ;;  %v1989_v34 = vrot.slane %v1838_v2, %v6392_v36 }
 0x38f   :  { %v2244_v40 = vrot.slane %v2243_v47, 2  ;;  %v1993_v16 = vrot.slane %v6648_v20, %v6392_v36  ;;  %v1997_v12 = vrot.slane %v1854_v57, %v6392_v36  ;;  %v2082_v18 = vadd.f32 %v1973_v48, %v6578_v50 }
 0x390   :  { %v2083_v15 = vadd.f32 %v1977_v9, %v6574_v0  ;;  %v2084_v63 = vadd.f32 %v1981_v32, %v6586_v56  ;;  %v2085_v59 = vadd.f32 %v1985_v22, %v6582_v52  ;;  %v2086_v6 = vadd.f32 %v1989_v34, %v6594_v54 }
 0x391   :  { %v2245_v11 = vadd.f32 %v2244_v40, %v2243_v47  ;;  %v2194_v49 = vrot.slane %v2082_v18, 4  ;;  %v2338_v35 = vmax.f32 %v2082_v18, 0.0  ;;  %v2087_v21 = vadd.f32 %v1993_v16, %v6590_v27 }
 0x392   :  { %v2200_v19 = vrot.slane %v2083_v15, 4  ;;  %v2339_v62 = vmax.f32 %v2083_v15, 0.0  ;;  %v2206_v60 = vrot.slane %v2084_v63, 4  ;;  %v2340_v58 = vmax.f32 %v2084_v63, 0.0 }
 0x393   :  { %v2246_v1 = vrot.slane %v2245_v11, 1  ;;  %v2195_v41 = vadd.f32 %v2194_v49, %v2082_v18  ;;  %5262 = vmatprep.mubr.f32.mxu1 %v2338_v35  ;;  %v2212_v50 = vrot.slane %v2085_v59, 4  ;;  %v2341_v0 = vmax.f32 %v2085_v59, 0.0 }
 0x394   :  { %v2201_v2 = vadd.f32 %v2200_v19, %v2083_v15  ;;  %5263 = vmatmul.mubr.f32.gmra.mrb[48].mxu1 %v2339_v62  ;;  %v2207_v56 = vadd.f32 %v2206_v60, %v2084_v63  ;;  %v2218_v52 = vrot.slane %v2086_v6, 4  ;;  %v2342_v53 = vmax.f32 %v2086_v6, 0.0 }
 0x395   :  { %v2247_v54 = vadd.f32 %v2246_v1, %v2245_v11  ;;  %v2196_v8 = vrot.slane %v2195_v41, 2  ;;  %5265 = vmatprep.mubr.f32.mxu1 %v2340_v58  ;;  %v2213_v4 = vadd.f32 %v2212_v50, %v2085_v59  ;;  %v2224_v24 = vrot.slane %v2087_v21, 4 }
 0x396   :  { %v2202_v27 = vrot.slane %v2201_v2, 2  ;;  %v2208_v55 = vrot.slane %v2207_v56, 2  ;;  %v2219_v43 = vadd.f32 %v2218_v52, %v2086_v6  ;;  %v2343_v42 = vmax.f32 %v2087_v21, 0.0 }
 0x397   :  { %v6681_v37 = vmul.f32 0.125, %v2247_v54  ;;  %v2197_v46 = vadd.f32 %v2196_v8, %v2195_v41  ;;  %v2214_v57 = vrot.slane %v2213_v4, 2  ;;  %v2225_v23 = vadd.f32 %v2224_v24, %v2087_v21 }
 0x398   :  { %v2203_v39 = vadd.f32 %v2202_v27, %v2201_v2  ;;  %v2209_v47 = vadd.f32 %v2208_v55, %v2207_v56  ;;  %5266 = vmatmul.mubr.f32.gmra.mrb[50].mxu1 %v2341_v0  ;;  %v2220_v48 = vrot.slane %v2219_v43, 2  ;;  %v2088_v9 = vadd.f32 %v1997_v12, %v6600_v25 }
 0x399   :  { %v2624_v32 = vmax.f32 %v6681_v37, 0.0  ;;  %v2198_v22 = vrot.slane %v2197_v46, 1  ;;  %v2215_v34 = vadd.f32 %v2214_v57, %v2213_v4  ;;  %5268 = vmatprep.mubr.f32.mxu1 %v2342_v53  ;;  %v2226_v40 = vrot.slane %v2225_v23, 2  ;;  %v3725_v37 = vld [vmem:[#allocation2 + $0x318] sm:$0xff] }
 0x39a   :  { %v2204_v16 = vrot.slane %v2203_v39, 1  ;;  %v2210_v18 = vrot.slane %v2209_v47, 1  ;;  %v2221_v15 = vadd.f32 %v2220_v48, %v2219_v43  ;;  %v2230_v63 = vrot.slane %v2088_v9, 4 }
 0x39b   :  { %v2199_v59 = vadd.f32 %v2198_v22, %v2197_v46  ;;  %v2216_v6 = vrot.slane %v2215_v34, 1  ;;  %v2344_v11 = vmax.f32 %v2088_v9, 0.0  ;;  %v2001_v49 = vrot.slane %v1856_v5, %v6392_v36 }
 0x39c   :  { %v2205_v35 = vadd.f32 %v2204_v16, %v2203_v39  ;;  %v2211_v25 = vadd.f32 %v2210_v18, %v2209_v47  ;;  %5269 = vmatmul.mubr.f32.gmra.mrb[52].mxu1 %v2343_v42  ;;  %v2231_v12 = vadd.f32 %v2230_v63, %v2088_v9  ;;  %v2346_v21 = vmax.f32 %v6645_v17, 0.0 }
 0x39d   :  { %v6690_v19 = vmul.f32 0.125, %v2199_v59  ;;  %5271 = vmatprep.mubr.f32.mxu1 %v2344_v11  ;;  %v2089_v62 = vadd.f32 %v2001_v49, %v6597_v10  ;;  %v2091_v60 = vadd.f32 %v2009_v7, %v6603_v29  ;;  %v2092_v20 = vadd.f32 %v6641_v31, %v6610_v51 }
 0x39e   :  { %v6699_v5 = vmul.f32 0.125, %v2205_v35  ;;  %v6701_v58 = vmul.f32 0.125, %v2211_v25  ;;  %v2093_v17 = vadd.f32 %v6651_v14, %v6607_v33  ;;  %v2094_v10 = vadd.f32 %v2021_v3, %v6615_v44 }
 0x39f   :  { %v2616_v1 = vmax.f32 %v6690_v19, 0.0  ;;  %v2236_v41 = vrot.slane %v2089_v62, 4  ;;  %v2345_v45 = vmax.f32 %v2089_v62, 0.0  ;;  %v2248_v29 = vrot.slane %v2091_v60, 4 }
 0x3a0   :  { %v2617_v7 = vmax.f32 %v6699_v5, 0.0  ;;  %v2347_v51 = vmax.f32 %v2091_v60, 0.0  ;;  %v2254_v31 = vrot.slane %v2092_v20, 4  ;;  %v2348_v50 = vmax.f32 %v2092_v20, 0.0 }
 0x3a1   :  { %5272 = vmatmul.mubr.f32.gmra.mrb[54].mxu1 %v2345_v45  ;;  %v2249_v0 = vadd.f32 %v2248_v29, %v2091_v60  ;;  %v2260_v2 = vrot.slane %v2093_v17, 4  ;;  %v2349_v56 = vmax.f32 %v2093_v17, 0.0  ;;  %v2266_v33 = vrot.slane %v2094_v10, 4 }
 0x3a2   :  { %5274 = vmatprep.mubr.f32.mxu1 %v2346_v21  ;;  %v2255_v14 = vadd.f32 %v2254_v31, %v2092_v20  ;;  %v2350_v52 = vmax.f32 %v2094_v10, 0.0  ;;  %v2217_v28 = vadd.f32 %v2216_v6, %v2215_v34  ;;  %v2222_v44 = vrot.slane %v2221_v15, 1 }
 0x3a3   :  { %v2250_v3 = vrot.slane %v2249_v0, 2  ;;  %v2261_v53 = vadd.f32 %v2260_v2, %v2093_v17  ;;  %v2267_v54 = vadd.f32 %v2266_v33, %v2094_v10  ;;  %v2227_v8 = vadd.f32 %v2226_v40, %v2225_v23 }
 0x3a4   :  { %v2256_v4 = vrot.slane %v2255_v14, 2  ;;  %v2223_v24 = vadd.f32 %v2222_v44, %v2221_v15  ;;  %v2232_v27 = vrot.slane %v2231_v12, 2  ;;  %v2237_v55 = vadd.f32 %v2236_v41, %v2089_v62 }
 0x3a5   :  { %v2251_v43 = vadd.f32 %v2250_v3, %v2249_v0  ;;  %5275 = vmatmul.mubr.f32.gmra.mrb[56].mxu1 %v2347_v51  ;;  %v2262_v42 = vrot.slane %v2261_v53, 2  ;;  %v2268_v46 = vrot.slane %v2267_v54, 2  ;;  %v2228_v57 = vrot.slane %v2227_v8, 1 }
 0x3a6   :  { %v2257_v39 = vadd.f32 %v2256_v4, %v2255_v14  ;;  %5277 = vmatprep.mubr.f32.mxu1 %v2348_v50  ;;  %v2233_v47 = vadd.f32 %v2232_v27, %v2231_v12  ;;  %v2238_v48 = vrot.slane %v2237_v55, 2  ;;  %v2309_v9 = vmul.f32 0.125, %v2217_v28 }
 0x3a7   :  { %v2252_v22 = vrot.slane %v2251_v43, 1  ;;  %v2263_v34 = vadd.f32 %v2262_v42, %v2261_v53  ;;  %v2269_v16 = vadd.f32 %v2268_v46, %v2267_v54  ;;  %v2229_v18 = vadd.f32 %v2228_v57, %v2227_v8  ;;  %v3723_v42 = vld [vmem:[#allocation2 + $0x308] sm:$0xff] }
 0x3a8   :  { %v2258_v63 = vrot.slane %v2257_v39, 1  ;;  %v2234_v23 = vrot.slane %v2233_v47, 1  ;;  %v2239_v40 = vadd.f32 %v2238_v48, %v2237_v55  ;;  %v2310_v15 = vmul.f32 0.125, %v2223_v24  ;;  %v3455_v55 = vld [vmem:[#allocation2 + $0x2d8] sm:$0xff]  ;;  %v3724_v48 = vld [vmem:[#allocation2 + $0x310] sm:$0xff] }
 0x3a9   :  { %v2253_v59 = vadd.f32 %v2252_v22, %v2251_v43  ;;  %v2264_v6 = vrot.slane %v2263_v34, 1  ;;  %5278 = vmatmul.mubr.f32.gmra.mrb[58].mxu1 %v2349_v56  ;;  %v2311_v11 = vmul.f32 0.125, %v2229_v18  ;;  %v2618_v49 = vmax.f32 %v6701_v58, 0.0  ;;  %v3456_v43 = vld [vmem:[#allocation2 + $0x2e0] sm:$0xff]  ;;  %v3458_v22 = vld [vmem:[#allocation2 + $0x2f0] sm:$0xff] }
 0x3aa   :  { %v2259_v35 = vadd.f32 %v2258_v63, %v2257_v39  ;;  %5280 = vmatprep.mubr.f32.mxu1 %v2350_v52  ;;  %v2235_v25 = vadd.f32 %v2234_v23, %v2233_v47  ;;  %v2240_v12 = vrot.slane %v2239_v40, 1  ;;  %v2619_v21 = vmax.f32 %v2309_v9, 0.0  ;;  %v3457_v9 = vld [vmem:[#allocation2 + $0x2e8] sm:$0xff]  ;;  %v3726_v63 = vld [vmem:[#allocation2 + $0x320] sm:$0xff] }
 0x3ab   :  { %v2315_v19 = vmul.f32 0.125, %v2253_v59  ;;  %v2620_v62 = vmax.f32 %v2310_v15, 0.0  ;;  %v2621_v60 = vmax.f32 %v2311_v11, 0.0  ;;  %v2694_v20 = vsel %vm1582_vm0, %v2617_v7, %v2616_v1 }
 0x3ac   :  { %v2316_v5 = vmul.f32 0.125, %v2259_v35  ;;  %v2241_v17 = vadd.f32 %v2240_v12, %v2239_v40  ;;  %v2312_v10 = vmul.f32 0.125, %v2235_v25  ;;  %v2695_v41 = vsel %vm1584_vm1, %v2618_v49, %v2694_v20  ;;  %v3459_v35 = vld [vmem:[#allocation2 + $0x2f8] sm:$0xff] }
 0x3ad   :  { %v2625_v45 = vmax.f32 %v2315_v19, 0.0  ;;  %v2696_v29 = vsel %vm1586_vm2, %v2619_v21, %v2695_v41  ;;  %v2265_v51 = vadd.f32 %v2264_v6, %v2263_v34  ;;  %v2270_v58 = vrot.slane %v2269_v16, 1  ;;  %v3460_v19 = vld [vmem:[#allocation2 + $0x300] sm:$0xff] }
 0x3ae   :  { %v2313_v31 = vmul.f32 0.125, %v2241_v17  ;;  %v2622_v50 = vmax.f32 %v2312_v10, 0.0  ;;  %v2697_v0 = vsel %vm1588_vm3, %v2620_v62, %v2696_v29  ;;  %v2273_v2 = vadd.f32 %v2272_v13, %v6657_v26  ;;  %v3728_v62 = vld [vmem:[#allocation2 + $0x330] sm:$0xff] }
 0x3af   :  { %v2698_v1 = vsel %vm1590_vm4, %v2621_v60, %v2697_v0  ;;  %v2271_v7 = vadd.f32 %v2270_v58, %v2269_v16  ;;  %v2278_v56 = vrot.slane %v6659_v38, 4  ;;  %v2284_v33 = vrot.slane %v6667_v61, 4  ;;  %v3730_v58 = vld [vmem:[#allocation2 + $0x340] sm:$0xff] }
 0x3b0   :  { %v2623_v14 = vmax.f32 %v2313_v31, 0.0  ;;  %v2699_v52 = vsel %vm1592_vm5, %v2622_v50, %v2698_v1  ;;  %v2274_v28 = vrot.slane %v2273_v2, 2  ;;  %v2317_v44 = vmul.f32 0.125, %v2265_v51  ;;  %v3729_v51 = vld [vmem:[#allocation2 + $0x338] sm:$0xff]  ;;  %v3731_v1 = vld [vmem:[#allocation2 + $0x348] sm:$0xff] }
 0x3b1   :  { %v2279_v3 = vadd.f32 %v2278_v56, %v6659_v38  ;;  %v2285_v53 = vadd.f32 %v2284_v33, %v6667_v61  ;;  %v2318_v54 = vmul.f32 0.125, %v2271_v7  ;;  %v2626_v8 = vmax.f32 %v2316_v5, 0.0  ;;  %v3732_v7 = vld [vmem:[#allocation2 + $0x350] sm:$0xff] }
 0x3b2   :  { %v2700_v13 = vsel %vm1594_vm6, %v2623_v14, %v2699_v52  ;;  %v2275_v4 = vadd.f32 %v2274_v28, %v2273_v2  ;;  %v2627_v24 = vmax.f32 %v2317_v44, 0.0  ;;  %v2701_v27 = vsel %vm1582_vm0, %v2625_v45, %v2624_v32  ;;  %v3733_v14 = vld [vmem:[#allocation2 + $0x358] sm:$0xff]  ;;  %v3734_v52 = vld [vmem:[#allocation2 + $0x360] sm:$0xff]  ;;  %v3735_v44 = vld [vmem:[#allocation2 + $0x368] sm:$0xff] }
 0x3b3   :  { %5321 = vmatprep.mubr.f32.mxu0 %v2700_v13  ;;  %v2280_v46 = vrot.slane %v2279_v3, 2  ;;  %v2286_v57 = vrot.slane %v2285_v53, 2  ;;  %v2628_v39 = vmax.f32 %v2318_v54, 0.0  ;;  %v2702_v47 = vsel %vm1584_vm1, %v2626_v8, %v2701_v27  ;;  %v3737_v54 = vld [vmem:[#allocation2 + $0x378] sm:$0xff]  ;;  %v3738_v8 = vld [vmem:[#allocation2 + $0x380] sm:$0xff] }
 0x3b4   :  { %v2276_v34 = vrot.slane %v2275_v4, 1  ;;  %v2703_v16 = vsel %vm1586_vm2, %v2627_v24, %v2702_v47  ;;  %v2351_v18 = vmax.f32 %v6657_v26, 0.0  ;;  %v2352_v15 = vmax.f32 %v6659_v38, 0.0  ;;  %v3727_v26 = vld [vmem:[#allocation2 + $0x328] sm:$0xff] }
 0x3b5   :  { %v2281_v32 = vadd.f32 %v2280_v46, %v2279_v3  ;;  %v2287_v23 = vadd.f32 %v2286_v57, %v2285_v53  ;;  %v2704_v40 = vsel %vm1588_vm3, %v2628_v39, %v2703_v16  ;;  %v5660_v6 = vpack.c.bf16 %v3456_v43, %v3455_v55  ;;  %v3736_v3 = vld [vmem:[#allocation2 + $0x370] sm:$0xff] }
 0x3b6   :  { %v2277_v59 = vadd.f32 %v2276_v34, %v2275_v4  ;;  %5281 = vmatmul.mubr.f32.gmra.mrb[60].mxu1 %v2351_v18  ;;  %v5672_v11 = vpack.c.bf16 %v3724_v48, %v3723_v42  ;;  %v5664_v49 = vpack.c.bf16 %v3458_v22, %v3457_v9  ;;  %v5676_v21 = vpack.c.bf16 %v3726_v63, %v3725_v37  ;;  %v6741_v37 = vld [vmem:[%s7386_s2 + $0x3] ss:$0 sm:$0xff] }
 0x3b7   :  { %v2282_v25 = vrot.slane %v2281_v32, 1  ;;  %v2288_v12 = vrot.slane %v2287_v23, 1  ;;  %5283 = vmatprep.mubr.f32.mxu1 %v2352_v15  ;;  %v2353_v20 = vmax.f32 %v6667_v61, 0.0  ;;  %5661 = vmatprep.subr.bf16.mxu0 %v5660_v6  ;;  %v5668_v10 = vpack.c.bf16 %v3460_v19, %v3459_v35 }
 0x3b8   :  { %v2319_v60 = vmul.f32 0.125, %v2277_v59  ;;  %5673 = vmatprep.subr.bf16.mxu1 %v5672_v11  ;;  %5663 = vmatpush3.bf16.msra.mxu0 %v5660_v6  ;;  %v5680_v41 = vpack.c.bf16 %v3728_v62, %v3727_v26  ;;  %v5684_v0 = vpack.c.bf16 %v3730_v58, %v3729_v51  ;;  %v5688_v33 = vpack.c.bf16 %v3732_v7, %v3731_v1 }
 0x3b9   :  { %v2283_v5 = vadd.f32 %v2282_v25, %v2281_v32  ;;  %v2289_v38 = vadd.f32 %v2288_v12, %v2287_v23  ;;  %5675 = vmatpush3.bf16.msra.mxu1 %v5672_v11  ;;  %5665 = vmatprep.subr.bf16.mxu0 %v5664_v49  ;;  %v5692_v28 = vpack.c.bf16 %v3734_v52, %v3733_v14 }
 0x3ba   :  { %v2629_v17 = vmax.f32 %v2319_v60, 0.0  ;;  %5284 = vmatmul.mubr.f32.gmra.mrb[62].mxu1 %v2353_v20  ;;  %5677 = vmatprep.subr.bf16.mxu1 %v5676_v21  ;;  %v5696_v53 = vpack.c.bf16 %v3736_v3, %v3735_v44  ;;  %v5700_v13 = vpack.c.bf16 %v3738_v8, %v3737_v54 }
 0x3bb   :  { %v2320_v45 = vmul.f32 0.125, %v2283_v5  ;;  %v2321_v29 = vmul.f32 0.125, %v2289_v38 }
 0x3bc   :  { %v2705_v31 = vsel %vm1590_vm4, %v2629_v17, %v2704_v40  ;;  %5667 = vmatpush3.bf16.msra.mxu0 %v5664_v49 }
 0x3bd   :  { %v2630_v50 = vmax.f32 %v2320_v45, 0.0  ;;  %5679 = vmatpush3.bf16.msra.mxu1 %v5676_v21  ;;  %v2631_v61 = vmax.f32 %v2321_v29, 0.0  ;;  %5669 = vmatprep.subr.bf16.mxu0 %v5668_v10 }
 0x3be   :  { %5681 = vmatprep.subr.bf16.mxu1 %v5680_v41 }
 0x3bf   :  { %v2706_v2 = vsel %vm1592_vm5, %v2630_v50, %v2705_v31 }
 0x3c0   :  { %v2707_v56 = vsel %vm1594_vm6, %v2631_v61, %v2706_v2  ;;  %5671 = vmatpush3.bf16.msra.mxu0 %v5668_v10 }
 0x3c1   :  { %5322 = vmatmul.mubr.f32.gmra.mrb[38].mxu0 %v2707_v56  ;;  %5683 = vmatpush3.bf16.msra.mxu1 %v5680_v41 }
 0x3c2   :  { %5685 = vmatprep.subr.bf16.mxu1 %v5684_v0 }
 0x3c5   :  { %5687 = vmatpush3.bf16.msra.mxu1 %v5684_v0 }
 0x3c6   :  { %5689 = vmatprep.subr.bf16.mxu1 %v5688_v33 }
 0x3c9   :  { %5691 = vmatpush3.bf16.msra.mxu1 %v5688_v33 }
 0x3ca   :  { %5693 = vmatprep.subr.bf16.mxu1 %v5692_v28 }
 0x3cd   :  { %5695 = vmatpush3.bf16.msra.mxu1 %v5692_v28 }
 0x3ce   :  { %5697 = vmatprep.subr.bf16.mxu1 %v5696_v53 }
 0x3cf   :  { %v5240_v4 = vpop.f32.mrb[32].mxu1 }
 0x3d0   :  { %v2441_v24 = vpop.f32.mrb[33].mxu1  ;;  %v2447_v63 = vadd.f32 %v5240_v4, %v6741_v37 }
 0x3d1   :  { %5699 = vmatpush3.bf16.msra.mxu1 %v5696_v53  ;;  %v2442_v32 = vadd.f32 %v6741_v37, %v2441_v24 }
 0x3d2   :  { %5701 = vmatprep.subr.bf16.mxu1 %v5700_v13 }
 0x3d3   :  { %v5243_v27 = vpop.f32.mrb[34].mxu1 }
 0x3d4   :  { %v2451_v55 = vpop.f32.mrb[35].mxu1  ;;  %v6746_v23 = vadd.f32 %v5243_v27, %v6741_v37 }
 0x3d5   :  { %5703 = vmatpush3.bf16.msra.mxu1 %v5700_v13  ;;  %v2452_v15 = vadd.f32 %v6741_v37, %v2451_v55 }
 0x3d7   :  { %v5246_v43 = vpop.f32.mrb[36].mxu1 }
 0x3d8   :  { %v2461_v42 = vpop.f32.mrb[37].mxu1  ;;  %v6750_v59 = vadd.f32 %v5246_v43, %v6741_v37 }
 0x3d9   :  { %v6754_v35 = vadd.f32 %v6741_v37, %v2461_v42 }
 0x3df   :  { %v5249_v46 = vpop.f32.mrb[38].mxu1 }
 0x3e0   :  { %v2471_v57 = vpop.f32.mrb[39].mxu1  ;;  %v6757_v25 = vadd.f32 %v5249_v46, %v6741_v37 }
 0x3e1   :  { %v6761_v19 = vadd.f32 %v6741_v37, %v2471_v57 }
 0x3e3   :  { %v5252_v39 = vpop.f32.mrb[40].mxu1 }
 0x3e4   :  { %v2481_v47 = vpop.f32.mrb[41].mxu1  ;;  %v6764_v26 = vadd.f32 %v5252_v39, %v6741_v37 }
 0x3e5   :  { %v2482_v10 = vadd.f32 %v6741_v37, %v2481_v47 }
 0x3e7   :  { %v5255_v48 = vpop.f32.mrb[42].mxu1 }
 0x3e8   :  { %v2491_v9 = vpop.f32.mrb[43].mxu1  ;;  %v6774_v41 = vadd.f32 %v5255_v48, %v6741_v37 }
 0x3e9   :  { %v6777_v45 = vadd.f32 %v6741_v37, %v2491_v9 }
 0x3f0   :  { %v5258_v22 = vpop.f32.mrb[44].mxu1 }
 0x3f1   :  { %v2501_v34 = vpop.f32.mrb[45].mxu1  ;;  %v2507_v0 = vadd.f32 %v5258_v22, %v6741_v37 }
 0x3f2   :  { %v2502_v2 = vadd.f32 %v6741_v37, %v2501_v34 }
 0x3f4   :  { %v5261_v16 = vpop.f32.mrb[46].mxu1 }
 0x3f5   :  { %v2511_v18 = vpop.f32.mrb[47].mxu1  ;;  %v2517_v1 = vadd.f32 %v5261_v16, %v6741_v37 }
 0x3f6   :  { %v2512_v14 = vadd.f32 %v6741_v37, %v2511_v18 }
 0x3fc   :  { %v5320_v40 = vpop.f32.mrb[36].mxu0 }
 0x3fd   :  { %v2850_v6 = vcombine.high %v5320_v40, %v5320_v40  ;;  %v2857_v11 = vrot.slane %v5320_v40, %v6382_v30  ;;  %v2778_v49 = vpop.f32.mrb[37].mxu0 }
 0x3fe   :  { %v2801_v12 = vcombine.high %v2778_v49, %v2778_v49  ;;  %v2808_v21 = vrot.slane %v2778_v49, %v6382_v30 }
 0x3ff   :  { %v2865_v62 = vcombine.high %v2857_v11, %v2857_v11  ;;  %v6767_v60 = vrot.slane %v2857_v11, %v6382_v30  ;;  %v2864_v20 = vrot.slane %v2850_v6, %v6382_v30 }
 0x400   :  { %v2815_v5 = vrot.slane %v2801_v12, %v6382_v30  ;;  %v2816_v38 = vcombine.high %v2808_v21, %v2808_v21  ;;  %v2824_v17 = vrot.slane %v2808_v21, %v6382_v30 }
 0x401   :  { %v6780_v29 = vrot.slane %v2865_v62, %v6382_v30  ;;  %v3032_v51 = vrot.slane %v6767_v60, %v6392_v36  ;;  %v2866_v7 = vcombine.high %v2864_v20, %v2864_v20  ;;  %v2880_v56 = vrot.slane %v2864_v20, %v6382_v30 }
 0x402   :  { %v2817_v58 = vcombine.high %v2815_v5, %v2815_v5  ;;  %v6785_v31 = vrot.slane %v2815_v5, %v6382_v30  ;;  %v6788_v50 = vrot.slane %v2816_v38, %v6382_v30  ;;  %v2846_v61 = vcombine.high %v2824_v17, %v2824_v17 }
 0x403   :  { %v6794_v33 = vadd.f32 %v3032_v51, %v2482_v10  ;;  %v2895_v52 = vcombine.high %v6767_v60, %v6767_v60  ;;  %v2897_v28 = vcombine.high %v6780_v29, %v6780_v29  ;;  %v3000_v44 = vrot.slane %v2824_v17, %v6392_v36 }
 0x404   :  { %v3004_v3 = vrot.slane %v6788_v50, %v6392_v36  ;;  %v3036_v53 = vrot.slane %v6780_v29, %v6392_v36  ;;  %v6808_v8 = vrot.slane %v2817_v58, %v6382_v30  ;;  %v2847_v13 = vcombine.high %v6785_v31, %v6785_v31 }
 0x405   :  { %v3237_v54 = vrot.slane %v6794_v33, 4  ;;  %v2848_v4 = vcombine.high %v6788_v50, %v6788_v50  ;;  %v3008_v24 = vrot.slane %v2846_v61, %v6392_v36  ;;  %v3157_v27 = vadd.f32 %v3000_v44, %v2442_v32 }
 0x406   :  { %v3158_v55 = vadd.f32 %v3004_v3, %v2447_v63  ;;  %v2894_v42 = vrot.slane %v2866_v7, %v6382_v30  ;;  %v3048_v46 = vrot.slane %v2880_v56, %v6392_v36  ;;  %v2896_v57 = vcombine.high %v2880_v56, %v2880_v56 }
 0x407   :  { %v3238_v43 = vadd.f32 %v3237_v54, %v6794_v33  ;;  %v3189_v39 = vrot.slane %v3157_v27, 4  ;;  %v3413_v48 = vmax.f32 %v3157_v27, 0.0  ;;  %v3159_v6 = vadd.f32 %v3008_v24, %v2452_v15 }
 0x408   :  { %v3195_v47 = vrot.slane %v3158_v55, 4  ;;  %v3414_v9 = vmax.f32 %v3158_v55, 0.0  ;;  %v3052_v34 = vrot.slane %v2894_v42, %v6392_v36  ;;  %v6819_v16 = vadd.f32 %v3048_v46, %v2502_v2 }
 0x409   :  { %v3239_v22 = vrot.slane %v3238_v43, 2  ;;  %v2898_v18 = vcombine.high %v2894_v42, %v2894_v42  ;;  %v3190_v40 = vadd.f32 %v3189_v39, %v3157_v27  ;;  %v3056_v63 = vrot.slane %v2896_v57, %v6392_v36  ;;  %5356 = vmatprep.mubr.f32.mxu0 %v3413_v48 }
 0x40a   :  { %v3196_v32 = vadd.f32 %v3195_v47, %v3158_v55  ;;  %v6822_v49 = vadd.f32 %v3052_v34, %v2507_v0  ;;  %v3261_v12 = vrot.slane %v6819_v16, 4  ;;  %5357 = vmatmul.mubr.f32.vlgmr.msra.gmra.mrb[40].mxu0 %v3414_v9  ;;  %v3201_v38 = vrot.slane %v3159_v6, 4 }
 0x40b   :  { %v3240_v11 = vadd.f32 %v3239_v22, %v3238_v43  ;;  %v3060_v21 = vrot.slane %v2898_v18, %v6392_v36  ;;  %v3191_v62 = vrot.slane %v3190_v40, 2  ;;  %v6826_v5 = vadd.f32 %v3056_v63, %v2512_v14 }
 0x40c   :  { %v3197_v20 = vrot.slane %v3196_v32, 2  ;;  %v3267_v10 = vrot.slane %v6822_v49, 4  ;;  %v3262_v51 = vadd.f32 %v3261_v12, %v6819_v16  ;;  %v3202_v0 = vadd.f32 %v3201_v38, %v3159_v6 }
 0x40d   :  { %v3241_v17 = vrot.slane %v3240_v11, 1  ;;  %v6830_v58 = vadd.f32 %v3060_v21, %v2517_v1  ;;  %v3192_v15 = vadd.f32 %v3191_v62, %v3190_v40  ;;  %v3273_v61 = vrot.slane %v6826_v5, 4 }
 0x40e   :  { %v3198_v50 = vadd.f32 %v3197_v20, %v3196_v32  ;;  %v3268_v7 = vadd.f32 %v3267_v10, %v6822_v49  ;;  %v3263_v56 = vrot.slane %v3262_v51, 2  ;;  %v3203_v24 = vrot.slane %v3202_v0, 2 }
 0x40f   :  { %v3242_v2 = vadd.f32 %v3241_v17, %v3240_v11  ;;  %v3279_v14 = vrot.slane %v6830_v58, 4  ;;  %v3193_v44 = vrot.slane %v3192_v15, 1  ;;  %v3274_v54 = vadd.f32 %v3273_v61, %v6826_v5 }
 0x410   :  { %v3199_v3 = vrot.slane %v3198_v50, 1  ;;  %v3012_v27 = vrot.slane %v2848_v4, %v6392_v36  ;;  %v3269_v1 = vrot.slane %v3268_v7, 2  ;;  %v3264_v55 = vadd.f32 %v3263_v56, %v3262_v51 }
 0x411   :  { %v3280_v43 = vadd.f32 %v3279_v14, %v6830_v58  ;;  %v3194_v42 = vadd.f32 %v3193_v44, %v3192_v15  ;;  %v3275_v57 = vrot.slane %v3274_v54, 2  ;;  %v3204_v39 = vadd.f32 %v3203_v24, %v3202_v0 }
 0x412   :  { %v3200_v46 = vadd.f32 %v3199_v3, %v3198_v50  ;;  %v3016_v47 = vrot.slane %v6785_v31, %v6392_v36  ;;  %v3270_v48 = vadd.f32 %v3269_v1, %v3268_v7  ;;  %v3265_v9 = vrot.slane %v3264_v55, 1 }
 0x413   :  { %v3281_v22 = vrot.slane %v3280_v43, 2  ;;  %v6840_v34 = vmul.f32 0.125, %v3242_v2  ;;  %v3020_v18 = vrot.slane %v6808_v8, %v6392_v36  ;;  %v3276_v4 = vadd.f32 %v3275_v57, %v3274_v54 }
 0x414   :  { %v3205_v40 = vrot.slane %v3204_v39, 1  ;;  %v6844_v32 = vmul.f32 0.125, %v3194_v42  ;;  %v6846_v63 = vmul.f32 0.125, %v3200_v46  ;;  %v3415_v12 = vmax.f32 %v3159_v6, 0.0 }
 0x415   :  { %v3282_v11 = vadd.f32 %v3281_v22, %v3280_v43  ;;  %v3040_v21 = vrot.slane %v2895_v52, %v6392_v36  ;;  %v3044_v62 = vrot.slane %v2897_v28, %v6392_v36  ;;  %v3271_v20 = vrot.slane %v3270_v48, 1 }
 0x416   :  { %v3266_v38 = vadd.f32 %v3265_v9, %v3264_v55  ;;  %v2849_v17 = vcombine.high %v6808_v8, %v6808_v8  ;;  %v3024_v6 = vrot.slane %v2847_v13, %v6392_v36  ;;  %v3277_v10 = vrot.slane %v3276_v4, 1  ;;  %5359 = vmatprep.mubr.f32.mxu0 %v3415_v12 }
 0x417   :  { %v3160_v60 = vadd.f32 %v3012_v27, %v6746_v23  ;;  %v3699_v52 = vmax.f32 %v6840_v34, 0.0  ;;  %v3206_v51 = vadd.f32 %v3205_v40, %v3204_v39  ;;  %v3161_v15 = vadd.f32 %v3016_v47, %v6754_v35 }
 0x418   :  { %v3162_v28 = vadd.f32 %v3020_v18, %v6750_v59  ;;  %v3691_v50 = vmax.f32 %v6844_v32, 0.0  ;;  %v3692_v8 = vmax.f32 %v6846_v63, 0.0  ;;  %v3283_v61 = vrot.slane %v3282_v11, 1 }
 0x419   :  { %v3207_v0 = vrot.slane %v3160_v60, 4  ;;  %v6868_v2 = vadd.f32 %v3271_v20, %v3270_v48  ;;  %v6870_v31 = vmul.f32 0.125, %v3266_v38  ;;  %v3416_v13 = vmax.f32 %v3160_v60, 0.0 }
 0x41a   :  { %v3213_v7 = vrot.slane %v3161_v15, 4  ;;  %v6872_v23 = vadd.f32 %v3277_v10, %v3276_v4  ;;  %v3417_v14 = vmax.f32 %v3161_v15, 0.0  ;;  %v3219_v44 = vrot.slane %v3162_v28, 4 }
 0x41b   :  { %v3208_v56 = vadd.f32 %v3207_v0, %v3160_v60  ;;  %v6874_v35 = vmul.f32 0.125, %v3206_v51  ;;  %5360 = vmatmul.mubr.f32.gmra.mrb[42].mxu0 %v3416_v13  ;;  %v3163_v3 = vadd.f32 %v3024_v6, %v6761_v19  ;;  %v3028_v54 = vrot.slane %v2849_v17, %v6392_v36 }
 0x41c   :  { %v3214_v59 = vadd.f32 %v3213_v7, %v3161_v15  ;;  %v6878_v24 = vadd.f32 %v3283_v61, %v3282_v11  ;;  %5362 = vmatprep.mubr.f32.mxu0 %v3417_v14  ;;  %v3220_v1 = vadd.f32 %v3219_v44, %v3162_v28  ;;  %v3166_v55 = vadd.f32 %v3036_v53, %v6764_v26 }
 0x41d   :  { %v3209_v27 = vrot.slane %v3208_v56, 2  ;;  %v3418_v42 = vmax.f32 %v3162_v28, 0.0  ;;  %v3225_v46 = vrot.slane %v3163_v3, 4  ;;  %v3164_v57 = vadd.f32 %v3028_v54, %v6757_v25 }
 0x41e   :  { %v3215_v43 = vrot.slane %v3214_v59, 2  ;;  %v3221_v47 = vrot.slane %v3220_v1, 2  ;;  %v3419_v19 = vmax.f32 %v3163_v3, 0.0  ;;  %v3243_v48 = vrot.slane %v3166_v55, 4 }
 0x41f   :  { %v3210_v39 = vadd.f32 %v3209_v27, %v3208_v56  ;;  %5363 = vmatmul.mubr.f32.gmra.mrb[44].mxu0 %v3418_v42  ;;  %v3226_v22 = vadd.f32 %v3225_v46, %v3163_v3  ;;  %v3231_v18 = vrot.slane %v3164_v57, 4  ;;  %v3421_v4 = vmax.f32 %v6794_v33, 0.0 }
 0x420   :  { %v3216_v9 = vadd.f32 %v3215_v43, %v3214_v59  ;;  %5365 = vmatprep.mubr.f32.mxu0 %v3419_v19  ;;  %v3244_v11 = vadd.f32 %v3243_v48, %v3166_v55  ;;  %v3167_v26 = vadd.f32 %v3040_v21, %v6777_v45  ;;  %v3168_v29 = vadd.f32 %v3044_v62, %v6774_v41 }
 0x421   :  { %v3211_v40 = vrot.slane %v3210_v39, 1  ;;  %v3420_v53 = vmax.f32 %v3164_v57, 0.0  ;;  %v3222_v25 = vadd.f32 %v3221_v47, %v3220_v1  ;;  %v3227_v20 = vrot.slane %v3226_v22, 2 }
 0x422   :  { %v3217_v12 = vrot.slane %v3216_v9, 1  ;;  %v3245_v38 = vrot.slane %v3244_v11, 2  ;;  %v3422_v17 = vmax.f32 %v3166_v55, 0.0  ;;  %v3249_v6 = vrot.slane %v3167_v26, 4 }
 0x423   :  { %v3255_v10 = vrot.slane %v3168_v29, 4  ;;  %5366 = vmatmul.mubr.f32.gmra.mrb[46].mxu0 %v3420_v53  ;;  %v3425_v60 = vmax.f32 %v6819_v16, 0.0  ;;  %v3212_v51 = vadd.f32 %v3211_v40, %v3210_v39  ;;  %v3223_v15 = vrot.slane %v3222_v25, 1 }
 0x424   :  { %v3218_v33 = vadd.f32 %v3217_v12, %v3216_v9  ;;  %5368 = vmatprep.mubr.f32.mxu0 %v3421_v4  ;;  %v3246_v28 = vadd.f32 %v3245_v38, %v3244_v11  ;;  %v3250_v61 = vadd.f32 %v3249_v6, %v3167_v26  ;;  %v3228_v21 = vadd.f32 %v3227_v20, %v3226_v22 }
 0x425   :  { %v3256_v45 = vadd.f32 %v3255_v10, %v3168_v29  ;;  %v3423_v41 = vmax.f32 %v3167_v26, 0.0  ;;  %v3224_v62 = vadd.f32 %v3223_v15, %v3222_v25  ;;  %v3232_v0 = vadd.f32 %v3231_v18, %v3164_v57 }
 0x426   :  { %v3384_v13 = vmul.f32 0.125, %v3212_v51  ;;  %v3247_v7 = vrot.slane %v3246_v28, 1  ;;  %v3251_v56 = vrot.slane %v3250_v61, 2  ;;  %v3229_v44 = vrot.slane %v3228_v21, 1 }
 0x427   :  { %v3257_v14 = vrot.slane %v3256_v45, 2  ;;  %5369 = vmatmul.mubr.f32.gmra.mrb[48].mxu0 %v3422_v17  ;;  %v3233_v59 = vrot.slane %v3232_v0, 2  ;;  %v3385_v3 = vmul.f32 0.125, %v3218_v33  ;;  %v3386_v16 = vmul.f32 0.125, %v3224_v62 }
 0x428   :  { %v3693_v54 = vmax.f32 %v6874_v35, 0.0  ;;  %v3248_v27 = vadd.f32 %v3247_v7, %v3246_v28  ;;  %v3252_v1 = vadd.f32 %v3251_v56, %v3250_v61  ;;  %5371 = vmatprep.mubr.f32.mxu0 %v3423_v41  ;;  %v3230_v43 = vadd.f32 %v3229_v44, %v3228_v21 }
 0x429   :  { %v3258_v55 = vadd.f32 %v3257_v14, %v3256_v45  ;;  %v3424_v42 = vmax.f32 %v3168_v29, 0.0  ;;  %v3234_v46 = vadd.f32 %v3233_v59, %v3232_v0  ;;  %v3694_v39 = vmax.f32 %v3384_v13, 0.0 }
 0x42a   :  { %v3771_v57 = vsel %vm1582_vm0, %v3692_v8, %v3691_v50  ;;  %v3390_v47 = vmul.f32 0.125, %v3248_v27  ;;  %v3253_v19 = vrot.slane %v3252_v1, 1  ;;  %v3387_v9 = vmul.f32 0.125, %v3230_v43 }
 0x42b   :  { %v3259_v48 = vrot.slane %v3258_v55, 1  ;;  %5372 = vmatmul.mubr.f32.gmra.mrb[50].mxu0 %v3424_v42  ;;  %v3235_v35 = vrot.slane %v3234_v46, 1  ;;  %v3695_v22 = vmax.f32 %v3385_v3, 0.0  ;;  %v3696_v18 = vmax.f32 %v3386_v16, 0.0 }
 0x42c   :  { %v3772_v4 = vsel %vm1584_vm1, %v3693_v54, %v3771_v57  ;;  %v3700_v40 = vmax.f32 %v3390_v47, 0.0  ;;  %v3254_v11 = vadd.f32 %v3253_v19, %v3252_v1  ;;  %5374 = vmatprep.mubr.f32.mxu0 %v3425_v60  ;;  %v3426_v32 = vmax.f32 %v6822_v49, 0.0 }
 0x42d   :  { %v3260_v26 = vadd.f32 %v3259_v48, %v3258_v55  ;;  %v3236_v29 = vadd.f32 %v3235_v35, %v3234_v46  ;;  %v3697_v63 = vmax.f32 %v3387_v9, 0.0  ;;  %v3773_v50 = vsel %vm1586_vm2, %v3694_v39, %v3772_v4 }
 0x42e   :  { %v3427_v8 = vmax.f32 %v6826_v5, 0.0  ;;  %v3391_v53 = vmul.f32 0.125, %v3254_v11  ;;  %v3774_v25 = vsel %vm1588_vm3, %v3695_v22, %v3773_v50  ;;  %v3778_v20 = vsel %vm1582_vm0, %v3700_v40, %v3699_v52 }
 0x42f   :  { %v3392_v12 = vmul.f32 0.125, %v3260_v26  ;;  %v3394_v38 = vmul.f32 0.125, %v6868_v2  ;;  %v3388_v17 = vmul.f32 0.125, %v3236_v29  ;;  %v3775_v6 = vsel %vm1590_vm4, %v3696_v18, %v3774_v25  ;;  %5375 = vmatmul.mubr.f32.gmra.mrb[52].mxu0 %v3426_v32 }
 0x430   :  { %v3395_v49 = vmul.f32 0.125, %v6872_v23  ;;  %v3701_v10 = vmax.f32 %v3391_v53, 0.0  ;;  %v3776_v5 = vsel %vm1592_vm5, %v3697_v63, %v3775_v6  ;;  %5377 = vmatprep.mubr.f32.mxu0 %v3427_v8  ;;  %v3396_v33 = vmul.f32 0.125, %v6878_v24 }
 0x431   :  { %v3702_v60 = vmax.f32 %v3392_v12, 0.0  ;;  %v3698_v51 = vmax.f32 %v3388_v17, 0.0  ;;  %v3428_v34 = vmax.f32 %v6830_v58, 0.0  ;;  %v3703_v52 = vmax.f32 %v6870_v31, 0.0 }
 0x432   :  { %v3779_v2 = vsel %vm1584_vm1, %v3701_v10, %v3778_v20  ;;  %v3704_v15 = vmax.f32 %v3394_v38, 0.0  ;;  %v3705_v23 = vmax.f32 %v3395_v49, 0.0  ;;  %v3706_v21 = vmax.f32 %v3396_v33, 0.0 }
 0x433   :  { %v3777_v28 = vsel %vm1594_vm6, %v3698_v51, %v3776_v5  ;;  %v3780_v61 = vsel %vm1586_vm2, %v3702_v60, %v3779_v2  ;;  %5378 = vmatmul.mubr.f32.gmra.mrb[54].mxu0 %v3428_v34 }
 0x434   :  { %5436 = vmatprep.mubr.f32.mxu1 %v3777_v28  ;;  %v3781_v45 = vsel %vm1588_vm3, %v3703_v52, %v3780_v61 }
 0x435   :  { %v3782_v41 = vsel %vm1590_vm4, %v3704_v15, %v3781_v45 }
 0x436   :  { %v3783_v24 = vsel %vm1592_vm5, %v3705_v23, %v3782_v41 }
 0x437   :  { %v3784_v58 = vsel %vm1594_vm6, %v3706_v21, %v3783_v24 }
 0x438   :  { %5437 = vmatmul.mubr.f32.vlgmr.msra.gmra.mrb[64].mxu1 %v3784_v58 }
 0x467   :  { %v5264_v31 = vpop.f32.mrb[48].mxu1 }
 0x468   :  { %v2521_v62 = vpop.f32.mrb[49].mxu1  ;;  %v2527_v42 = vadd.f32 %v5264_v31, %v6741_v37 }
 0x469   :  { %v2522_v46 = vadd.f32 %v6741_v37, %v2521_v62 }
 0x46b   :  { %v5267_v0 = vpop.f32.mrb[50].mxu1 }
 0x46c   :  { %v2531_v13 = vpop.f32.mrb[51].mxu1  ;;  %v6920_v39 = vadd.f32 %v5267_v0, %v6741_v37 }
 0x46d   :  { %v6923_v57 = vadd.f32 %v6741_v37, %v2531_v13 }
 0x46f   :  { %v5270_v7 = vpop.f32.mrb[52].mxu1 }
 0x470   :  { %v2541_v56 = vpop.f32.mrb[53].mxu1  ;;  %v6926_v47 = vadd.f32 %v5270_v7, %v6741_v37 }
 0x471   :  { %v6929_v19 = vadd.f32 %v6741_v37, %v2541_v56 }
 0x474   :  { %v5273_v14 = vpop.f32.mrb[54].mxu1 }
 0x475   :  { %v2551_v44 = vpop.f32.mrb[55].mxu1  ;;  %v6932_v48 = vadd.f32 %v5273_v14, %v6741_v37 }
 0x476   :  { %v6935_v9 = vadd.f32 %v6741_v37, %v2551_v44 }
 0x478   :  { %v5276_v59 = vpop.f32.mrb[56].mxu1 }
 0x479   :  { %v2561_v3 = vpop.f32.mrb[57].mxu1  ;;  %v6938_v35 = vadd.f32 %v5276_v59, %v6741_v37 }
 0x47a   :  { %v2562_v18 = vadd.f32 %v6741_v37, %v2561_v3 }
 0x47c   :  { %v5279_v16 = vpop.f32.mrb[58].mxu1 }
 0x47d   :  { %v2571_v54 = vpop.f32.mrb[59].mxu1  ;;  %v6942_v4 = vadd.f32 %v5279_v16, %v6741_v37 }
 0x47e   :  { %v6946_v32 = vadd.f32 %v6741_v37, %v2571_v54 }
 0x489   :  { %v5282_v27 = vpop.f32.mrb[60].mxu1 }
 0x48a   :  { %v2581_v1 = vpop.f32.mrb[61].mxu1  ;;  %v2587_v50 = vadd.f32 %v5282_v27, %v6741_v37 }
 0x48b   :  { %v2582_v25 = vadd.f32 %v6741_v37, %v2581_v1 }
 0x48d   :  { %v5285_v55 = vpop.f32.mrb[62].mxu1 }
 0x48e   :  { %v2591_v43 = vpop.f32.mrb[63].mxu1  ;;  %v2597_v6 = vadd.f32 %v5285_v55, %v6741_v37 }
 0x48f   :  { %v2592_v5 = vadd.f32 %v6741_v37, %v2591_v43 }
 0x494   :  { %v5323_v22 = vpop.f32.mrb[38].mxu0 }
 0x495   :  { %v2948_v40 = vcombine.high %v5323_v22, %v5323_v22  ;;  %v2955_v11 = vrot.slane %v5323_v22, %v6382_v30  ;;  %v2788_v26 = vpop.f32.mrb[39].mxu0 }
 0x496   :  { %v2899_v29 = vcombine.high %v2788_v26, %v2788_v26  ;;  %v2906_v63 = vrot.slane %v2788_v26, %v6382_v30 }
 0x497   :  { %v2962_v8 = vrot.slane %v2948_v40, %v6382_v30  ;;  %v2963_v53 = vcombine.high %v2955_v11, %v2955_v11  ;;  %v2971_v12 = vrot.slane %v2955_v11, %v6382_v30 }
 0x498   :  { %v2913_v20 = vrot.slane %v2899_v29, %v6382_v30  ;;  %v2914_v38 = vcombine.high %v2906_v63, %v2906_v63  ;;  %v2922_v17 = vrot.slane %v2906_v63, %v6382_v30 }
 0x499   :  { %v2964_v49 = vcombine.high %v2962_v8, %v2962_v8  ;;  %v6957_v10 = vrot.slane %v2963_v53, %v6382_v30  ;;  %v2993_v60 = vcombine.high %v2971_v12, %v2971_v12  ;;  %v3096_v51 = vrot.slane %v2971_v12, %v6392_v36 }
 0x49a   :  { %v2915_v33 = vcombine.high %v2913_v20, %v2913_v20  ;;  %v6962_v34 = vrot.slane %v2913_v20, %v6382_v30  ;;  %v2936_v52 = vrot.slane %v2914_v38, %v6382_v30  ;;  %v2978_v2 = vrot.slane %v2962_v8, %v6382_v30 }
 0x49b   :  { %v2995_v15 = vcombine.high %v6957_v10, %v6957_v10  ;;  %v3100_v28 = vrot.slane %v6957_v10, %v6392_v36  ;;  %v2944_v61 = vcombine.high %v2922_v17, %v2922_v17  ;;  %v6971_v23 = vrot.slane %v2993_v60, %v6392_v36 }
 0x49c   :  { %v6973_v37 = vadd.f32 %v3096_v51, %v2562_v18  ;;  %v6976_v45 = vrot.slane %v2915_v33, %v6382_v30  ;;  %v2946_v21 = vcombine.high %v2936_v52, %v2936_v52  ;;  %v2945_v24 = vcombine.high %v6962_v34, %v6962_v34 }
 0x49d   :  { %v6979_v41 = vrot.slane %v2995_v15, %v6392_v36  ;;  %v3064_v58 = vrot.slane %v2922_v17, %v6392_v36  ;;  %v3068_v31 = vrot.slane %v2936_v52, %v6392_v36  ;;  %v3072_v13 = vrot.slane %v2944_v61, %v6392_v36 }
 0x49e   :  { %v3333_v62 = vrot.slane %v6973_v37, 4  ;;  %v2947_v0 = vcombine.high %v6976_v45, %v6976_v45  ;;  %v6990_v7 = vrot.slane %v2946_v21, %v6392_v36  ;;  %v3080_v56 = vrot.slane %v6962_v34, %v6392_v36 }
 0x49f   :  { %v3084_v14 = vrot.slane %v6976_v45, %v6392_v36  ;;  %v3173_v44 = vadd.f32 %v3064_v58, %v2522_v46  ;;  %v2992_v59 = vrot.slane %v2964_v49, %v6382_v30  ;;  %v3112_v16 = vrot.slane %v2978_v2, %v6392_v36 }
 0x4a0   :  { %v3334_v3 = vadd.f32 %v3333_v62, %v6973_v37  ;;  %v2994_v54 = vcombine.high %v2978_v2, %v2978_v2  ;;  %v3174_v27 = vadd.f32 %v3068_v31, %v2527_v42  ;;  %v3175_v49 = vadd.f32 %v3072_v13, %v6923_v57 }
 0x4a1   :  { %v3285_v1 = vrot.slane %v3173_v44, 4  ;;  %v3116_v55 = vrot.slane %v2992_v59, %v6392_v36  ;;  %v2996_v43 = vcombine.high %v2992_v59, %v2992_v59  ;;  %v3429_v22 = vmax.f32 %v3173_v44, 0.0 }
 0x4a2   :  { %v3335_v18 = vrot.slane %v3334_v3, 2  ;;  %v7000_v40 = vadd.f32 %v3112_v16, %v2582_v25  ;;  %v3120_v11 = vrot.slane %v2994_v54, %v6392_v36  ;;  %v3291_v26 = vrot.slane %v3174_v27, 4 }
 0x4a3   :  { %v3286_v46 = vadd.f32 %v3285_v1, %v3173_v44  ;;  %v7003_v29 = vadd.f32 %v3116_v55, %v2587_v50  ;;  %v3124_v63 = vrot.slane %v2996_v43, %v6392_v36  ;;  %5380 = vmatprep.mubr.f32.mxu0 %v3429_v22  ;;  %v3430_v8 = vmax.f32 %v3174_v27, 0.0 }
 0x4a4   :  { %v3336_v53 = vadd.f32 %v3335_v18, %v3334_v3  ;;  %v3357_v42 = vrot.slane %v7000_v40, 4  ;;  %v7007_v12 = vadd.f32 %v3120_v11, %v2592_v5  ;;  %v3292_v20 = vadd.f32 %v3291_v26, %v3174_v27 }
 0x4a5   :  { %v3287_v38 = vrot.slane %v3286_v46, 2  ;;  %v3363_v25 = vrot.slane %v7003_v29, 4  ;;  %v7010_v17 = vadd.f32 %v3124_v63, %v2597_v6  ;;  %5381 = vmatmul.mubr.f32.gmra.mrb[56].mxu0 %v3430_v8  ;;  %v3297_v15 = vrot.slane %v3175_v49, 4 }
 0x4a6   :  { %v3337_v50 = vrot.slane %v3336_v53, 1  ;;  %v3358_v60 = vadd.f32 %v3357_v42, %v7000_v40  ;;  %v3369_v51 = vrot.slane %v7007_v12, 4  ;;  %v3293_v33 = vrot.slane %v3292_v20, 2 }
 0x4a7   :  { %v3288_v52 = vadd.f32 %v3287_v38, %v3286_v46  ;;  %v3364_v2 = vadd.f32 %v3363_v25, %v7003_v29  ;;  %v3375_v5 = vrot.slane %v7010_v17, 4  ;;  %v3298_v13 = vadd.f32 %v3297_v15, %v3175_v49 }
 0x4a8   :  { %v3338_v61 = vadd.f32 %v3337_v50, %v3336_v53  ;;  %v3359_v21 = vrot.slane %v3358_v60, 2  ;;  %v3370_v6 = vadd.f32 %v3369_v51, %v7007_v12  ;;  %v3294_v58 = vadd.f32 %v3293_v33, %v3292_v20 }
 0x4a9   :  { %v3289_v31 = vrot.slane %v3288_v52, 1  ;;  %v3365_v62 = vrot.slane %v3364_v2, 2  ;;  %v3376_v57 = vadd.f32 %v3375_v5, %v7010_v17  ;;  %v3299_v55 = vrot.slane %v3298_v13, 2 }
 0x4aa   :  { %v7019_v44 = vmul.f32 0.125, %v3338_v61  ;;  %v3360_v59 = vadd.f32 %v3359_v21, %v3358_v60  ;;  %v3371_v3 = vrot.slane %v3370_v6, 2  ;;  %v3295_v16 = vrot.slane %v3294_v58, 1 }
 0x4ab   :  { %v3290_v54 = vadd.f32 %v3289_v31, %v3288_v52  ;;  %v3366_v27 = vadd.f32 %v3365_v62, %v3364_v2  ;;  %v3377_v1 = vrot.slane %v3376_v57, 2  ;;  %v3088_v43 = vrot.slane %v2945_v24, %v6392_v36 }
 0x4ac   :  { %v3361_v22 = vrot.slane %v3360_v59, 1  ;;  %v7022_v18 = vadd.f32 %v3371_v3, %v3370_v6  ;;  %v3296_v11 = vadd.f32 %v3295_v16, %v3294_v58  ;;  %v3715_v26 = vmax.f32 %v7019_v44, 0.0 }
 0x4ad   :  { %v7025_v46 = vmul.f32 0.125, %v3290_v54  ;;  %v3367_v63 = vrot.slane %v3366_v27, 1  ;;  %v3300_v8 = vadd.f32 %v3299_v55, %v3298_v13  ;;  %v7027_v42 = vadd.f32 %v3377_v1, %v3376_v57 }
 0x4ae   :  { %v3362_v53 = vadd.f32 %v3361_v22, %v3360_v59  ;;  %v7029_v20 = vmul.f32 0.125, %v3296_v11  ;;  %v3431_v38 = vmax.f32 %v3175_v49, 0.0  ;;  %v3373_v24 = vrot.slane %v7022_v18, 1 }
 0x4af   :  { %v3707_v25 = vmax.f32 %v7025_v46, 0.0  ;;  %v3301_v50 = vrot.slane %v3300_v8, 1  ;;  %v3176_v60 = vadd.f32 %v6990_v7, %v6920_v39  ;;  %v7035_v51 = vadd.f32 %v3367_v63, %v3366_v27 }
 0x4b0   :  { %v7037_v33 = vmul.f32 0.125, %v3362_v53  ;;  %5383 = vmatprep.mubr.f32.mxu0 %v3431_v38  ;;  %v3177_v52 = vadd.f32 %v3080_v56, %v6929_v19  ;;  %v3178_v49 = vadd.f32 %v3084_v14, %v6926_v47  ;;  %v3179_v39 = vadd.f32 %v3088_v43, %v6935_v9 }
 0x4b1   :  { %v3302_v2 = vadd.f32 %v3301_v50, %v3300_v8  ;;  %v3303_v5 = vrot.slane %v3176_v60, 4  ;;  %v3432_v15 = vmax.f32 %v3176_v60, 0.0  ;;  %v3708_v7 = vmax.f32 %v7029_v20, 0.0 }
 0x4b2   :  { %v3309_v61 = vrot.slane %v3177_v52, 4  ;;  %v3433_v21 = vmax.f32 %v3177_v52, 0.0  ;;  %v3315_v6 = vrot.slane %v3178_v49, 4  ;;  %v3434_v19 = vmax.f32 %v3178_v49, 0.0 }
 0x4b3   :  { %v7049_v58 = vmul.f32 0.125, %v3302_v2  ;;  %v3304_v31 = vadd.f32 %v3303_v5, %v3176_v60  ;;  %5384 = vmatmul.mubr.f32.gmra.mrb[58].mxu0 %v3432_v15  ;;  %v3321_v34 = vrot.slane %v3179_v39, 4  ;;  %v3435_v47 = vmax.f32 %v3179_v39, 0.0 }
 0x4b4   :  { %v3310_v56 = vadd.f32 %v3309_v61, %v3177_v52  ;;  %5386 = vmatprep.mubr.f32.mxu0 %v3433_v21  ;;  %v3316_v62 = vadd.f32 %v3315_v6, %v3178_v49  ;;  %v3092_v9 = vrot.slane %v2947_v0, %v6392_v36  ;;  %v3437_v13 = vmax.f32 %v6973_v37, 0.0 }
 0x4b5   :  { %v3305_v14 = vrot.slane %v3304_v31, 2  ;;  %v3322_v57 = vadd.f32 %v3321_v34, %v3179_v39  ;;  %v3182_v59 = vadd.f32 %v3100_v28, %v6938_v35  ;;  %v3183_v27 = vadd.f32 %v6971_v23, %v6946_v32 }
 0x4b6   :  { %v3311_v3 = vrot.slane %v3310_v56, 2  ;;  %v3317_v16 = vrot.slane %v3316_v62, 2  ;;  %v3180_v54 = vadd.f32 %v3092_v9, %v6932_v48  ;;  %v3184_v55 = vadd.f32 %v6979_v41, %v6942_v4 }
 0x4b7   :  { %v3306_v1 = vadd.f32 %v3305_v14, %v3304_v31  ;;  %5387 = vmatmul.mubr.f32.gmra.mrb[60].mxu0 %v3434_v19  ;;  %v3339_v45 = vrot.slane %v3182_v59, 4  ;;  %v3438_v0 = vmax.f32 %v3182_v59, 0.0  ;;  %v3345_v10 = vrot.slane %v3183_v27, 4 }
 0x4b8   :  { %v3312_v37 = vadd.f32 %v3311_v3, %v3310_v56  ;;  %5389 = vmatprep.mubr.f32.mxu0 %v3435_v47  ;;  %v3327_v43 = vrot.slane %v3180_v54, 4  ;;  %v3436_v22 = vmax.f32 %v3180_v54, 0.0  ;;  %v3439_v11 = vmax.f32 %v3183_v27, 0.0 }
 0x4b9   :  { %v3307_v35 = vrot.slane %v3306_v1, 1  ;;  %v3340_v28 = vadd.f32 %v3339_v45, %v3182_v59  ;;  %v3351_v63 = vrot.slane %v3184_v55, 4  ;;  %v3346_v48 = vadd.f32 %v3345_v10, %v3183_v27 }
 0x4ba   :  { %v3440_v8 = vmax.f32 %v3184_v55, 0.0  ;;  %v3441_v32 = vmax.f32 %v7000_v40, 0.0  ;;  %v3313_v23 = vrot.slane %v3312_v37, 1  ;;  %v3318_v60 = vadd.f32 %v3317_v16, %v3316_v62 }
 0x4bb   :  { %5390 = vmatmul.mubr.f32.gmra.mrb[62].mxu0 %v3436_v22  ;;  %v3341_v53 = vrot.slane %v3340_v28, 2  ;;  %v3352_v38 = vadd.f32 %v3351_v63, %v3184_v55  ;;  %v3308_v50 = vadd.f32 %v3307_v35, %v3306_v1  ;;  %v3347_v4 = vrot.slane %v3346_v48, 2 }
 0x4bc   :  { %5392 = vmatprep.mubr.f32.mxu0 %v3437_v13  ;;  %v3314_v41 = vadd.f32 %v3313_v23, %v3312_v37  ;;  %v3323_v52 = vrot.slane %v3322_v57, 2  ;;  %v3328_v49 = vadd.f32 %v3327_v43, %v3180_v54  ;;  %v3319_v15 = vrot.slane %v3318_v60, 1 }
 0x4bd   :  { %v3342_v2 = vadd.f32 %v3341_v53, %v3340_v28  ;;  %v3353_v5 = vrot.slane %v3352_v38, 2  ;;  %v3400_v39 = vmul.f32 0.125, %v3308_v50  ;;  %v3348_v61 = vadd.f32 %v3347_v4, %v3346_v48 }
 0x4be   :  { %v3324_v21 = vadd.f32 %v3323_v52, %v3322_v57  ;;  %v3329_v6 = vrot.slane %v3328_v49, 2  ;;  %v3401_v31 = vmul.f32 0.125, %v3314_v41  ;;  %v3320_v34 = vadd.f32 %v3319_v15, %v3318_v60  ;;  %v4537_v60 = vld [vmem:[#allocation2 + $0x390] sm:$0xff] }
 0x4bf   :  { %v3343_v40 = vrot.slane %v3342_v2, 1  ;;  %5393 = vmatmul.mubr.f32.gmra.mrb[64].mxu0 %v3438_v0  ;;  %v3354_v19 = vadd.f32 %v3353_v5, %v3352_v38  ;;  %v3709_v56 = vmax.f32 %v7049_v58, 0.0  ;;  %v3349_v62 = vrot.slane %v3348_v61, 1 }
 0x4c0   :  { %5395 = vmatprep.mubr.f32.mxu0 %v3439_v11  ;;  %v3325_v47 = vrot.slane %v3324_v21, 1  ;;  %v3330_v9 = vadd.f32 %v3329_v6, %v3328_v49  ;;  %v3710_v14 = vmax.f32 %v3400_v39, 0.0  ;;  %v3402_v3 = vmul.f32 0.125, %v3320_v34  ;;  %v4539_v49 = vld [vmem:[#allocation2 + $0x3a0] sm:$0xff] }
 0x4c1   :  { %v3344_v13 = vadd.f32 %v3343_v40, %v3342_v2  ;;  %v3355_v59 = vrot.slane %v3354_v19, 1  ;;  %v3711_v16 = vmax.f32 %v3401_v31, 0.0  ;;  %v3350_v54 = vadd.f32 %v3349_v62, %v3348_v61  ;;  %v4540_v31 = vld [vmem:[#allocation2 + $0x3a8] sm:$0xff]  ;;  %v4541_v40 = vld [vmem:[#allocation2 + $0x3b0] sm:$0xff]  ;;  %v4543_v62 = vld [vmem:[#allocation2 + $0x3c0] sm:$0xff] }
 0x4c2   :  { %v3326_v27 = vadd.f32 %v3325_v47, %v3324_v21  ;;  %v3331_v57 = vrot.slane %v3330_v9, 1  ;;  %v3785_v1 = vsel %vm1582_vm0, %v3708_v7, %v3707_v25  ;;  %v3712_v58 = vmax.f32 %v3402_v3, 0.0  ;;  %v4547_v3 = vld [vmem:[#allocation2 + $0x3e0] sm:$0xff] }
 0x4c3   :  { %v3406_v45 = vmul.f32 0.125, %v3344_v13  ;;  %5396 = vmatmul.mubr.f32.gmra.mrb[66].mxu0 %v3440_v8  ;;  %v3786_v0 = vsel %vm1584_vm1, %v3709_v56, %v3785_v1  ;;  %v3356_v55 = vadd.f32 %v3355_v59, %v3354_v19  ;;  %v3407_v37 = vmul.f32 0.125, %v3350_v54  ;;  %v4542_v56 = vld [vmem:[#allocation2 + $0x3b8] sm:$0xff]  ;;  %v4549_v54 = vld [vmem:[#allocation2 + $0x3f0] sm:$0xff] }
 0x4c4   :  { %5398 = vmatprep.mubr.f32.mxu0 %v3441_v32  ;;  %v3332_v43 = vadd.f32 %v3331_v57, %v3330_v9  ;;  %v3403_v22 = vmul.f32 0.125, %v3326_v27  ;;  %v3787_v10 = vsel %vm1586_vm2, %v3710_v14, %v3786_v0  ;;  %v3374_v46 = vadd.f32 %v3373_v24, %v7022_v18  ;;  %v4536_v24 = vld [vmem:[#allocation2 + $0x388] sm:$0xff]  ;;  %v4545_v14 = vld [vmem:[#allocation2 + $0x3d0] sm:$0xff]  ;;  %v4546_v59 = vld [vmem:[#allocation2 + $0x3d8] sm:$0xff] }
 0x4c5   :  { %v3716_v35 = vmax.f32 %v3406_v45, 0.0  ;;  %v3788_v28 = vsel %vm1588_vm3, %v3711_v16, %v3787_v10  ;;  %v3379_v20 = vrot.slane %v7027_v42, 1  ;;  %v3408_v63 = vmul.f32 0.125, %v3356_v55  ;;  %v4544_v9 = vld [vmem:[#allocation2 + $0x3c8] sm:$0xff]  ;;  %v4550_v1 = vld [vmem:[#allocation2 + $0x3f8] sm:$0xff]  ;;  %v4551_v45 = vld [vmem:[#allocation2 + $0x400] sm:$0xff] }
 0x4c6   :  { %v3404_v25 = vmul.f32 0.125, %v3332_v43  ;;  %v3713_v7 = vmax.f32 %v3403_v22, 0.0  ;;  %v3789_v11 = vsel %vm1590_vm4, %v3712_v58, %v3788_v28  ;;  %v3410_v8 = vmul.f32 0.125, %v7035_v51  ;;  %v4548_v16 = vld [vmem:[#allocation2 + $0x3e8] sm:$0xff] }
 0x4c7   :  { %v3380_v48 = vadd.f32 %v3379_v20, %v7027_v42  ;;  %v3411_v32 = vmul.f32 0.125, %v3374_v46  ;;  %v3717_v23 = vmax.f32 %v3407_v37, 0.0  ;;  %v3718_v50 = vmax.f32 %v3408_v63, 0.0  ;;  %v4538_v42 = vld [vmem:[#allocation2 + $0x398] sm:$0xff] }
 0x4c8   :  { %v3714_v53 = vmax.f32 %v3404_v25, 0.0  ;;  %v3790_v38 = vsel %vm1592_vm5, %v3713_v7, %v3789_v11  ;;  %v3792_v18 = vsel %vm1582_vm0, %v3716_v35, %v3715_v26  ;;  %v3719_v4 = vmax.f32 %v7037_v33, 0.0 }
 0x4c9   :  { %v3412_v41 = vmul.f32 0.125, %v3380_v48  ;;  %v3793_v52 = vsel %vm1584_vm1, %v3717_v23, %v3792_v18  ;;  %v3720_v2 = vmax.f32 %v3410_v8, 0.0  ;;  %v3442_v15 = vmax.f32 %v7003_v29, 0.0  ;;  %v7100_v48 = vld [vmem:[%s7386_s2 + $0x4] ss:$0 sm:$0xff] }
 0x4ca   :  { %v3791_v51 = vsel %vm1594_vm6, %v3714_v53, %v3790_v38  ;;  %v3794_v5 = vsel %vm1586_vm2, %v3718_v50, %v3793_v52  ;;  %v3721_v44 = vmax.f32 %v3411_v32, 0.0  ;;  %v3443_v39 = vmax.f32 %v7007_v12, 0.0 }
 0x4cb   :  { %5439 = vmatprep.mubr.f32.mxu1 %v3791_v51  ;;  %v3795_v26 = vsel %vm1588_vm3, %v3719_v4, %v3794_v5  ;;  %v5704_v61 = vpack.c.bf16 %v4537_v60, %v4536_v24  ;;  %v3722_v33 = vmax.f32 %v3412_v41, 0.0  ;;  %5399 = vmatmul.mubr.f32.gmra.mrb[68].mxu0 %v3442_v15  ;;  %v5708_v6 = vpack.c.bf16 %v4539_v49, %v4538_v42 }
 0x4cc   :  { %v3796_v21 = vsel %vm1590_vm4, %v3720_v2, %v3795_v26  ;;  %5401 = vmatprep.mubr.f32.mxu0 %v3443_v39  ;;  %v3444_v34 = vmax.f32 %v7010_v17, 0.0  ;;  %v5712_v12 = vpack.c.bf16 %v4541_v40, %v4540_v31  ;;  %v5716_v47 = vpack.c.bf16 %v4543_v62, %v4542_v56 }
 0x4cd   :  { %v3797_v19 = vsel %vm1592_vm5, %v3721_v44, %v3796_v21  ;;  %5705 = vmatprep.subr.bf16.mxu1 %v5704_v61  ;;  %v5720_v13 = vpack.c.bf16 %v4545_v14, %v4544_v9  ;;  %v5724_v17 = vpack.c.bf16 %v4547_v3, %v4546_v59  ;;  %v5728_v27 = vpack.c.bf16 %v4549_v54, %v4548_v16 }
 0x4ce   :  { %v3798_v29 = vsel %vm1594_vm6, %v3722_v33, %v3797_v19  ;;  %5707 = vmatpush3.bf16.msra.mxu1 %v5704_v61  ;;  %v5732_v0 = vpack.c.bf16 %v4551_v45, %v4550_v1 }
 0x4cf   :  { %5440 = vmatmul.mubr.f32.gmra.mrb[66].mxu1 %v3798_v29  ;;  %5709 = vmatprep.subr.bf16.mxu1 %v5708_v6 }
 0x4d0   :  { %5402 = vmatmul.mubr.f32.gmra.mrb[70].mxu0 %v3444_v34 }
 0x4d2   :  { %5711 = vmatpush3.bf16.msra.mxu1 %v5708_v6 }
 0x4d3   :  { %5713 = vmatprep.subr.bf16.mxu1 %v5712_v12 }
 0x4d6   :  { %5715 = vmatpush3.bf16.msra.mxu1 %v5712_v12 }
 0x4d7   :  { %5717 = vmatprep.subr.bf16.mxu1 %v5716_v47 }
 0x4da   :  { %5719 = vmatpush3.bf16.msra.mxu1 %v5716_v47 }
 0x4db   :  { %5721 = vmatprep.subr.bf16.mxu1 %v5720_v13 }
 0x4dd   :  { %v5358_v57 = vpop.f32.mrb[40].mxu0 }
 0x4de   :  { %5723 = vmatpush3.bf16.msra.mxu1 %v5720_v13  ;;  %v3532_v58 = vpop.f32.mrb[41].mxu0  ;;  %v7103_v32 = vadd.f32 %v5358_v57, %v7100_v48 }
 0x4df   :  { %5725 = vmatprep.subr.bf16.mxu1 %v5724_v17  ;;  %v3533_v23 = vadd.f32 %v7100_v48, %v3532_v58 }
 0x4e2   :  { %5727 = vmatpush3.bf16.msra.mxu1 %v5724_v17 }
 0x4e3   :  { %5729 = vmatprep.subr.bf16.mxu1 %v5728_v27 }
 0x4e6   :  { %5731 = vmatpush3.bf16.msra.mxu1 %v5728_v27 }
 0x4e7   :  { %5733 = vmatprep.subr.bf16.mxu1 %v5732_v0 }
 0x4ea   :  { %5735 = vmatpush3.bf16.msra.mxu1 %v5732_v0 }
 0x4ee   :  { %v5361_v55 = vpop.f32.mrb[42].mxu0 }
 0x4ef   :  { %v3542_v37 = vpop.f32.mrb[43].mxu0  ;;  %v7107_v53 = vadd.f32 %v5361_v55, %v7100_v48 }
 0x4f0   :  { %v3543_v38 = vadd.f32 %v7100_v48, %v3542_v37 }
 0x4f2   :  { %v5364_v43 = vpop.f32.mrb[44].mxu0 }
 0x4f3   :  { %v3552_v22 = vpop.f32.mrb[45].mxu0  ;;  %v7111_v50 = vadd.f32 %v5364_v43, %v7100_v48 }
 0x4f4   :  { %v7114_v18 = vadd.f32 %v7100_v48, %v3552_v22 }
 0x4f6   :  { %v5367_v10 = vpop.f32.mrb[46].mxu0 }
 0x4f7   :  { %v3562_v35 = vpop.f32.mrb[47].mxu0  ;;  %v7117_v24 = vadd.f32 %v5367_v10, %v7100_v48 }
 0x4f8   :  { %v7120_v60 = vadd.f32 %v7100_v48, %v3562_v35 }
 0x4fa   :  { %v5370_v28 = vpop.f32.mrb[48].mxu0 }
 0x4fb   :  { %v3572_v46 = vpop.f32.mrb[49].mxu0  ;;  %v3578_v41 = vadd.f32 %v5370_v28, %v7100_v48 }
 0x4fc   :  { %v3573_v52 = vadd.f32 %v7100_v48, %v3572_v46 }
 0x4fe   :  { %v5373_v20 = vpop.f32.mrb[50].mxu0 }
 0x4ff   :  { %v3582_v25 = vpop.f32.mrb[51].mxu0  ;;  %v3588_v2 = vadd.f32 %v5373_v20, %v7100_v48 }
 0x500   :  { %v3583_v5 = vadd.f32 %v7100_v48, %v3582_v25 }
 0x502   :  { %v5376_v7 = vpop.f32.mrb[52].mxu0 }
 0x503   :  { %v3592_v11 = vpop.f32.mrb[53].mxu0  ;;  %v7130_v61 = vadd.f32 %v5376_v7, %v7100_v48 }
 0x504   :  { %v7133_v33 = vadd.f32 %v7100_v48, %v3592_v11 }
 0x506   :  { %v5379_v63 = vpop.f32.mrb[54].mxu0 }
 0x507   :  { %v3602_v8 = vpop.f32.mrb[55].mxu0  ;;  %v7138_v40 = vadd.f32 %v5379_v63, %v7100_v48 }
 0x508   :  { %v7145_v12 = vadd.f32 %v7100_v48, %v3602_v8 }
 0x50b   :  { %v5438_v4 = vpop.f32.mrb[64].mxu1 }
 0x50c   :  { %v3941_v42 = vcombine.high %v5438_v4, %v5438_v4  ;;  %v3948_v49 = vrot.slane %v5438_v4, %v6382_v30  ;;  %v3869_v51 = vpop.f32.mrb[65].mxu1 }
 0x50d   :  { %v3892_v15 = vcombine.high %v3869_v51, %v3869_v51  ;;  %v3899_v44 = vrot.slane %v3869_v51, %v6382_v30 }
 0x50e   :  { %v3956_v26 = vcombine.high %v3948_v49, %v3948_v49  ;;  %v3964_v39 = vrot.slane %v3948_v49, %v6382_v30  ;;  %v7141_v19 = vrot.slane %v3941_v42, %v6382_v30 }
 0x50f   :  { %v3906_v21 = vrot.slane %v3892_v15, %v6382_v30  ;;  %v3907_v6 = vcombine.high %v3899_v44, %v3899_v44  ;;  %v3915_v31 = vrot.slane %v3899_v44, %v6382_v30 }
 0x510   :  { %v3978_v29 = vrot.slane %v3956_v26, %v6382_v30  ;;  %v3986_v34 = vcombine.high %v3964_v39, %v3964_v39  ;;  %v4123_v56 = vrot.slane %v3964_v39, %v6392_v36  ;;  %v3957_v57 = vcombine.high %v7141_v19, %v7141_v19 }
 0x511   :  { %v3908_v62 = vcombine.high %v3906_v21, %v3906_v21  ;;  %v3922_v47 = vrot.slane %v3906_v21, %v6382_v30  ;;  %v3929_v9 = vrot.slane %v3907_v6, %v6382_v30  ;;  %v3937_v3 = vcombine.high %v3915_v31, %v3915_v31 }
 0x512   :  { %v3988_v14 = vcombine.high %v3978_v29, %v3978_v29  ;;  %v4127_v13 = vrot.slane %v3978_v29, %v6392_v36  ;;  %v4131_v59 = vrot.slane %v3986_v34, %v6392_v36  ;;  %v4256_v17 = vadd.f32 %v4123_v56, %v3573_v52 }
 0x513   :  { %v7153_v16 = vrot.slane %v3908_v62, %v6382_v30  ;;  %v3938_v54 = vcombine.high %v3922_v47, %v3922_v47  ;;  %v3939_v27 = vcombine.high %v3929_v9, %v3929_v9  ;;  %v4091_v55 = vrot.slane %v3915_v31, %v6392_v36 }
 0x514   :  { %v4135_v1 = vrot.slane %v3988_v14, %v6392_v36  ;;  %v4257_v45 = vadd.f32 %v4127_v13, %v3578_v41  ;;  %v4258_v58 = vadd.f32 %v4131_v59, %v3583_v5  ;;  %v4328_v0 = vrot.slane %v4256_v17, 4 }
 0x515   :  { %v4095_v37 = vrot.slane %v3929_v9, %v6392_v36  ;;  %v4099_v43 = vrot.slane %v3937_v3, %v6392_v36  ;;  %v4103_v28 = vrot.slane %v3939_v27, %v6392_v36  ;;  %v4107_v20 = vrot.slane %v3922_v47, %v6392_v36 }
 0x516   :  { %v4259_v22 = vadd.f32 %v4135_v1, %v3588_v2  ;;  %v4334_v10 = vrot.slane %v4257_v45, 4  ;;  %v4340_v35 = vrot.slane %v4258_v58, 4  ;;  %v4329_v46 = vadd.f32 %v4328_v0, %v4256_v17 }
 0x517   :  { %v4111_v25 = vrot.slane %v7153_v16, %v6392_v36  ;;  %v4115_v7 = vrot.slane %v3938_v54, %v6392_v36  ;;  %v3940_v4 = vcombine.high %v7153_v16, %v7153_v16  ;;  %v4248_v52 = vadd.f32 %v4091_v55, %v3533_v23 }
 0x518   :  { %v4335_v11 = vadd.f32 %v4334_v10, %v4257_v45  ;;  %v4341_v63 = vadd.f32 %v4340_v35, %v4258_v58  ;;  %v4346_v8 = vrot.slane %v4259_v22, 4  ;;  %v4330_v41 = vrot.slane %v4329_v46, 2 }
 0x519   :  { %v4249_v42 = vadd.f32 %v4095_v37, %v7103_v32  ;;  %v4250_v49 = vadd.f32 %v4099_v43, %v3543_v38  ;;  %v4251_v15 = vadd.f32 %v4103_v28, %v7107_v53  ;;  %v4252_v26 = vadd.f32 %v4107_v20, %v7114_v18 }
 0x51a   :  { %v4336_v51 = vrot.slane %v4335_v11, 2  ;;  %v4342_v2 = vrot.slane %v4341_v63, 2  ;;  %v4347_v5 = vadd.f32 %v4346_v8, %v4259_v22  ;;  %v4331_v44 = vadd.f32 %v4330_v41, %v4329_v46 }
 0x51b   :  { %v4253_v39 = vadd.f32 %v4111_v25, %v7111_v50  ;;  %v7173_v21 = vadd.f32 %v4115_v7, %v7120_v60  ;;  %v4280_v23 = vrot.slane %v4248_v52, 4  ;;  %v4286_v32 = vrot.slane %v4249_v42, 4 }
 0x51c   :  { %v4337_v6 = vadd.f32 %v4336_v51, %v4335_v11  ;;  %v4343_v31 = vadd.f32 %v4342_v2, %v4341_v63  ;;  %v4348_v29 = vrot.slane %v4347_v5, 2  ;;  %v4332_v34 = vrot.slane %v4331_v44, 1 }
 0x51d   :  { %v4292_v38 = vrot.slane %v4250_v49, 4  ;;  %v4298_v56 = vrot.slane %v4251_v15, 4  ;;  %v4281_v53 = vadd.f32 %v4280_v23, %v4248_v52  ;;  %v4287_v13 = vadd.f32 %v4286_v32, %v4249_v42 }
 0x51e   :  { %v4338_v62 = vrot.slane %v4337_v6, 1  ;;  %v4344_v47 = vrot.slane %v4343_v31, 1  ;;  %v4349_v9 = vadd.f32 %v4348_v29, %v4347_v5  ;;  %v4333_v14 = vadd.f32 %v4332_v34, %v4331_v44 }
 0x51f   :  { %v4293_v18 = vadd.f32 %v4292_v38, %v4250_v49  ;;  %v4299_v59 = vadd.f32 %v4298_v56, %v4251_v15  ;;  %v4282_v17 = vrot.slane %v4281_v53, 2  ;;  %v4288_v54 = vrot.slane %v4287_v13, 2 }
 0x520   :  { %v4339_v50 = vadd.f32 %v4338_v62, %v4337_v6  ;;  %v4345_v3 = vadd.f32 %v4344_v47, %v4343_v31  ;;  %v4350_v60 = vrot.slane %v4349_v9, 1  ;;  %v7175_v16 = vmul.f32 0.125, %v4333_v14 }
 0x521   :  { %v4294_v27 = vrot.slane %v4293_v18, 2  ;;  %v4300_v1 = vrot.slane %v4299_v59, 2  ;;  %v4283_v55 = vadd.f32 %v4282_v17, %v4281_v53  ;;  %v3971_v37 = vrot.slane %v7141_v19, %v6382_v30 }
 0x522   :  { %v4351_v45 = vadd.f32 %v4350_v60, %v4349_v9  ;;  %v7177_v58 = vmul.f32 0.125, %v4339_v50  ;;  %v7179_v0 = vmul.f32 0.125, %v4345_v3  ;;  %v4289_v43 = vadd.f32 %v4288_v54, %v4287_v13 }
 0x523   :  { %v4295_v22 = vadd.f32 %v4294_v27, %v4293_v18  ;;  %v4301_v10 = vadd.f32 %v4300_v1, %v4299_v59  ;;  %v4512_v28 = vmax.f32 %v7175_v16, 0.0  ;;  %v4119_v46 = vrot.slane %v3940_v4, %v6392_v36 }
 0x524   :  { %v7183_v35 = vmul.f32 0.125, %v4351_v45  ;;  %v4284_v20 = vrot.slane %v4283_v55, 1  ;;  %v4513_v25 = vmax.f32 %v7177_v58, 0.0  ;;  %v4290_v7 = vrot.slane %v4289_v43, 1 }
 0x525   :  { %v4296_v11 = vrot.slane %v4295_v22, 1  ;;  %v4304_v63 = vrot.slane %v4252_v26, 4  ;;  %v4514_v8 = vmax.f32 %v7179_v0, 0.0  ;;  %v4302_v52 = vrot.slane %v4301_v10, 1 }
 0x526   :  { %v4285_v41 = vadd.f32 %v4284_v20, %v4283_v55  ;;  %v4310_v42 = vrot.slane %v4253_v39, 4  ;;  %v4291_v49 = vadd.f32 %v4290_v7, %v4289_v43  ;;  %v3985_v5 = vrot.slane %v3957_v57, %v6382_v30 }
 0x527   :  { %v4297_v51 = vadd.f32 %v4296_v11, %v4295_v22  ;;  %v4305_v2 = vadd.f32 %v4304_v63, %v4252_v26  ;;  %v4515_v4 = vmax.f32 %v7183_v35, 0.0  ;;  %v4139_v44 = vrot.slane %v3971_v37, %v6392_v36 }
 0x528   :  { %v7194_v15 = vmul.f32 0.125, %v4285_v41  ;;  %v3987_v6 = vcombine.high %v3971_v37, %v3971_v37  ;;  %v4311_v29 = vadd.f32 %v4310_v42, %v4253_v39  ;;  %v7197_v23 = vmul.f32 0.125, %v4291_v49 }
 0x529   :  { %v4306_v31 = vrot.slane %v4305_v2, 2  ;;  %v4143_v34 = vrot.slane %v3985_v5, %v6392_v36  ;;  %v4316_v26 = vrot.slane %v7173_v21, 4  ;;  %v4260_v32 = vadd.f32 %v4139_v44, %v7133_v33 }
 0x52a   :  { %v3989_v38 = vcombine.high %v3985_v5, %v3985_v5  ;;  %v4147_v19 = vrot.slane %v3987_v6, %v6392_v36  ;;  %v7203_v56 = vmul.f32 0.125, %v4297_v51  ;;  %v4504_v62 = vmax.f32 %v7194_v15, 0.0 }
 0x52b   :  { %v4307_v57 = vadd.f32 %v4306_v31, %v4305_v2  ;;  %v4261_v47 = vadd.f32 %v4143_v34, %v7130_v61  ;;  %v4352_v9 = vrot.slane %v4260_v32, 4  ;;  %v4255_v14 = vadd.f32 %v4119_v46, %v7117_v24 }
 0x52c   :  { %v4151_v39 = vrot.slane %v3989_v38, %v6392_v36  ;;  %v4262_v53 = vadd.f32 %v4147_v19, %v7145_v12  ;;  %v4505_v33 = vmax.f32 %v7197_v23, 0.0  ;;  %v4312_v59 = vrot.slane %v4311_v29, 2 }
 0x52d   :  { %v4308_v13 = vrot.slane %v4307_v57, 1  ;;  %v4358_v18 = vrot.slane %v4261_v47, 4  ;;  %v4353_v50 = vadd.f32 %v4352_v9, %v4260_v32  ;;  %v4317_v17 = vadd.f32 %v4316_v26, %v7173_v21 }
 0x52e   :  { %v4263_v3 = vadd.f32 %v4151_v39, %v7138_v40  ;;  %v4364_v60 = vrot.slane %v4262_v53, 4  ;;  %v4303_v61 = vadd.f32 %v4302_v52, %v4301_v10  ;;  %v4313_v27 = vadd.f32 %v4312_v59, %v4311_v29 }
 0x52f   :  { %v4359_v54 = vadd.f32 %v4358_v18, %v4261_v47  ;;  %v4322_v1 = vrot.slane %v4255_v14, 4  ;;  %v4354_v45 = vrot.slane %v4353_v50, 2  ;;  %v4318_v37 = vrot.slane %v4317_v17, 2 }
 0x530   :  { %v4370_v55 = vrot.slane %v4263_v3, 4  ;;  %v4365_v12 = vadd.f32 %v4364_v60, %v4262_v53  ;;  %v4309_v43 = vadd.f32 %v4308_v13, %v4307_v57  ;;  %v4314_v22 = vrot.slane %v4313_v27, 1 }
 0x531   :  { %v4360_v24 = vrot.slane %v4359_v54, 2  ;;  %v4323_v46 = vadd.f32 %v4322_v1, %v4255_v14  ;;  %v4355_v20 = vadd.f32 %v4354_v45, %v4353_v50  ;;  %v4319_v63 = vadd.f32 %v4318_v37, %v4317_v17 }
 0x532   :  { %v4371_v7 = vadd.f32 %v4370_v55, %v4263_v3  ;;  %v4366_v11 = vrot.slane %v4365_v12, 2  ;;  %v4315_v41 = vadd.f32 %v4314_v22, %v4313_v27  ;;  %v4475_v21 = vmul.f32 0.125, %v4303_v61 }
 0x533   :  { %v4361_v40 = vadd.f32 %v4360_v24, %v4359_v54  ;;  %v4324_v42 = vrot.slane %v4323_v46, 2  ;;  %v4356_v49 = vrot.slane %v4355_v20, 1  ;;  %v4320_v51 = vrot.slane %v4319_v63, 1 }
 0x534   :  { %v4372_v10 = vrot.slane %v4371_v7, 2  ;;  %v4367_v52 = vadd.f32 %v4366_v11, %v4365_v12  ;;  %v4476_v15 = vmul.f32 0.125, %v4309_v43  ;;  %v4477_v44 = vmul.f32 0.125, %v4315_v41 }
 0x535   :  { %v4362_v2 = vrot.slane %v4361_v40, 1  ;;  %v4325_v5 = vadd.f32 %v4324_v42, %v4323_v46  ;;  %v4357_v6 = vadd.f32 %v4356_v49, %v4355_v20  ;;  %v4321_v23 = vadd.f32 %v4320_v51, %v4319_v63 }
 0x536   :  { %v4373_v31 = vadd.f32 %v4372_v10, %v4371_v7  ;;  %v4368_v29 = vrot.slane %v4367_v52, 1  ;;  %v4506_v34 = vmax.f32 %v7203_v56, 0.0  ;;  %v4507_v38 = vmax.f32 %v4475_v21, 0.0 }
 0x537   :  { %v4363_v26 = vadd.f32 %v4362_v2, %v4361_v40  ;;  %v4326_v32 = vrot.slane %v4325_v5, 1  ;;  %v4484_v19 = vmul.f32 0.125, %v4357_v6  ;;  %v4478_v9 = vmul.f32 0.125, %v4321_v23 }
 0x538   :  { %v4374_v57 = vrot.slane %v4373_v31, 1  ;;  %v4369_v47 = vadd.f32 %v4368_v29, %v4367_v52  ;;  %v4589_v14 = vsel %vm1582_vm0, %v4505_v33, %v4504_v62  ;;  %v4596_v13 = vsel %vm1582_vm0, %v4513_v25, %v4512_v28 }
 0x539   :  { %v4485_v39 = vmul.f32 0.125, %v4363_v26  ;;  %v4327_v53 = vadd.f32 %v4326_v32, %v4325_v5  ;;  %v4508_v56 = vmax.f32 %v4476_v15, 0.0  ;;  %v4509_v50 = vmax.f32 %v4477_v44, 0.0 }
 0x53a   :  { %v4375_v18 = vadd.f32 %v4374_v57, %v4373_v31  ;;  %v4486_v59 = vmul.f32 0.125, %v4369_v47  ;;  %v4516_v3 = vmax.f32 %v4484_v19, 0.0  ;;  %v4590_v17 = vsel %vm1584_vm1, %v4506_v34, %v4589_v14 }
 0x53b   :  { %v4479_v60 = vmul.f32 0.125, %v4327_v53  ;;  %v4597_v54 = vsel %vm1584_vm1, %v4514_v8, %v4596_v13  ;;  %v4517_v61 = vmax.f32 %v4485_v39, 0.0  ;;  %v4591_v16 = vsel %vm1586_vm2, %v4507_v38, %v4590_v17 }
 0x53c   :  { %v4487_v62 = vmul.f32 0.125, %v4375_v18  ;;  %v4598_v58 = vsel %vm1586_vm2, %v4515_v4, %v4597_v54  ;;  %v4518_v28 = vmax.f32 %v4486_v59, 0.0  ;;  %v4510_v25 = vmax.f32 %v4478_v9, 0.0 }
 0x53d   :  { %v4592_v33 = vsel %vm1588_vm3, %v4508_v56, %v4591_v16  ;;  %v4599_v27 = vsel %vm1588_vm3, %v4516_v3, %v4598_v58  ;;  %v4511_v45 = vmax.f32 %v4479_v60, 0.0 }
 0x53e   :  { %v4519_v1 = vmax.f32 %v4487_v62, 0.0  ;;  %v4593_v0 = vsel %vm1590_vm4, %v4509_v50, %v4592_v33  ;;  %v4600_v8 = vsel %vm1590_vm4, %v4517_v61, %v4599_v27 }
 0x53f   :  { %v4594_v55 = vsel %vm1592_vm5, %v4510_v25, %v4593_v0  ;;  %v4601_v12 = vsel %vm1592_vm5, %v4518_v28, %v4600_v8 }
 0x540   :  { %v4595_v35 = vsel %vm1594_vm6, %v4511_v45, %v4594_v55  ;;  %v4602_v4 = vsel %vm1594_vm6, %v4519_v1, %v4601_v12 }
 0x541   :  { %5474 = vmatprep.mubr.f32.mxu1 %v4595_v35 }
 0x542   :  { %5475 = vmatmul.mubr.f32.vlgmr.msra.gmra.mrb[68].mxu1 %v4602_v4 }
 0x578   :  { %v5382_v37 = vpop.f32.mrb[56].mxu0 }
 0x579   :  { %v3612_v24 = vpop.f32.mrb[57].mxu0  ;;  %v7237_v10 = vadd.f32 %v5382_v37, %v7100_v48 }
 0x57a   :  { %v7240_v52 = vadd.f32 %v7100_v48, %v3612_v24 }
 0x586   :  { %v5385_v43 = vpop.f32.mrb[58].mxu0 }
 0x587   :  { %v3622_v22 = vpop.f32.mrb[59].mxu0  ;;  %v7243_v51 = vadd.f32 %v5385_v43, %v7100_v48 }
 0x588   :  { %v7246_v2 = vadd.f32 %v7100_v48, %v3622_v22 }
 0x58a   :  { %v5388_v46 = vpop.f32.mrb[60].mxu0 }
 0x58b   :  { %v3632_v20 = vpop.f32.mrb[61].mxu0  ;;  %v7249_v5 = vadd.f32 %v5388_v46, %v7100_v48 }
 0x58c   :  { %v7252_v15 = vadd.f32 %v7100_v48, %v3632_v20 }
 0x58e   :  { %v5391_v7 = vpop.f32.mrb[62].mxu0 }
 0x58f   :  { %v3642_v11 = vpop.f32.mrb[63].mxu0  ;;  %v7255_v44 = vadd.f32 %v5391_v7, %v7100_v48 }
 0x590   :  { %v7258_v31 = vadd.f32 %v7100_v48, %v3642_v11 }
 0x592   :  { %v5394_v63 = vpop.f32.mrb[64].mxu0 }
 0x593   :  { %v3652_v40 = vpop.f32.mrb[65].mxu0  ;;  %v3658_v29 = vadd.f32 %v5394_v63, %v7100_v48 }
 0x594   :  { %v3653_v38 = vadd.f32 %v7100_v48, %v3652_v40 }
 0x596   :  { %v5397_v41 = vpop.f32.mrb[66].mxu0 }
 0x597   :  { %v3662_v42 = vpop.f32.mrb[67].mxu0  ;;  %v3668_v19 = vadd.f32 %v5397_v41, %v7100_v48 }
 0x598   :  { %v3663_v39 = vadd.f32 %v7100_v48, %v3662_v42 }
 0x59e   :  { %v5400_v21 = vpop.f32.mrb[68].mxu0 }
 0x59f   :  { %v3672_v49 = vpop.f32.mrb[69].mxu0  ;;  %v7268_v13 = vadd.f32 %v5400_v21, %v7100_v48 }
 0x5a0   :  { %v7273_v50 = vadd.f32 %v7100_v48, %v3672_v49 }
 0x5a2   :  { %v5441_v6 = vpop.f32.mrb[66].mxu1 }
 0x5a3   :  { %v4039_v23 = vcombine.high %v5441_v6, %v5441_v6  ;;  %v4046_v34 = vrot.slane %v5441_v6, %v6382_v30  ;;  %v3879_v26 = vpop.f32.mrb[67].mxu1  ;;  %v5403_v32 = vpop.f32.mrb[70].mxu0 }
 0x5a4   :  { %v3990_v57 = vcombine.high %v3879_v26, %v3879_v26  ;;  %v3997_v47 = vrot.slane %v3879_v26, %v6382_v30  ;;  %v3682_v9 = vpop.f32.mrb[71].mxu0  ;;  %v7280_v54 = vadd.f32 %v5403_v32, %v7100_v48 }
 0x5a5   :  { %v4054_v53 = vcombine.high %v4046_v34, %v4046_v34  ;;  %v4062_v14 = vrot.slane %v4046_v34, %v6382_v30  ;;  %v7276_v3 = vrot.slane %v4039_v23, %v6382_v30  ;;  %v7292_v4 = vadd.f32 %v7100_v48, %v3682_v9 }
 0x5a6   :  { %v4004_v18 = vrot.slane %v3990_v57, %v6382_v30  ;;  %v4005_v59 = vcombine.high %v3997_v47, %v3997_v47  ;;  %v4013_v56 = vrot.slane %v3997_v47, %v6382_v30 }
 0x5a7   :  { %v4076_v60 = vrot.slane %v4054_v53, %v6382_v30  ;;  %v4084_v17 = vcombine.high %v4062_v14, %v4062_v14  ;;  %v4187_v61 = vrot.slane %v4062_v14, %v6392_v36  ;;  %v4055_v42 = vcombine.high %v7276_v3, %v7276_v3 }
 0x5a8   :  { %v4006_v62 = vcombine.high %v4004_v18, %v4004_v18  ;;  %v4020_v16 = vrot.slane %v4004_v18, %v6382_v30  ;;  %v4027_v58 = vrot.slane %v4005_v59, %v6382_v30  ;;  %v4035_v27 = vcombine.high %v4013_v56, %v4013_v56 }
 0x5a9   :  { %v4086_v28 = vcombine.high %v4076_v60, %v4076_v60  ;;  %v4191_v25 = vrot.slane %v4076_v60, %v6392_v36  ;;  %v4195_v33 = vrot.slane %v4084_v17, %v6392_v36  ;;  %v4272_v1 = vadd.f32 %v4187_v61, %v3653_v38 }
 0x5aa   :  { %v7288_v45 = vrot.slane %v4006_v62, %v6382_v30  ;;  %v4036_v0 = vcombine.high %v4020_v16, %v4020_v16  ;;  %v4037_v8 = vcombine.high %v4027_v58, %v4027_v58  ;;  %v4155_v24 = vrot.slane %v4013_v56, %v6392_v36 }
 0x5ab   :  { %v4199_v55 = vrot.slane %v4086_v28, %v6392_v36  ;;  %v4273_v12 = vadd.f32 %v4191_v25, %v3658_v29  ;;  %v4274_v35 = vadd.f32 %v4195_v33, %v3663_v39  ;;  %v4424_v37 = vrot.slane %v4272_v1, 4 }
 0x5ac   :  { %v4159_v43 = vrot.slane %v4027_v58, %v6392_v36  ;;  %v4163_v22 = vrot.slane %v4035_v27, %v6392_v36  ;;  %v4167_v11 = vrot.slane %v4037_v8, %v6392_v36  ;;  %v4171_v40 = vrot.slane %v4020_v16, %v6392_v36 }
 0x5ad   :  { %v4275_v46 = vadd.f32 %v4199_v55, %v3668_v19  ;;  %v4430_v20 = vrot.slane %v4273_v12, 4  ;;  %v4436_v7 = vrot.slane %v4274_v35, 4  ;;  %v4425_v63 = vadd.f32 %v4424_v37, %v4272_v1 }
 0x5ae   :  { %v4175_v41 = vrot.slane %v7288_v45, %v6392_v36  ;;  %v4179_v48 = vrot.slane %v4036_v0, %v6392_v36  ;;  %v4264_v23 = vadd.f32 %v4155_v24, %v7240_v52  ;;  %v4265_v34 = vadd.f32 %v4159_v43, %v7237_v10 }
 0x5af   :  { %v4431_v21 = vadd.f32 %v4430_v20, %v4273_v12  ;;  %v4437_v49 = vadd.f32 %v4436_v7, %v4274_v35  ;;  %v4442_v6 = vrot.slane %v4275_v46, 4  ;;  %v4426_v29 = vrot.slane %v4425_v63, 2 }
 0x5b0   :  { %v4266_v26 = vadd.f32 %v4163_v22, %v7246_v2  ;;  %v4267_v57 = vadd.f32 %v4167_v11, %v7243_v51  ;;  %v4268_v9 = vadd.f32 %v4171_v40, %v7252_v15  ;;  %v4269_v39 = vadd.f32 %v4175_v41, %v7249_v5 }
 0x5b1   :  { %v4432_v32 = vrot.slane %v4431_v21, 2  ;;  %v4438_v38 = vrot.slane %v4437_v49, 2  ;;  %v4443_v19 = vadd.f32 %v4442_v6, %v4275_v46  ;;  %v4427_v47 = vadd.f32 %v4426_v29, %v4425_v63 }
 0x5b2   :  { %v7311_v53 = vadd.f32 %v4179_v48, %v7258_v31  ;;  %v4376_v59 = vrot.slane %v4264_v23, 4  ;;  %v4382_v56 = vrot.slane %v4265_v34, 4  ;;  %v4388_v2 = vrot.slane %v4266_v26, 4 }
 0x5b3   :  { %v4433_v14 = vadd.f32 %v4432_v32, %v4431_v21  ;;  %v4439_v18 = vadd.f32 %v4438_v38, %v4437_v49  ;;  %v4444_v52 = vrot.slane %v4443_v19, 2  ;;  %v4428_v10 = vrot.slane %v4427_v47, 1 }
 0x5b4   :  { %v4394_v60 = vrot.slane %v4267_v57, 4  ;;  %v4038_v51 = vcombine.high %v7288_v45, %v7288_v45  ;;  %v4377_v62 = vadd.f32 %v4376_v59, %v4264_v23  ;;  %v4383_v16 = vadd.f32 %v4382_v56, %v4265_v34 }
 0x5b5   :  { %v4434_v17 = vrot.slane %v4433_v14, 1  ;;  %v4440_v61 = vrot.slane %v4439_v18, 1  ;;  %v4429_v15 = vadd.f32 %v4428_v10, %v4427_v47  ;;  %v4389_v5 = vadd.f32 %v4388_v2, %v4266_v26 }
 0x5b6   :  { %v4395_v58 = vadd.f32 %v4394_v60, %v4267_v57  ;;  %v7315_v25 = vadd.f32 %v4444_v52, %v4443_v19  ;;  %v4378_v33 = vrot.slane %v4377_v62, 2  ;;  %v4384_v1 = vrot.slane %v4383_v16, 2 }
 0x5b7   :  { %v4435_v31 = vadd.f32 %v4434_v17, %v4433_v14  ;;  %v4441_v28 = vadd.f32 %v4440_v61, %v4439_v18  ;;  %v7317_v27 = vmul.f32 0.125, %v4429_v15  ;;  %v4390_v0 = vrot.slane %v4389_v5, 2 }
 0x5b8   :  { %v4396_v8 = vrot.slane %v4395_v58, 2  ;;  %v4069_v55 = vrot.slane %v7276_v3, %v6382_v30  ;;  %v4379_v45 = vadd.f32 %v4378_v33, %v4377_v62  ;;  %v4400_v35 = vrot.slane %v4268_v9, 4 }
 0x5b9   :  { %v7321_v12 = vmul.f32 0.125, %v4435_v31  ;;  %v4183_v37 = vrot.slane %v4038_v51, %v6392_v36  ;;  %v4385_v24 = vadd.f32 %v4384_v1, %v4383_v16  ;;  %v4391_v43 = vadd.f32 %v4390_v0, %v4389_v5 }
 0x5ba   :  { %v4397_v22 = vadd.f32 %v4396_v8, %v4395_v58  ;;  %v4446_v46 = vrot.slane %v7315_v25, 1  ;;  %v7325_v20 = vmul.f32 0.125, %v4441_v28  ;;  %v4380_v7 = vrot.slane %v4379_v45, 1 }
 0x5bb   :  { %v4401_v11 = vadd.f32 %v4400_v35, %v4268_v9  ;;  %v4528_v63 = vmax.f32 %v7317_v27, 0.0  ;;  %v4386_v40 = vrot.slane %v4385_v24, 1  ;;  %v4392_v41 = vrot.slane %v4391_v43, 1 }
 0x5bc   :  { %v4406_v3 = vrot.slane %v4269_v39, 4  ;;  %v4529_v48 = vmax.f32 %v7321_v12, 0.0  ;;  %v4381_v21 = vadd.f32 %v4380_v7, %v4379_v45  ;;  %v4083_v6 = vrot.slane %v4055_v42, %v6382_v30 }
 0x5bd   :  { %v4402_v49 = vrot.slane %v4401_v11, 2  ;;  %v4387_v29 = vadd.f32 %v4386_v40, %v4385_v24  ;;  %v4393_v23 = vadd.f32 %v4392_v41, %v4391_v43  ;;  %v4398_v34 = vrot.slane %v4397_v22, 1 }
 0x5be   :  { %v4203_v26 = vrot.slane %v4069_v55, %v6392_v36  ;;  %v4407_v38 = vadd.f32 %v4406_v3, %v4269_v39  ;;  %v4207_v19 = vrot.slane %v4083_v6, %v6392_v36  ;;  %v4087_v57 = vcombine.high %v4083_v6, %v4083_v6 }
 0x5bf   :  { %v4403_v32 = vadd.f32 %v4402_v49, %v4401_v11  ;;  %v4489_v47 = vmul.f32 0.125, %v4387_v29  ;;  %v7332_v9 = vmul.f32 0.125, %v4393_v23  ;;  %v4085_v18 = vcombine.high %v4069_v55, %v4069_v55 }
 0x5c0   :  { %v4276_v14 = vadd.f32 %v4203_v26, %v7273_v50  ;;  %v4412_v52 = vrot.slane %v7311_v53, 4  ;;  %v4488_v59 = vmul.f32 0.125, %v4381_v21  ;;  %v4277_v30 = vadd.f32 %v4207_v19, %v7268_v13 }
 0x5c1   :  { %v4215_v42 = vrot.slane %v4087_v57, %v6392_v36  ;;  %v4404_v10 = vrot.slane %v4403_v32, 1  ;;  %v4521_v56 = vmax.f32 %v4489_v47, 0.0  ;;  %v4211_v39 = vrot.slane %v4085_v18, %v6392_v36 }
 0x5c2   :  { %v4448_v2 = vrot.slane %v4276_v14, 4  ;;  %v4522_v60 = vmax.f32 %v7332_v9, 0.0  ;;  %v4454_v17 = vrot.slane %v4277_v30, 4  ;;  %v4271_v50 = vadd.f32 %v4183_v37, %v7255_v44 }
 0x5c3   :  { %v4279_v61 = vadd.f32 %v4215_v42, %v7280_v54  ;;  %v4278_v62 = vadd.f32 %v4211_v39, %v7292_v4  ;;  %v4399_v15 = vadd.f32 %v4398_v34, %v4397_v22  ;;  %v4408_v16 = vrot.slane %v4407_v38, 2 }
 0x5c4   :  { %v4449_v51 = vadd.f32 %v4448_v2, %v4276_v14  ;;  %v4455_v13 = vadd.f32 %v4454_v17, %v4277_v30  ;;  %v4413_v58 = vadd.f32 %v4412_v52, %v7311_v53  ;;  %v4418_v31 = vrot.slane %v4271_v50, 4 }
 0x5c5   :  { %v4466_v5 = vrot.slane %v4279_v61, 4  ;;  %v4460_v33 = vrot.slane %v4278_v62, 4  ;;  %v4405_v36 = vadd.f32 %v4404_v10, %v4403_v32  ;;  %v4409_v1 = vadd.f32 %v4408_v16, %v4407_v38 }
 0x5c6   :  { %v4450_v28 = vrot.slane %v4449_v51, 2  ;;  %v4456_v0 = vrot.slane %v4455_v13, 2  ;;  %v4414_v55 = vrot.slane %v4413_v58, 2  ;;  %v4419_v54 = vadd.f32 %v4418_v31, %v4271_v50 }
 0x5c7   :  { %v4467_v8 = vadd.f32 %v4466_v5, %v4279_v61  ;;  %v4461_v44 = vadd.f32 %v4460_v33, %v4278_v62  ;;  %v4410_v35 = vrot.slane %v4409_v1, 1  ;;  %v4491_v37 = vmul.f32 0.125, %v4399_v15 }
 0x5c8   :  { %v4451_v45 = vadd.f32 %v4450_v28, %v4449_v51  ;;  %v4457_v4 = vadd.f32 %v4456_v0, %v4455_v13  ;;  %v4415_v43 = vadd.f32 %v4414_v55, %v4413_v58  ;;  %v4420_v22 = vrot.slane %v4419_v54, 2 }
 0x5c9   :  { %v4468_v24 = vrot.slane %v4467_v8, 2  ;;  %v4462_v11 = vrot.slane %v4461_v44, 2  ;;  %v4411_v53 = vadd.f32 %v4410_v35, %v4409_v1  ;;  %v4492_v40 = vmul.f32 0.125, %v4405_v36 }
 0x5ca   :  { %v4452_v7 = vrot.slane %v4451_v45, 1  ;;  %v4458_v41 = vrot.slane %v4457_v4, 1  ;;  %v4416_v21 = vrot.slane %v4415_v43, 1  ;;  %v4421_v49 = vadd.f32 %v4420_v22, %v4419_v54 }
 0x5cb   :  { %v4469_v3 = vadd.f32 %v4468_v24, %v4467_v8  ;;  %v4520_v6 = vmax.f32 %v4488_v59, 0.0  ;;  %v4463_v29 = vadd.f32 %v4462_v11, %v4461_v44  ;;  %v4493_v23 = vmul.f32 0.125, %v4411_v53 }
 0x5cc   :  { %v4523_v34 = vmax.f32 %v4491_v37, 0.0  ;;  %v4530_v26 = vmax.f32 %v7325_v20, 0.0  ;;  %v4453_v32 = vadd.f32 %v4452_v7, %v4451_v45  ;;  %v4417_v38 = vadd.f32 %v4416_v21, %v4415_v43 }
 0x5cd   :  { %v4422_v19 = vrot.slane %v4421_v49, 1  ;;  %v4459_v57 = vadd.f32 %v4458_v41, %v4457_v4  ;;  %v4470_v47 = vrot.slane %v4469_v3, 1  ;;  %v4464_v9 = vrot.slane %v4463_v29, 1 }
 0x5ce   :  { %v4603_v14 = vsel %vm1582_vm0, %v4521_v56, %v4520_v6  ;;  %v4494_v52 = vmul.f32 0.125, %v4417_v38  ;;  %v4524_v30 = vmax.f32 %v4492_v40, 0.0  ;;  %v4525_v59 = vmax.f32 %v4493_v23, 0.0 }
 0x5cf   :  { %v4423_v18 = vadd.f32 %v4422_v19, %v4421_v49  ;;  %v4604_v42 = vsel %vm1584_vm1, %v4522_v60, %v4603_v14  ;;  %v4465_v10 = vadd.f32 %v4464_v9, %v4463_v29  ;;  %v4447_v20 = vadd.f32 %v4446_v46, %v7315_v25 }
 0x5d0   :  { %v4605_v2 = vsel %vm1586_vm2, %v4523_v34, %v4604_v42  ;;  %v4500_v39 = vmul.f32 0.125, %v4453_v32  ;;  %v4526_v61 = vmax.f32 %v4494_v52, 0.0  ;;  %v4501_v51 = vmul.f32 0.125, %v4459_v57 }
 0x5d1   :  { %v4495_v17 = vmul.f32 0.125, %v4423_v18  ;;  %v4606_v50 = vsel %vm1588_vm3, %v4524_v30, %v4605_v2  ;;  %v4471_v62 = vadd.f32 %v4470_v47, %v4469_v3  ;;  %v4499_v15 = vmul.f32 0.125, %v4447_v20 }
 0x5d2   :  { %v4607_v56 = vsel %vm1590_vm4, %v4525_v59, %v4606_v50  ;;  %v4502_v13 = vmul.f32 0.125, %v4465_v10  ;;  %v4610_v25 = vsel %vm1582_vm0, %v4529_v48, %v4528_v63  ;;  %v4532_v31 = vmax.f32 %v4500_v39, 0.0  ;;  %v4735_v48 = vld [vmem:[%s7386_s2 + $0x5] ss:$0 sm:$0xff] }
 0x5d3   :  { %v4527_v16 = vmax.f32 %v4495_v17, 0.0  ;;  %v4608_v60 = vsel %vm1592_vm5, %v4526_v61, %v4607_v56  ;;  %v4503_v46 = vmul.f32 0.125, %v4471_v62  ;;  %v4531_v5 = vmax.f32 %v4499_v15, 0.0 }
 0x5d4   :  { %v4611_v58 = vsel %vm1584_vm1, %v4530_v26, %v4610_v25  ;;  %v4533_v33 = vmax.f32 %v4501_v51, 0.0  ;;  %v4534_v1 = vmax.f32 %v4502_v13, 0.0 }
 0x5d5   :  { %v4609_v28 = vsel %vm1594_vm6, %v4527_v16, %v4608_v60  ;;  %v4612_v36 = vsel %vm1586_vm2, %v4531_v5, %v4611_v58  ;;  %v4535_v8 = vmax.f32 %v4503_v46, 0.0 }
 0x5d6   :  { %5477 = vmatprep.mubr.f32.mxu1 %v4609_v28  ;;  %v4613_v0 = vsel %vm1588_vm3, %v4532_v31, %v4612_v36 }
 0x5d7   :  { %v4614_v27 = vsel %vm1590_vm4, %v4533_v33, %v4613_v0 }
 0x5d8   :  { %v4615_v12 = vsel %vm1592_vm5, %v4534_v1, %v4614_v27 }
 0x5d9   :  { %v4616_v63 = vsel %vm1594_vm6, %v4535_v8, %v4615_v12 }
 0x5da   :  { %5478 = vmatmul.mubr.f32.gmra.mrb[70].mxu1 %v4616_v63 }
 0x615   :  { %v5476_v55 = vpop.f32.mrb[68].mxu1 }
 0x616   :  { %v4693_v54 = vadd.f32 %v5476_v55, %v4735_v48  ;;  %v4687_v45 = vpop.f32.mrb[69].mxu1 }
 0x617   :  { %v4688_v44 = vadd.f32 %v4735_v48, %v4687_v45 }
 0x618   :  { %4707 = vst [vmem:[#allocation5 + $0x8] sm:$0xff] %v4693_v54 }
 0x619   :  { %4706 = vst [vmem:[#allocation5] sm:$0xff] %v4688_v44 }
 0x6ad   :  { %v5479_v35 = vpop.f32.mrb[70].mxu1 }
 0x6ae   :  { %v4703_v37 = vadd.f32 %v5479_v35, %v4735_v48  ;;  %v4697_v4 = vpop.f32.mrb[71].mxu1 }
 0x6af   :  { %v4698_v24 = vadd.f32 %v4735_v48, %v4697_v4 }
 0x6b0   :  { %4709 = vst [vmem:[#allocation5 + $0x18] sm:$0xff] %v4703_v37 }
 0x6b1   :  { %4708 = vst [vmem:[#allocation5 + $0x10] sm:$0xff] %v4698_v24 }
 0x6b2   :  { %5830 = shalt.err (!%p5827_p12)
}
 0x6b3   :  { %s5831_s29 = scalar_lea.hbm %s7387_s3, 512 }
 0x6b4   :  { %p5832_p13 = scmp.ne.s32.totalorder %s7387_s3, %s5831_s29  ;;  %p5835_p0 = scmp.lt.u32.totalorder %s5831_s29, %s7387_s3 }
 0x6b6   :  { %p5837_p1 = pnand %p5835_p0, %p5832_p13 }
 0x6b8   :  { %5840 = shalt.err (!%p5837_p1)
}
 0x6b9   :  { %4721 = dma.vmem_to_hbm [thread:$0]  %s4716_s26, 512, %s7387_s3, [#allocation4], %s5846_s22, %s5846_s22, %s5847_s23  }
 0x6ba   :  { %5843 = dma.done.wait [#allocation4], 512  }
 0x6bb   :  { %5844 = vsyncadd [#allocation4], 4294966784 }
 0x6bc   :  { %4725 = vsyncpa [#allocation3], 1 }
 0x6bd   :  { %4726 = vsyncpa [#allocation4], 1 }

</bundles_post_ra>
